<compile_context>
chip_gen: v7x
topology: tpu7x:2x2x1
jax: 0.10.0
libtpu: 0.0.40
codegen_flags: <defaults>
</compile_context>

<pallas_src>
import math
import functools

import jax
import jax.numpy as jnp
from jax.experimental import pallas as pl
from jax.experimental.pallas import tpu as pltpu


# ----------------------------- in-kernel helpers -----------------------------

def _layer_norm(x, g, b, eps=1e-5):
    mu = jnp.mean(x, axis=-1, keepdims=True)
    var = jnp.mean(jnp.square(x - mu), axis=-1, keepdims=True)
    return (x - mu) * jax.lax.rsqrt(var + eps) * g + b


def _mha_blocks(q2, k3, v3, mask, scale, nhead):
    """Multi-head attention via head-block row expansion.

    q2:   (B*Sq, E)   already-projected queries (batch folded into rows)
    k3:   (B, Skv, E) already-projected keys
    v3:   (B, Skv, E) already-projected values
    mask: (H*Sq, E)   1.0 where feature column belongs to the row-block's head
    returns (B*Sq, E) concatenated per-head outputs (PyTorch head ordering).
    """
    HS, E = mask.shape
    Sq = HS // nhead
    B = k3.shape[0]

    q3 = q2.reshape(B, Sq, E)
    # Replicate queries into H row blocks; zero out columns of other heads so
    # the full-E contraction below yields exact per-head dot products.
    qbig = jnp.broadcast_to(q3[:, None, :, :], (B, nhead, Sq, E))
    qbig = qbig.reshape(B, HS, E) * mask[None, :, :]                 # (B, H*Sq, E)

    # Per-head scores for every head at once: leading-batch einsum (MXU).
    s = jnp.einsum('bqe,bke->bqk', qbig, k3,
                   preferred_element_type=jnp.float32) * scale       # (B, H*Sq, Skv)
    s = s - jnp.max(s, axis=-1, keepdims=True)
    p = jnp.exp(s)
    p = p * pl.reciprocal(jnp.sum(p, axis=-1, keepdims=True), approx=True)

    # Weighted values for every head, then select each head's own columns.
    z = jnp.einsum('bqk,bke->bqe', p, v3,
                   preferred_element_type=jnp.float32)                # (B, H*Sq, E)
    z = z * mask[None, :, :]

    # Collapse the H row blocks back to (B, Sq, E): H-1 aligned slab adds.
    o3 = z[:, 0:Sq, :]
    for h in range(1, nhead):
        o3 = o3 + z[:, h * Sq:(h + 1) * Sq, :]
    return o3.reshape(B * Sq, E)


# ------------------------------ fused kernel ------------------------------

def fused_decoder_kernel(nhead, num_layers,
                         x_ref, mem_ref, mask_ref,
                         sa_wqkv, sa_bqkv, sa_wo, sa_bo,
                         ca_wq, ca_bq, ca_wkv, ca_bkv, ca_wo, ca_bo,
                         n1g, n1b, n2g, n2b, n3g, n3b,
                         f1w, f1b, f2w, f2b,
                         ll_w, ll_b,
                         out_ref):
    BS, E = x_ref.shape
    HS = mask_ref.shape[0]
    S = HS // nhead
    B = BS // S
    Sm = mem_ref.shape[0] // B
    dh = E // nhead
    scale = 1.0 / math.sqrt(dh)

    x = x_ref[...]                      # (B*S, E)   residual stream, VMEM-resident
    mem = mem_ref[...]                  # (B*Sm, E)
    mask = mask_ref[...]                # (H*S, E)

    # Static unroll over layers (num_layers is tiny); weights are stacked with a
    # leading L axis so this stays a single pallas_call.  For large num_layers
    # switch to lax.fori_loop with dynamic ref[l] indexing.
    for l in range(num_layers):
        # --- self attention (fused QKV projection, post-norm) ---
        qkv = jnp.dot(x, sa_wqkv[l], preferred_element_type=jnp.float32) + sa_bqkv[l]
        q = qkv[:, :E]
        k3 = qkv[:, E:2 * E].reshape(B, S, E)
        v3 = qkv[:, 2 * E:].reshape(B, S, E)
        att = _mha_blocks(q, k3, v3, mask, scale, nhead)
        att = jnp.dot(att, sa_wo[l], preferred_element_type=jnp.float32) + sa_bo[l]
        x = _layer_norm(x + att, n1g[l], n1b[l])

        # --- cross attention (fused KV projection on memory) ---
        qc = jnp.dot(x, ca_wq[l], preferred_element_type=jnp.float32) + ca_bq[l]
        kv = jnp.dot(mem, ca_wkv[l], preferred_element_type=jnp.float32) + ca_bkv[l]
        kc3 = kv[:, :E].reshape(B, Sm, E)
        vc3 = kv[:, E:].reshape(B, Sm, E)
        att = _mha_blocks(qc, kc3, vc3, mask, scale, nhead)
        att = jnp.dot(att, ca_wo[l], preferred_element_type=jnp.float32) + ca_bo[l]
        x = _layer_norm(x + att, n2g[l], n2b[l])

        # --- feed-forward (relu, dim_feedforward = 8*E) ---
        h = jnp.maximum(
            jnp.dot(x, f1w[l], preferred_element_type=jnp.float32) + f1b[l], 0.0)
        ff = jnp.dot(h, f2w[l], preferred_element_type=jnp.float32) + f2b[l]
        x = _layer_norm(x + ff, n3g[l], n3b[l])

    # --- final linear E -> dim_output ---
    out_ref[...] = (jnp.dot(x, ll_w[...], preferred_element_type=jnp.float32)
                    + ll_b[...])
    # Note: output last dim (dim_output=16) is lane-sparse, but the whole output
    # is a single ~1 KB store here; an in-kernel (B*S, O) -> (B, S*O) relayout
    # would cost more than the masked store it removes.


# ------------------------------ host-side helpers ------------------------------

def positional_encoding(S, E):
    """Scatter-free sin/cos positional encoding, precomputed once on the host."""
    position = jnp.arange(S, dtype=jnp.float32)[:, None]
    div_term = jnp.exp(jnp.arange(0, E, 2, dtype=jnp.float32) *
                       (-math.log(10000.0) / E))
    ang = position * div_term                                    # (S, E//2)
    return jnp.stack([jnp.sin(ang), jnp.cos(ang)], axis=-1).reshape(S, E)


def head_block_mask(nhead, S, E):
    """(H*S, E) mask: 1 where feature column e belongs to the head of row block h."""
    dh = E // nhead
    row_head = jnp.arange(nhead * S, dtype=jnp.int32) // S
    col_head = jnp.arange(E, dtype=jnp.int32) // dh
    return (row_head[:, None] == col_head[None, :]).astype(jnp.float32)


_WEIGHT_ORDER = ('sa_wqkv', 'sa_bqkv', 'sa_wo', 'sa_bo',
                 'ca_wq', 'ca_bq', 'ca_wkv', 'ca_bkv', 'ca_wo', 'ca_bo',
                 'n1g', 'n1b', 'n2g', 'n2b', 'n3g', 'n3b',
                 'f1w', 'f1b', 'f2w', 'f2b',
                 'll_w', 'll_b')


def discriminator_decoder_forward(tgt_sbe, mem_sbe, params, nhead):
    """tgt: (S,B,E) f32, memory: (Sm,B,E) f32 -> (S,B,dim_output). One pallas_call."""
    S, B, E = tgt_sbe.shape
    Sm = mem_sbe.shape[0]
    assert E % nhead == 0, "feature_size must be divisible by n_head"
    O = params['ll_w'].shape[-1]
    L = params['sa_wqkv'].shape[0]

    # Layout plumbing stays in the wrapper: batch-first, batch folded into rows.
    pe = positional_encoding(S, E)
    x = jnp.transpose(tgt_sbe + pe[:, None, :], (1, 0, 2)).reshape(B * S, E)
    mem = jnp.transpose(mem_sbe, (1, 0, 2)).reshape(B * Sm, E)
    mask = head_block_mask(nhead, S, E)

    weights = [params[k] for k in _WEIGHT_ORDER]
    n_in = 3 + len(weights)
    y = pl.pallas_call(
        functools.partial(fused_decoder_kernel, nhead, L),
        out_shape=jax.ShapeDtypeStruct((B * S, O), jnp.float32),
        in_specs=[pl.BlockSpec(memory_space=pltpu.MemorySpace.VMEM)] * n_in,
        out_specs=pl.BlockSpec(memory_space=pltpu.MemorySpace.VMEM),
    )(x, mem, mask, *weights)                                    # (B*S, O)
    return jnp.transpose(y.reshape(B, S, O), (1, 0, 2))          # -> (S, B, O)


# ------------------------------ parameter init ------------------------------

def init_params(key, E, num_layers, dim_output):
    """Weights stored stacked over layers and PRE-TRANSPOSED (input-major) so the
    kernel computes jnp.dot(x, w) with no in-kernel .T."""
    def u(k, shape, scale=0.1):
        return jax.random.uniform(k, shape, jnp.float32, -scale, scale)

    L = num_layers
    ks = jax.random.split(key, 8)
    return dict(
        sa_wqkv=u(ks[0], (L, E, 3 * E)), sa_bqkv=jnp.zeros((L, 1, 3 * E), jnp.float32),
        sa_wo=u(ks[1], (L, E, E)),       sa_bo=jnp.zeros((L, 1, E), jnp.float32),
        ca_wq=u(ks[2], (L, E, E)),       ca_bq=jnp.zeros((L, 1, E), jnp.float32),
        ca_wkv=u(ks[3], (L, E, 2 * E)),  ca_bkv=jnp.zeros((L, 1, 2 * E), jnp.float32),
        ca_wo=u(ks[4], (L, E, E)),       ca_bo=jnp.zeros((L, 1, E), jnp.float32),
        n1g=jnp.ones((L, 1, E), jnp.float32), n1b=jnp.zeros((L, 1, E), jnp.float32),
        n2g=jnp.ones((L, 1, E), jnp.float32), n2b=jnp.zeros((L, 1, E), jnp.float32),
        n3g=jnp.ones((L, 1, E), jnp.float32), n3b=jnp.zeros((L, 1, E), jnp.float32),
        f1w=u(ks[5], (L, E, 8 * E)),     f1b=jnp.zeros((L, 1, 8 * E), jnp.float32),
        f2w=u(ks[6], (L, 8 * E, E)),     f2b=jnp.zeros((L, 1, E), jnp.float32),
        ll_w=u(ks[7], (E, dim_output)),                      # ll.weight.uniform_(-0.1,0.1)
        ll_b=jnp.zeros((1, dim_output), jnp.float32),        # ll.bias.zero_()
    )


# ------------------------------ main ------------------------------

if __name__ == "__main__":
    cfg = {'t_d': {'feature_size': 32, 'num_layers': 2, 'dropout': 0.1,
                   'n_head': 4, 'dim_output': 16}}
    E = int(cfg['t_d']['feature_size'])
    H = int(cfg['t_d']['n_head'])
    L = int(cfg['t_d']['num_layers'])
    O = int(cfg['t_d']['dim_output'])
    S, Sm, B = 8, 8, 2

    key = jax.random.PRNGKey(0)
    k_tgt, k_mem, k_par = jax.random.split(key, 3)
    tgt = jax.random.normal(k_tgt, (S, B, E), jnp.float32)
    mem = jax.random.normal(k_mem, (Sm, B, E), jnp.float32)
    params = init_params(k_par, E, L, O)

    out = discriminator_decoder_forward(tgt, mem, params, H)
    out = jax.block_until_ready(out)
    assert out.shape == (S, B, O), out.shape
    assert bool(jnp.all(jnp.isfinite(out)))
    print("KERNEL_OK")
</pallas_src>

<mosaic_0001>
module attributes {stable_mosaic.version = 11 : i64} {
  func.func @fused_decoder_kernel(%arg0: memref<16x32xf32, #tpu.memory_space<vmem>>, %arg1: memref<16x32xf32, #tpu.memory_space<vmem>>, %arg2: memref<32x32xf32, #tpu.memory_space<vmem>>, %arg3: memref<2x32x96xf32, #tpu.memory_space<vmem>>, %arg4: memref<2x1x96xf32, #tpu.memory_space<vmem>>, %arg5: memref<2x32x32xf32, #tpu.memory_space<vmem>>, %arg6: memref<2x1x32xf32, #tpu.memory_space<vmem>>, %arg7: memref<2x32x32xf32, #tpu.memory_space<vmem>>, %arg8: memref<2x1x32xf32, #tpu.memory_space<vmem>>, %arg9: memref<2x32x64xf32, #tpu.memory_space<vmem>>, %arg10: memref<2x1x64xf32, #tpu.memory_space<vmem>>, %arg11: memref<2x32x32xf32, #tpu.memory_space<vmem>>, %arg12: memref<2x1x32xf32, #tpu.memory_space<vmem>>, %arg13: memref<2x1x32xf32, #tpu.memory_space<vmem>>, %arg14: memref<2x1x32xf32, #tpu.memory_space<vmem>>, %arg15: memref<2x1x32xf32, #tpu.memory_space<vmem>>, %arg16: memref<2x1x32xf32, #tpu.memory_space<vmem>>, %arg17: memref<2x1x32xf32, #tpu.memory_space<vmem>>, %arg18: memref<2x1x32xf32, #tpu.memory_space<vmem>>, %arg19: memref<2x32x256xf32, #tpu.memory_space<vmem>>, %arg20: memref<2x1x256xf32, #tpu.memory_space<vmem>>, %arg21: memref<2x256x32xf32, #tpu.memory_space<vmem>>, %arg22: memref<2x1x32xf32, #tpu.memory_space<vmem>>, %arg23: memref<32x16xf32, #tpu.memory_space<vmem>>, %arg24: memref<1x16xf32, #tpu.memory_space<vmem>>, %arg25: memref<16x16xf32, #tpu.memory_space<vmem>>) attributes {dimension_semantics = [], scalar_prefetch = 0 : i64, scratch_operands = 0 : i64, tpu.core_type = #tpu.core_type<tc>} {
    %c0 = arith.constant 0 : index
    %c0_0 = arith.constant 0 : index
    %0 = vector.load %arg0[%c0, %c0_0] : memref<16x32xf32, #tpu.memory_space<vmem>>, vector<16x32xf32>
    %c0_1 = arith.constant 0 : index
    %c0_2 = arith.constant 0 : index
    %1 = vector.load %arg1[%c0_1, %c0_2] : memref<16x32xf32, #tpu.memory_space<vmem>>, vector<16x32xf32>
    %c0_3 = arith.constant 0 : index
    %c0_4 = arith.constant 0 : index
    %2 = vector.load %arg2[%c0_3, %c0_4] : memref<32x32xf32, #tpu.memory_space<vmem>>, vector<32x32xf32>
    %c0_5 = arith.constant 0 : index
    %c0_6 = arith.constant 0 : index
    %c0_7 = arith.constant 0 : index
    %3 = vector.load %arg3[%c0_5, %c0_6, %c0_7] : memref<2x32x96xf32, #tpu.memory_space<vmem>>, vector<1x32x96xf32>
    %4 = vector.shape_cast %3 : vector<1x32x96xf32> to vector<32x96xf32>
    %cst = arith.constant dense<0.000000e+00> : vector<16x96xf32>
    %5 = tpu.matmul %0, %4, %cst {dimension_numbers = #tpu.dot_dimension_numbers<[1], [0], [0], [1], [0, 0, 1, 1], [], []>} : vector<16x32xf32>, vector<32x96xf32>, vector<16x96xf32> -> vector<16x96xf32>
    %c0_8 = arith.constant 0 : index
    %c0_9 = arith.constant 0 : index
    %c0_10 = arith.constant 0 : index
    %6 = vector.load %arg4[%c0_8, %c0_9, %c0_10] : memref<2x1x96xf32, #tpu.memory_space<vmem>>, vector<1x1x96xf32>
    %7 = vector.shape_cast %6 : vector<1x1x96xf32> to vector<1x96xf32>
    %8 = vector.broadcast %7 : vector<1x96xf32> to vector<16x96xf32>
    %9 = arith.addf %5, %8 : vector<16x96xf32>
    %10 = vector.extract_strided_slice %9 {offsets = [0, 0], sizes = [16, 32], strides = [1, 1]} : vector<16x96xf32> to vector<16x32xf32>
    %11 = vector.extract_strided_slice %9 {offsets = [0, 32], sizes = [16, 32], strides = [1, 1]} : vector<16x96xf32> to vector<16x32xf32>
    %12 = vector.shape_cast %11 : vector<16x32xf32> to vector<2x8x32xf32>
    %13 = vector.extract_strided_slice %9 {offsets = [0, 64], sizes = [16, 32], strides = [1, 1]} : vector<16x96xf32> to vector<16x32xf32>
    %14 = vector.shape_cast %13 : vector<16x32xf32> to vector<2x8x32xf32>
    %15 = vector.shape_cast %10 : vector<16x32xf32> to vector<2x8x32xf32>
    %16 = vector.shape_cast %15 : vector<2x8x32xf32> to vector<2x1x8x32xf32>
    %17 = vector.shape_cast %16 : vector<2x1x8x32xf32> to vector<2x1x8x32xf32>
    %18 = vector.broadcast %17 : vector<2x1x8x32xf32> to vector<2x4x8x32xf32>
    %19 = vector.shape_cast %18 : vector<2x4x8x32xf32> to vector<2x32x32xf32>
    %20 = vector.shape_cast %2 : vector<32x32xf32> to vector<1x32x32xf32>
    %21 = vector.broadcast %20 : vector<1x32x32xf32> to vector<2x32x32xf32>
    %22 = arith.mulf %19, %21 : vector<2x32x32xf32>
    "tpu.trace_start"() <{level = 10 : i32, message = "bqe,bke->bqk"}> : () -> ()
    %cst_11 = arith.constant dense<0.000000e+00> : vector<2x32x8xf32>
    %23 = tpu.matmul %22, %12, %cst_11 {dimension_numbers = #tpu.dot_dimension_numbers<[2], [2], [1], [1], [0, 0, 0, 1, 1, 1], [0], [0]>} : vector<2x32x32xf32>, vector<2x8x32xf32>, vector<2x32x8xf32> -> vector<2x32x8xf32>
    "tpu.trace_stop"() : () -> ()
    %cst_12 = arith.constant 0.353553385 : f32
    %24 = vector.broadcast %cst_12 : f32 to vector<2x32x8xf32>
    %25 = arith.mulf %23, %24 : vector<2x32x8xf32>
    %cst_13 = arith.constant dense<0xFF800000> : vector<2x32xf32>
    %26 = vector.multi_reduction <maximumf>, %25, %cst_13 [2] : vector<2x32x8xf32> to vector<2x32xf32>
    %27 = vector.shape_cast %26 : vector<2x32xf32> to vector<2x32x1xf32>
    %28 = vector.broadcast %27 : vector<2x32x1xf32> to vector<2x32x8xf32>
    %29 = arith.subf %25, %28 : vector<2x32x8xf32>
    %30 = math.exp %29 : vector<2x32x8xf32>
    %cst_14 = arith.constant dense<0.000000e+00> : vector<2x32xf32>
    %31 = vector.multi_reduction <add>, %30, %cst_14 [2] : vector<2x32x8xf32> to vector<2x32xf32>
    %32 = vector.shape_cast %31 : vector<2x32xf32> to vector<2x32x1xf32>
    %33 = tpu.reciprocal %32 {approx = true} : vector<2x32x1xf32> -> vector<2x32x1xf32>
    %34 = vector.broadcast %33 : vector<2x32x1xf32> to vector<2x32x8xf32>
    %35 = arith.mulf %30, %34 : vector<2x32x8xf32>
    "tpu.trace_start"() <{level = 10 : i32, message = "bqk,bke->bqe"}> : () -> ()
    %cst_15 = arith.constant dense<0.000000e+00> : vector<2x32x32xf32>
    %36 = tpu.matmul %35, %14, %cst_15 {dimension_numbers = #tpu.dot_dimension_numbers<[2], [1], [1], [2], [0, 0, 0, 1, 1, 2], [0], [0]>} : vector<2x32x8xf32>, vector<2x8x32xf32>, vector<2x32x32xf32> -> vector<2x32x32xf32>
    "tpu.trace_stop"() : () -> ()
    %37 = vector.shape_cast %2 : vector<32x32xf32> to vector<1x32x32xf32>
    %38 = vector.broadcast %37 : vector<1x32x32xf32> to vector<2x32x32xf32>
    %39 = arith.mulf %36, %38 : vector<2x32x32xf32>
    %40 = vector.extract_strided_slice %39 {offsets = [0, 0, 0], sizes = [2, 8, 32], strides = [1, 1, 1]} : vector<2x32x32xf32> to vector<2x8x32xf32>
    %41 = vector.extract_strided_slice %39 {offsets = [0, 8, 0], sizes = [2, 8, 32], strides = [1, 1, 1]} : vector<2x32x32xf32> to vector<2x8x32xf32>
    %42 = arith.addf %40, %41 : vector<2x8x32xf32>
    %43 = vector.extract_strided_slice %39 {offsets = [0, 16, 0], sizes = [2, 8, 32], strides = [1, 1, 1]} : vector<2x32x32xf32> to vector<2x8x32xf32>
    %44 = arith.addf %42, %43 : vector<2x8x32xf32>
    %45 = vector.extract_strided_slice %39 {offsets = [0, 24, 0], sizes = [2, 8, 32], strides = [1, 1, 1]} : vector<2x32x32xf32> to vector<2x8x32xf32>
    %46 = arith.addf %44, %45 : vector<2x8x32xf32>
    %47 = vector.shape_cast %46 : vector<2x8x32xf32> to vector<16x32xf32>
    %c0_16 = arith.constant 0 : index
    %c0_17 = arith.constant 0 : index
    %c0_18 = arith.constant 0 : index
    %48 = vector.load %arg5[%c0_16, %c0_17, %c0_18] : memref<2x32x32xf32, #tpu.memory_space<vmem>>, vector<1x32x32xf32>
    %49 = vector.shape_cast %48 : vector<1x32x32xf32> to vector<32x32xf32>
    %cst_19 = arith.constant dense<0.000000e+00> : vector<16x32xf32>
    %50 = tpu.matmul %47, %49, %cst_19 {dimension_numbers = #tpu.dot_dimension_numbers<[1], [0], [0], [1], [0, 0, 1, 1], [], []>} : vector<16x32xf32>, vector<32x32xf32>, vector<16x32xf32> -> vector<16x32xf32>
    %c0_20 = arith.constant 0 : index
    %c0_21 = arith.constant 0 : index
    %c0_22 = arith.constant 0 : index
    %51 = vector.load %arg6[%c0_20, %c0_21, %c0_22] : memref<2x1x32xf32, #tpu.memory_space<vmem>>, vector<1x1x32xf32>
    %52 = vector.shape_cast %51 : vector<1x1x32xf32> to vector<1x32xf32>
    %53 = vector.broadcast %52 : vector<1x32xf32> to vector<16x32xf32>
    %54 = arith.addf %50, %53 : vector<16x32xf32>
    %55 = arith.addf %0, %54 : vector<16x32xf32>
    %c0_23 = arith.constant 0 : index
    %c0_24 = arith.constant 0 : index
    %c0_25 = arith.constant 0 : index
    %56 = vector.load %arg13[%c0_23, %c0_24, %c0_25] : memref<2x1x32xf32, #tpu.memory_space<vmem>>, vector<1x1x32xf32>
    %57 = vector.shape_cast %56 : vector<1x1x32xf32> to vector<1x32xf32>
    %c0_26 = arith.constant 0 : index
    %c0_27 = arith.constant 0 : index
    %c0_28 = arith.constant 0 : index
    %58 = vector.load %arg14[%c0_26, %c0_27, %c0_28] : memref<2x1x32xf32, #tpu.memory_space<vmem>>, vector<1x1x32xf32>
    %59 = vector.shape_cast %58 : vector<1x1x32xf32> to vector<1x32xf32>
    %cst_29 = arith.constant dense<0.000000e+00> : vector<16xf32>
    %60 = vector.multi_reduction <add>, %55, %cst_29 [1] : vector<16x32xf32> to vector<16xf32>
    %61 = vector.shape_cast %60 : vector<16xf32> to vector<16x1xf32>
    %cst_30 = arith.constant 3.200000e+01 : f32
    %62 = vector.broadcast %cst_30 : f32 to vector<16x1xf32>
    %63 = arith.divf %61, %62 : vector<16x1xf32>
    %64 = vector.broadcast %63 : vector<16x1xf32> to vector<16x32xf32>
    %65 = arith.subf %55, %64 : vector<16x32xf32>
    %66 = arith.mulf %65, %65 : vector<16x32xf32>
    %cst_31 = arith.constant dense<0.000000e+00> : vector<16xf32>
    %67 = vector.multi_reduction <add>, %66, %cst_31 [1] : vector<16x32xf32> to vector<16xf32>
    %68 = vector.shape_cast %67 : vector<16xf32> to vector<16x1xf32>
    %cst_32 = arith.constant 3.200000e+01 : f32
    %69 = vector.broadcast %cst_32 : f32 to vector<16x1xf32>
    %70 = arith.divf %68, %69 : vector<16x1xf32>
    %71 = vector.broadcast %63 : vector<16x1xf32> to vector<16x32xf32>
    %72 = arith.subf %55, %71 : vector<16x32xf32>
    %cst_33 = arith.constant 9.99999974E-6 : f32
    %73 = vector.broadcast %cst_33 : f32 to vector<16x1xf32>
    %74 = arith.addf %70, %73 : vector<16x1xf32>
    %75 = math.rsqrt %74 : vector<16x1xf32>
    %76 = vector.broadcast %75 : vector<16x1xf32> to vector<16x32xf32>
    %77 = arith.mulf %72, %76 : vector<16x32xf32>
    %78 = vector.broadcast %57 : vector<1x32xf32> to vector<16x32xf32>
    %79 = arith.mulf %77, %78 : vector<16x32xf32>
    %80 = vector.broadcast %59 : vector<1x32xf32> to vector<16x32xf32>
    %81 = arith.addf %79, %80 : vector<16x32xf32>
    %c0_34 = arith.constant 0 : index
    %c0_35 = arith.constant 0 : index
    %c0_36 = arith.constant 0 : index
    %82 = vector.load %arg7[%c0_34, %c0_35, %c0_36] : memref<2x32x32xf32, #tpu.memory_space<vmem>>, vector<1x32x32xf32>
    %83 = vector.shape_cast %82 : vector<1x32x32xf32> to vector<32x32xf32>
    %cst_37 = arith.constant dense<0.000000e+00> : vector<16x32xf32>
    %84 = tpu.matmul %81, %83, %cst_37 {dimension_numbers = #tpu.dot_dimension_numbers<[1], [0], [0], [1], [0, 0, 1, 1], [], []>} : vector<16x32xf32>, vector<32x32xf32>, vector<16x32xf32> -> vector<16x32xf32>
    %c0_38 = arith.constant 0 : index
    %c0_39 = arith.constant 0 : index
    %c0_40 = arith.constant 0 : index
    %85 = vector.load %arg8[%c0_38, %c0_39, %c0_40] : memref<2x1x32xf32, #tpu.memory_space<vmem>>, vector<1x1x32xf32>
    %86 = vector.shape_cast %85 : vector<1x1x32xf32> to vector<1x32xf32>
    %87 = vector.broadcast %86 : vector<1x32xf32> to vector<16x32xf32>
    %88 = arith.addf %84, %87 : vector<16x32xf32>
    %c0_41 = arith.constant 0 : index
    %c0_42 = arith.constant 0 : index
    %c0_43 = arith.constant 0 : index
    %89 = vector.load %arg9[%c0_41, %c0_42, %c0_43] : memref<2x32x64xf32, #tpu.memory_space<vmem>>, vector<1x32x64xf32>
    %90 = vector.shape_cast %89 : vector<1x32x64xf32> to vector<32x64xf32>
    %cst_44 = arith.constant dense<0.000000e+00> : vector<16x64xf32>
    %91 = tpu.matmul %1, %90, %cst_44 {dimension_numbers = #tpu.dot_dimension_numbers<[1], [0], [0], [1], [0, 0, 1, 1], [], []>} : vector<16x32xf32>, vector<32x64xf32>, vector<16x64xf32> -> vector<16x64xf32>
    %c0_45 = arith.constant 0 : index
    %c0_46 = arith.constant 0 : index
    %c0_47 = arith.constant 0 : index
    %92 = vector.load %arg10[%c0_45, %c0_46, %c0_47] : memref<2x1x64xf32, #tpu.memory_space<vmem>>, vector<1x1x64xf32>
    %93 = vector.shape_cast %92 : vector<1x1x64xf32> to vector<1x64xf32>
    %94 = vector.broadcast %93 : vector<1x64xf32> to vector<16x64xf32>
    %95 = arith.addf %91, %94 : vector<16x64xf32>
    %96 = vector.extract_strided_slice %95 {offsets = [0, 0], sizes = [16, 32], strides = [1, 1]} : vector<16x64xf32> to vector<16x32xf32>
    %97 = vector.shape_cast %96 : vector<16x32xf32> to vector<2x8x32xf32>
    %98 = vector.extract_strided_slice %95 {offsets = [0, 32], sizes = [16, 32], strides = [1, 1]} : vector<16x64xf32> to vector<16x32xf32>
    %99 = vector.shape_cast %98 : vector<16x32xf32> to vector<2x8x32xf32>
    %100 = vector.shape_cast %88 : vector<16x32xf32> to vector<2x8x32xf32>
    %101 = vector.shape_cast %100 : vector<2x8x32xf32> to vector<2x1x8x32xf32>
    %102 = vector.shape_cast %101 : vector<2x1x8x32xf32> to vector<2x1x8x32xf32>
    %103 = vector.broadcast %102 : vector<2x1x8x32xf32> to vector<2x4x8x32xf32>
    %104 = vector.shape_cast %103 : vector<2x4x8x32xf32> to vector<2x32x32xf32>
    %105 = vector.shape_cast %2 : vector<32x32xf32> to vector<1x32x32xf32>
    %106 = vector.broadcast %105 : vector<1x32x32xf32> to vector<2x32x32xf32>
    %107 = arith.mulf %104, %106 : vector<2x32x32xf32>
    "tpu.trace_start"() <{level = 10 : i32, message = "bqe,bke->bqk"}> : () -> ()
    %cst_48 = arith.constant dense<0.000000e+00> : vector<2x32x8xf32>
    %108 = tpu.matmul %107, %97, %cst_48 {dimension_numbers = #tpu.dot_dimension_numbers<[2], [2], [1], [1], [0, 0, 0, 1, 1, 1], [0], [0]>} : vector<2x32x32xf32>, vector<2x8x32xf32>, vector<2x32x8xf32> -> vector<2x32x8xf32>
    "tpu.trace_stop"() : () -> ()
    %cst_49 = arith.constant 0.353553385 : f32
    %109 = vector.broadcast %cst_49 : f32 to vector<2x32x8xf32>
    %110 = arith.mulf %108, %109 : vector<2x32x8xf32>
    %cst_50 = arith.constant dense<0xFF800000> : vector<2x32xf32>
    %111 = vector.multi_reduction <maximumf>, %110, %cst_50 [2] : vector<2x32x8xf32> to vector<2x32xf32>
    %112 = vector.shape_cast %111 : vector<2x32xf32> to vector<2x32x1xf32>
    %113 = vector.broadcast %112 : vector<2x32x1xf32> to vector<2x32x8xf32>
    %114 = arith.subf %110, %113 : vector<2x32x8xf32>
    %115 = math.exp %114 : vector<2x32x8xf32>
    %cst_51 = arith.constant dense<0.000000e+00> : vector<2x32xf32>
    %116 = vector.multi_reduction <add>, %115, %cst_51 [2] : vector<2x32x8xf32> to vector<2x32xf32>
    %117 = vector.shape_cast %116 : vector<2x32xf32> to vector<2x32x1xf32>
    %118 = tpu.reciprocal %117 {approx = true} : vector<2x32x1xf32> -> vector<2x32x1xf32>
    %119 = vector.broadcast %118 : vector<2x32x1xf32> to vector<2x32x8xf32>
    %120 = arith.mulf %115, %119 : vector<2x32x8xf32>
    "tpu.trace_start"() <{level = 10 : i32, message = "bqk,bke->bqe"}> : () -> ()
    %cst_52 = arith.constant dense<0.000000e+00> : vector<2x32x32xf32>
    %121 = tpu.matmul %120, %99, %cst_52 {dimension_numbers = #tpu.dot_dimension_numbers<[2], [1], [1], [2], [0, 0, 0, 1, 1, 2], [0], [0]>} : vector<2x32x8xf32>, vector<2x8x32xf32>, vector<2x32x32xf32> -> vector<2x32x32xf32>
    "tpu.trace_stop"() : () -> ()
    %122 = vector.shape_cast %2 : vector<32x32xf32> to vector<1x32x32xf32>
    %123 = vector.broadcast %122 : vector<1x32x32xf32> to vector<2x32x32xf32>
    %124 = arith.mulf %121, %123 : vector<2x32x32xf32>
    %125 = vector.extract_strided_slice %124 {offsets = [0, 0, 0], sizes = [2, 8, 32], strides = [1, 1, 1]} : vector<2x32x32xf32> to vector<2x8x32xf32>
    %126 = vector.extract_strided_slice %124 {offsets = [0, 8, 0], sizes = [2, 8, 32], strides = [1, 1, 1]} : vector<2x32x32xf32> to vector<2x8x32xf32>
    %127 = arith.addf %125, %126 : vector<2x8x32xf32>
    %128 = vector.extract_strided_slice %124 {offsets = [0, 16, 0], sizes = [2, 8, 32], strides = [1, 1, 1]} : vector<2x32x32xf32> to vector<2x8x32xf32>
    %129 = arith.addf %127, %128 : vector<2x8x32xf32>
    %130 = vector.extract_strided_slice %124 {offsets = [0, 24, 0], sizes = [2, 8, 32], strides = [1, 1, 1]} : vector<2x32x32xf32> to vector<2x8x32xf32>
    %131 = arith.addf %129, %130 : vector<2x8x32xf32>
    %132 = vector.shape_cast %131 : vector<2x8x32xf32> to vector<16x32xf32>
    %c0_53 = arith.constant 0 : index
    %c0_54 = arith.constant 0 : index
    %c0_55 = arith.constant 0 : index
    %133 = vector.load %arg11[%c0_53, %c0_54, %c0_55] : memref<2x32x32xf32, #tpu.memory_space<vmem>>, vector<1x32x32xf32>
    %134 = vector.shape_cast %133 : vector<1x32x32xf32> to vector<32x32xf32>
    %cst_56 = arith.constant dense<0.000000e+00> : vector<16x32xf32>
    %135 = tpu.matmul %132, %134, %cst_56 {dimension_numbers = #tpu.dot_dimension_numbers<[1], [0], [0], [1], [0, 0, 1, 1], [], []>} : vector<16x32xf32>, vector<32x32xf32>, vector<16x32xf32> -> vector<16x32xf32>
    %c0_57 = arith.constant 0 : index
    %c0_58 = arith.constant 0 : index
    %c0_59 = arith.constant 0 : index
    %136 = vector.load %arg12[%c0_57, %c0_58, %c0_59] : memref<2x1x32xf32, #tpu.memory_space<vmem>>, vector<1x1x32xf32>
    %137 = vector.shape_cast %136 : vector<1x1x32xf32> to vector<1x32xf32>
    %138 = vector.broadcast %137 : vector<1x32xf32> to vector<16x32xf32>
    %139 = arith.addf %135, %138 : vector<16x32xf32>
    %140 = arith.addf %81, %139 : vector<16x32xf32>
    %c0_60 = arith.constant 0 : index
    %c0_61 = arith.constant 0 : index
    %c0_62 = arith.constant 0 : index
    %141 = vector.load %arg15[%c0_60, %c0_61, %c0_62] : memref<2x1x32xf32, #tpu.memory_space<vmem>>, vector<1x1x32xf32>
    %142 = vector.shape_cast %141 : vector<1x1x32xf32> to vector<1x32xf32>
    %c0_63 = arith.constant 0 : index
    %c0_64 = arith.constant 0 : index
    %c0_65 = arith.constant 0 : index
    %143 = vector.load %arg16[%c0_63, %c0_64, %c0_65] : memref<2x1x32xf32, #tpu.memory_space<vmem>>, vector<1x1x32xf32>
    %144 = vector.shape_cast %143 : vector<1x1x32xf32> to vector<1x32xf32>
    %cst_66 = arith.constant dense<0.000000e+00> : vector<16xf32>
    %145 = vector.multi_reduction <add>, %140, %cst_66 [1] : vector<16x32xf32> to vector<16xf32>
    %146 = vector.shape_cast %145 : vector<16xf32> to vector<16x1xf32>
    %cst_67 = arith.constant 3.200000e+01 : f32
    %147 = vector.broadcast %cst_67 : f32 to vector<16x1xf32>
    %148 = arith.divf %146, %147 : vector<16x1xf32>
    %149 = vector.broadcast %148 : vector<16x1xf32> to vector<16x32xf32>
    %150 = arith.subf %140, %149 : vector<16x32xf32>
    %151 = arith.mulf %150, %150 : vector<16x32xf32>
    %cst_68 = arith.constant dense<0.000000e+00> : vector<16xf32>
    %152 = vector.multi_reduction <add>, %151, %cst_68 [1] : vector<16x32xf32> to vector<16xf32>
    %153 = vector.shape_cast %152 : vector<16xf32> to vector<16x1xf32>
    %cst_69 = arith.constant 3.200000e+01 : f32
    %154 = vector.broadcast %cst_69 : f32 to vector<16x1xf32>
    %155 = arith.divf %153, %154 : vector<16x1xf32>
    %156 = vector.broadcast %148 : vector<16x1xf32> to vector<16x32xf32>
    %157 = arith.subf %140, %156 : vector<16x32xf32>
    %cst_70 = arith.constant 9.99999974E-6 : f32
    %158 = vector.broadcast %cst_70 : f32 to vector<16x1xf32>
    %159 = arith.addf %155, %158 : vector<16x1xf32>
    %160 = math.rsqrt %159 : vector<16x1xf32>
    %161 = vector.broadcast %160 : vector<16x1xf32> to vector<16x32xf32>
    %162 = arith.mulf %157, %161 : vector<16x32xf32>
    %163 = vector.broadcast %142 : vector<1x32xf32> to vector<16x32xf32>
    %164 = arith.mulf %162, %163 : vector<16x32xf32>
    %165 = vector.broadcast %144 : vector<1x32xf32> to vector<16x32xf32>
    %166 = arith.addf %164, %165 : vector<16x32xf32>
    %c0_71 = arith.constant 0 : index
    %c0_72 = arith.constant 0 : index
    %c0_73 = arith.constant 0 : index
    %167 = vector.load %arg19[%c0_71, %c0_72, %c0_73] : memref<2x32x256xf32, #tpu.memory_space<vmem>>, vector<1x32x256xf32>
    %168 = vector.shape_cast %167 : vector<1x32x256xf32> to vector<32x256xf32>
    %cst_74 = arith.constant dense<0.000000e+00> : vector<16x256xf32>
    %169 = tpu.matmul %166, %168, %cst_74 {dimension_numbers = #tpu.dot_dimension_numbers<[1], [0], [0], [1], [0, 0, 1, 1], [], []>} : vector<16x32xf32>, vector<32x256xf32>, vector<16x256xf32> -> vector<16x256xf32>
    %c0_75 = arith.constant 0 : index
    %c0_76 = arith.constant 0 : index
    %c0_77 = arith.constant 0 : index
    %170 = vector.load %arg20[%c0_75, %c0_76, %c0_77] : memref<2x1x256xf32, #tpu.memory_space<vmem>>, vector<1x1x256xf32>
    %171 = vector.shape_cast %170 : vector<1x1x256xf32> to vector<1x256xf32>
    %172 = vector.broadcast %171 : vector<1x256xf32> to vector<16x256xf32>
    %173 = arith.addf %169, %172 : vector<16x256xf32>
    %cst_78 = arith.constant 0.000000e+00 : f32
    %174 = vector.broadcast %cst_78 : f32 to vector<16x256xf32>
    %175 = arith.maximumf %173, %174 : vector<16x256xf32>
    %c0_79 = arith.constant 0 : index
    %c0_80 = arith.constant 0 : index
    %c0_81 = arith.constant 0 : index
    %176 = vector.load %arg21[%c0_79, %c0_80, %c0_81] : memref<2x256x32xf32, #tpu.memory_space<vmem>>, vector<1x256x32xf32>
    %177 = vector.shape_cast %176 : vector<1x256x32xf32> to vector<256x32xf32>
    %cst_82 = arith.constant dense<0.000000e+00> : vector<16x32xf32>
    %178 = tpu.matmul %175, %177, %cst_82 {dimension_numbers = #tpu.dot_dimension_numbers<[1], [0], [0], [1], [0, 0, 1, 1], [], []>} : vector<16x256xf32>, vector<256x32xf32>, vector<16x32xf32> -> vector<16x32xf32>
    %c0_83 = arith.constant 0 : index
    %c0_84 = arith.constant 0 : index
    %c0_85 = arith.constant 0 : index
    %179 = vector.load %arg22[%c0_83, %c0_84, %c0_85] : memref<2x1x32xf32, #tpu.memory_space<vmem>>, vector<1x1x32xf32>
    %180 = vector.shape_cast %179 : vector<1x1x32xf32> to vector<1x32xf32>
    %181 = vector.broadcast %180 : vector<1x32xf32> to vector<16x32xf32>
    %182 = arith.addf %178, %181 : vector<16x32xf32>
    %183 = arith.addf %166, %182 : vector<16x32xf32>
    %c0_86 = arith.constant 0 : index
    %c0_87 = arith.constant 0 : index
    %c0_88 = arith.constant 0 : index
    %184 = vector.load %arg17[%c0_86, %c0_87, %c0_88] : memref<2x1x32xf32, #tpu.memory_space<vmem>>, vector<1x1x32xf32>
    %185 = vector.shape_cast %184 : vector<1x1x32xf32> to vector<1x32xf32>
    %c0_89 = arith.constant 0 : index
    %c0_90 = arith.constant 0 : index
    %c0_91 = arith.constant 0 : index
    %186 = vector.load %arg18[%c0_89, %c0_90, %c0_91] : memref<2x1x32xf32, #tpu.memory_space<vmem>>, vector<1x1x32xf32>
    %187 = vector.shape_cast %186 : vector<1x1x32xf32> to vector<1x32xf32>
    %cst_92 = arith.constant dense<0.000000e+00> : vector<16xf32>
    %188 = vector.multi_reduction <add>, %183, %cst_92 [1] : vector<16x32xf32> to vector<16xf32>
    %189 = vector.shape_cast %188 : vector<16xf32> to vector<16x1xf32>
    %cst_93 = arith.constant 3.200000e+01 : f32
    %190 = vector.broadcast %cst_93 : f32 to vector<16x1xf32>
    %191 = arith.divf %189, %190 : vector<16x1xf32>
    %192 = vector.broadcast %191 : vector<16x1xf32> to vector<16x32xf32>
    %193 = arith.subf %183, %192 : vector<16x32xf32>
    %194 = arith.mulf %193, %193 : vector<16x32xf32>
    %cst_94 = arith.constant dense<0.000000e+00> : vector<16xf32>
    %195 = vector.multi_reduction <add>, %194, %cst_94 [1] : vector<16x32xf32> to vector<16xf32>
    %196 = vector.shape_cast %195 : vector<16xf32> to vector<16x1xf32>
    %cst_95 = arith.constant 3.200000e+01 : f32
    %197 = vector.broadcast %cst_95 : f32 to vector<16x1xf32>
    %198 = arith.divf %196, %197 : vector<16x1xf32>
    %199 = vector.broadcast %191 : vector<16x1xf32> to vector<16x32xf32>
    %200 = arith.subf %183, %199 : vector<16x32xf32>
    %cst_96 = arith.constant 9.99999974E-6 : f32
    %201 = vector.broadcast %cst_96 : f32 to vector<16x1xf32>
    %202 = arith.addf %198, %201 : vector<16x1xf32>
    %203 = math.rsqrt %202 : vector<16x1xf32>
    %204 = vector.broadcast %203 : vector<16x1xf32> to vector<16x32xf32>
    %205 = arith.mulf %200, %204 : vector<16x32xf32>
    %206 = vector.broadcast %185 : vector<1x32xf32> to vector<16x32xf32>
    %207 = arith.mulf %205, %206 : vector<16x32xf32>
    %208 = vector.broadcast %187 : vector<1x32xf32> to vector<16x32xf32>
    %209 = arith.addf %207, %208 : vector<16x32xf32>
    %c1 = arith.constant 1 : index
    %c0_97 = arith.constant 0 : index
    %c0_98 = arith.constant 0 : index
    %210 = vector.load %arg3[%c1, %c0_97, %c0_98] : memref<2x32x96xf32, #tpu.memory_space<vmem>>, vector<1x32x96xf32>
    %211 = vector.shape_cast %210 : vector<1x32x96xf32> to vector<32x96xf32>
    %cst_99 = arith.constant dense<0.000000e+00> : vector<16x96xf32>
    %212 = tpu.matmul %209, %211, %cst_99 {dimension_numbers = #tpu.dot_dimension_numbers<[1], [0], [0], [1], [0, 0, 1, 1], [], []>} : vector<16x32xf32>, vector<32x96xf32>, vector<16x96xf32> -> vector<16x96xf32>
    %c1_100 = arith.constant 1 : index
    %c0_101 = arith.constant 0 : index
    %c0_102 = arith.constant 0 : index
    %213 = vector.load %arg4[%c1_100, %c0_101, %c0_102] : memref<2x1x96xf32, #tpu.memory_space<vmem>>, vector<1x1x96xf32>
    %214 = vector.shape_cast %213 : vector<1x1x96xf32> to vector<1x96xf32>
    %215 = vector.broadcast %214 : vector<1x96xf32> to vector<16x96xf32>
    %216 = arith.addf %212, %215 : vector<16x96xf32>
    %217 = vector.extract_strided_slice %216 {offsets = [0, 0], sizes = [16, 32], strides = [1, 1]} : vector<16x96xf32> to vector<16x32xf32>
    %218 = vector.extract_strided_slice %216 {offsets = [0, 32], sizes = [16, 32], strides = [1, 1]} : vector<16x96xf32> to vector<16x32xf32>
    %219 = vector.shape_cast %218 : vector<16x32xf32> to vector<2x8x32xf32>
    %220 = vector.extract_strided_slice %216 {offsets = [0, 64], sizes = [16, 32], strides = [1, 1]} : vector<16x96xf32> to vector<16x32xf32>
    %221 = vector.shape_cast %220 : vector<16x32xf32> to vector<2x8x32xf32>
    %222 = vector.shape_cast %217 : vector<16x32xf32> to vector<2x8x32xf32>
    %223 = vector.shape_cast %222 : vector<2x8x32xf32> to vector<2x1x8x32xf32>
    %224 = vector.shape_cast %223 : vector<2x1x8x32xf32> to vector<2x1x8x32xf32>
    %225 = vector.broadcast %224 : vector<2x1x8x32xf32> to vector<2x4x8x32xf32>
    %226 = vector.shape_cast %225 : vector<2x4x8x32xf32> to vector<2x32x32xf32>
    %227 = vector.shape_cast %2 : vector<32x32xf32> to vector<1x32x32xf32>
    %228 = vector.broadcast %227 : vector<1x32x32xf32> to vector<2x32x32xf32>
    %229 = arith.mulf %226, %228 : vector<2x32x32xf32>
    "tpu.trace_start"() <{level = 10 : i32, message = "bqe,bke->bqk"}> : () -> ()
    %cst_103 = arith.constant dense<0.000000e+00> : vector<2x32x8xf32>
    %230 = tpu.matmul %229, %219, %cst_103 {dimension_numbers = #tpu.dot_dimension_numbers<[2], [2], [1], [1], [0, 0, 0, 1, 1, 1], [0], [0]>} : vector<2x32x32xf32>, vector<2x8x32xf32>, vector<2x32x8xf32> -> vector<2x32x8xf32>
    "tpu.trace_stop"() : () -> ()
    %cst_104 = arith.constant 0.353553385 : f32
    %231 = vector.broadcast %cst_104 : f32 to vector<2x32x8xf32>
    %232 = arith.mulf %230, %231 : vector<2x32x8xf32>
    %cst_105 = arith.constant dense<0xFF800000> : vector<2x32xf32>
    %233 = vector.multi_reduction <maximumf>, %232, %cst_105 [2] : vector<2x32x8xf32> to vector<2x32xf32>
    %234 = vector.shape_cast %233 : vector<2x32xf32> to vector<2x32x1xf32>
    %235 = vector.broadcast %234 : vector<2x32x1xf32> to vector<2x32x8xf32>
    %236 = arith.subf %232, %235 : vector<2x32x8xf32>
    %237 = math.exp %236 : vector<2x32x8xf32>
    %cst_106 = arith.constant dense<0.000000e+00> : vector<2x32xf32>
    %238 = vector.multi_reduction <add>, %237, %cst_106 [2] : vector<2x32x8xf32> to vector<2x32xf32>
    %239 = vector.shape_cast %238 : vector<2x32xf32> to vector<2x32x1xf32>
    %240 = tpu.reciprocal %239 {approx = true} : vector<2x32x1xf32> -> vector<2x32x1xf32>
    %241 = vector.broadcast %240 : vector<2x32x1xf32> to vector<2x32x8xf32>
    %242 = arith.mulf %237, %241 : vector<2x32x8xf32>
    "tpu.trace_start"() <{level = 10 : i32, message = "bqk,bke->bqe"}> : () -> ()
    %cst_107 = arith.constant dense<0.000000e+00> : vector<2x32x32xf32>
    %243 = tpu.matmul %242, %221, %cst_107 {dimension_numbers = #tpu.dot_dimension_numbers<[2], [1], [1], [2], [0, 0, 0, 1, 1, 2], [0], [0]>} : vector<2x32x8xf32>, vector<2x8x32xf32>, vector<2x32x32xf32> -> vector<2x32x32xf32>
    "tpu.trace_stop"() : () -> ()
    %244 = vector.shape_cast %2 : vector<32x32xf32> to vector<1x32x32xf32>
    %245 = vector.broadcast %244 : vector<1x32x32xf32> to vector<2x32x32xf32>
    %246 = arith.mulf %243, %245 : vector<2x32x32xf32>
    %247 = vector.extract_strided_slice %246 {offsets = [0, 0, 0], sizes = [2, 8, 32], strides = [1, 1, 1]} : vector<2x32x32xf32> to vector<2x8x32xf32>
    %248 = vector.extract_strided_slice %246 {offsets = [0, 8, 0], sizes = [2, 8, 32], strides = [1, 1, 1]} : vector<2x32x32xf32> to vector<2x8x32xf32>
    %249 = arith.addf %247, %248 : vector<2x8x32xf32>
    %250 = vector.extract_strided_slice %246 {offsets = [0, 16, 0], sizes = [2, 8, 32], strides = [1, 1, 1]} : vector<2x32x32xf32> to vector<2x8x32xf32>
    %251 = arith.addf %249, %250 : vector<2x8x32xf32>
    %252 = vector.extract_strided_slice %246 {offsets = [0, 24, 0], sizes = [2, 8, 32], strides = [1, 1, 1]} : vector<2x32x32xf32> to vector<2x8x32xf32>
    %253 = arith.addf %251, %252 : vector<2x8x32xf32>
    %254 = vector.shape_cast %253 : vector<2x8x32xf32> to vector<16x32xf32>
    %c1_108 = arith.constant 1 : index
    %c0_109 = arith.constant 0 : index
    %c0_110 = arith.constant 0 : index
    %255 = vector.load %arg5[%c1_108, %c0_109, %c0_110] : memref<2x32x32xf32, #tpu.memory_space<vmem>>, vector<1x32x32xf32>
    %256 = vector.shape_cast %255 : vector<1x32x32xf32> to vector<32x32xf32>
    %cst_111 = arith.constant dense<0.000000e+00> : vector<16x32xf32>
    %257 = tpu.matmul %254, %256, %cst_111 {dimension_numbers = #tpu.dot_dimension_numbers<[1], [0], [0], [1], [0, 0, 1, 1], [], []>} : vector<16x32xf32>, vector<32x32xf32>, vector<16x32xf32> -> vector<16x32xf32>
    %c1_112 = arith.constant 1 : index
    %c0_113 = arith.constant 0 : index
    %c0_114 = arith.constant 0 : index
    %258 = vector.load %arg6[%c1_112, %c0_113, %c0_114] : memref<2x1x32xf32, #tpu.memory_space<vmem>>, vector<1x1x32xf32>
    %259 = vector.shape_cast %258 : vector<1x1x32xf32> to vector<1x32xf32>
    %260 = vector.broadcast %259 : vector<1x32xf32> to vector<16x32xf32>
    %261 = arith.addf %257, %260 : vector<16x32xf32>
    %262 = arith.addf %209, %261 : vector<16x32xf32>
    %c1_115 = arith.constant 1 : index
    %c0_116 = arith.constant 0 : index
    %c0_117 = arith.constant 0 : index
    %263 = vector.load %arg13[%c1_115, %c0_116, %c0_117] : memref<2x1x32xf32, #tpu.memory_space<vmem>>, vector<1x1x32xf32>
    %264 = vector.shape_cast %263 : vector<1x1x32xf32> to vector<1x32xf32>
    %c1_118 = arith.constant 1 : index
    %c0_119 = arith.constant 0 : index
    %c0_120 = arith.constant 0 : index
    %265 = vector.load %arg14[%c1_118, %c0_119, %c0_120] : memref<2x1x32xf32, #tpu.memory_space<vmem>>, vector<1x1x32xf32>
    %266 = vector.shape_cast %265 : vector<1x1x32xf32> to vector<1x32xf32>
    %cst_121 = arith.constant dense<0.000000e+00> : vector<16xf32>
    %267 = vector.multi_reduction <add>, %262, %cst_121 [1] : vector<16x32xf32> to vector<16xf32>
    %268 = vector.shape_cast %267 : vector<16xf32> to vector<16x1xf32>
    %cst_122 = arith.constant 3.200000e+01 : f32
    %269 = vector.broadcast %cst_122 : f32 to vector<16x1xf32>
    %270 = arith.divf %268, %269 : vector<16x1xf32>
    %271 = vector.broadcast %270 : vector<16x1xf32> to vector<16x32xf32>
    %272 = arith.subf %262, %271 : vector<16x32xf32>
    %273 = arith.mulf %272, %272 : vector<16x32xf32>
    %cst_123 = arith.constant dense<0.000000e+00> : vector<16xf32>
    %274 = vector.multi_reduction <add>, %273, %cst_123 [1] : vector<16x32xf32> to vector<16xf32>
    %275 = vector.shape_cast %274 : vector<16xf32> to vector<16x1xf32>
    %cst_124 = arith.constant 3.200000e+01 : f32
    %276 = vector.broadcast %cst_124 : f32 to vector<16x1xf32>
    %277 = arith.divf %275, %276 : vector<16x1xf32>
    %278 = vector.broadcast %270 : vector<16x1xf32> to vector<16x32xf32>
    %279 = arith.subf %262, %278 : vector<16x32xf32>
    %cst_125 = arith.constant 9.99999974E-6 : f32
    %280 = vector.broadcast %cst_125 : f32 to vector<16x1xf32>
    %281 = arith.addf %277, %280 : vector<16x1xf32>
    %282 = math.rsqrt %281 : vector<16x1xf32>
    %283 = vector.broadcast %282 : vector<16x1xf32> to vector<16x32xf32>
    %284 = arith.mulf %279, %283 : vector<16x32xf32>
    %285 = vector.broadcast %264 : vector<1x32xf32> to vector<16x32xf32>
    %286 = arith.mulf %284, %285 : vector<16x32xf32>
    %287 = vector.broadcast %266 : vector<1x32xf32> to vector<16x32xf32>
    %288 = arith.addf %286, %287 : vector<16x32xf32>
    %c1_126 = arith.constant 1 : index
    %c0_127 = arith.constant 0 : index
    %c0_128 = arith.constant 0 : index
    %289 = vector.load %arg7[%c1_126, %c0_127, %c0_128] : memref<2x32x32xf32, #tpu.memory_space<vmem>>, vector<1x32x32xf32>
    %290 = vector.shape_cast %289 : vector<1x32x32xf32> to vector<32x32xf32>
    %cst_129 = arith.constant dense<0.000000e+00> : vector<16x32xf32>
    %291 = tpu.matmul %288, %290, %cst_129 {dimension_numbers = #tpu.dot_dimension_numbers<[1], [0], [0], [1], [0, 0, 1, 1], [], []>} : vector<16x32xf32>, vector<32x32xf32>, vector<16x32xf32> -> vector<16x32xf32>
    %c1_130 = arith.constant 1 : index
    %c0_131 = arith.constant 0 : index
    %c0_132 = arith.constant 0 : index
    %292 = vector.load %arg8[%c1_130, %c0_131, %c0_132] : memref<2x1x32xf32, #tpu.memory_space<vmem>>, vector<1x1x32xf32>
    %293 = vector.shape_cast %292 : vector<1x1x32xf32> to vector<1x32xf32>
    %294 = vector.broadcast %293 : vector<1x32xf32> to vector<16x32xf32>
    %295 = arith.addf %291, %294 : vector<16x32xf32>
    %c1_133 = arith.constant 1 : index
    %c0_134 = arith.constant 0 : index
    %c0_135 = arith.constant 0 : index
    %296 = vector.load %arg9[%c1_133, %c0_134, %c0_135] : memref<2x32x64xf32, #tpu.memory_space<vmem>>, vector<1x32x64xf32>
    %297 = vector.shape_cast %296 : vector<1x32x64xf32> to vector<32x64xf32>
    %cst_136 = arith.constant dense<0.000000e+00> : vector<16x64xf32>
    %298 = tpu.matmul %1, %297, %cst_136 {dimension_numbers = #tpu.dot_dimension_numbers<[1], [0], [0], [1], [0, 0, 1, 1], [], []>} : vector<16x32xf32>, vector<32x64xf32>, vector<16x64xf32> -> vector<16x64xf32>
    %c1_137 = arith.constant 1 : index
    %c0_138 = arith.constant 0 : index
    %c0_139 = arith.constant 0 : index
    %299 = vector.load %arg10[%c1_137, %c0_138, %c0_139] : memref<2x1x64xf32, #tpu.memory_space<vmem>>, vector<1x1x64xf32>
    %300 = vector.shape_cast %299 : vector<1x1x64xf32> to vector<1x64xf32>
    %301 = vector.broadcast %300 : vector<1x64xf32> to vector<16x64xf32>
    %302 = arith.addf %298, %301 : vector<16x64xf32>
    %303 = vector.extract_strided_slice %302 {offsets = [0, 0], sizes = [16, 32], strides = [1, 1]} : vector<16x64xf32> to vector<16x32xf32>
    %304 = vector.shape_cast %303 : vector<16x32xf32> to vector<2x8x32xf32>
    %305 = vector.extract_strided_slice %302 {offsets = [0, 32], sizes = [16, 32], strides = [1, 1]} : vector<16x64xf32> to vector<16x32xf32>
    %306 = vector.shape_cast %305 : vector<16x32xf32> to vector<2x8x32xf32>
    %307 = vector.shape_cast %295 : vector<16x32xf32> to vector<2x8x32xf32>
    %308 = vector.shape_cast %307 : vector<2x8x32xf32> to vector<2x1x8x32xf32>
    %309 = vector.shape_cast %308 : vector<2x1x8x32xf32> to vector<2x1x8x32xf32>
    %310 = vector.broadcast %309 : vector<2x1x8x32xf32> to vector<2x4x8x32xf32>
    %311 = vector.shape_cast %310 : vector<2x4x8x32xf32> to vector<2x32x32xf32>
    %312 = vector.shape_cast %2 : vector<32x32xf32> to vector<1x32x32xf32>
    %313 = vector.broadcast %312 : vector<1x32x32xf32> to vector<2x32x32xf32>
    %314 = arith.mulf %311, %313 : vector<2x32x32xf32>
    "tpu.trace_start"() <{level = 10 : i32, message = "bqe,bke->bqk"}> : () -> ()
    %cst_140 = arith.constant dense<0.000000e+00> : vector<2x32x8xf32>
    %315 = tpu.matmul %314, %304, %cst_140 {dimension_numbers = #tpu.dot_dimension_numbers<[2], [2], [1], [1], [0, 0, 0, 1, 1, 1], [0], [0]>} : vector<2x32x32xf32>, vector<2x8x32xf32>, vector<2x32x8xf32> -> vector<2x32x8xf32>
    "tpu.trace_stop"() : () -> ()
    %cst_141 = arith.constant 0.353553385 : f32
    %316 = vector.broadcast %cst_141 : f32 to vector<2x32x8xf32>
    %317 = arith.mulf %315, %316 : vector<2x32x8xf32>
    %cst_142 = arith.constant dense<0xFF800000> : vector<2x32xf32>
    %318 = vector.multi_reduction <maximumf>, %317, %cst_142 [2] : vector<2x32x8xf32> to vector<2x32xf32>
    %319 = vector.shape_cast %318 : vector<2x32xf32> to vector<2x32x1xf32>
    %320 = vector.broadcast %319 : vector<2x32x1xf32> to vector<2x32x8xf32>
    %321 = arith.subf %317, %320 : vector<2x32x8xf32>
    %322 = math.exp %321 : vector<2x32x8xf32>
    %cst_143 = arith.constant dense<0.000000e+00> : vector<2x32xf32>
    %323 = vector.multi_reduction <add>, %322, %cst_143 [2] : vector<2x32x8xf32> to vector<2x32xf32>
    %324 = vector.shape_cast %323 : vector<2x32xf32> to vector<2x32x1xf32>
    %325 = tpu.reciprocal %324 {approx = true} : vector<2x32x1xf32> -> vector<2x32x1xf32>
    %326 = vector.broadcast %325 : vector<2x32x1xf32> to vector<2x32x8xf32>
    %327 = arith.mulf %322, %326 : vector<2x32x8xf32>
    "tpu.trace_start"() <{level = 10 : i32, message = "bqk,bke->bqe"}> : () -> ()
    %cst_144 = arith.constant dense<0.000000e+00> : vector<2x32x32xf32>
    %328 = tpu.matmul %327, %306, %cst_144 {dimension_numbers = #tpu.dot_dimension_numbers<[2], [1], [1], [2], [0, 0, 0, 1, 1, 2], [0], [0]>} : vector<2x32x8xf32>, vector<2x8x32xf32>, vector<2x32x32xf32> -> vector<2x32x32xf32>
    "tpu.trace_stop"() : () -> ()
    %329 = vector.shape_cast %2 : vector<32x32xf32> to vector<1x32x32xf32>
    %330 = vector.broadcast %329 : vector<1x32x32xf32> to vector<2x32x32xf32>
    %331 = arith.mulf %328, %330 : vector<2x32x32xf32>
    %332 = vector.extract_strided_slice %331 {offsets = [0, 0, 0], sizes = [2, 8, 32], strides = [1, 1, 1]} : vector<2x32x32xf32> to vector<2x8x32xf32>
    %333 = vector.extract_strided_slice %331 {offsets = [0, 8, 0], sizes = [2, 8, 32], strides = [1, 1, 1]} : vector<2x32x32xf32> to vector<2x8x32xf32>
    %334 = arith.addf %332, %333 : vector<2x8x32xf32>
    %335 = vector.extract_strided_slice %331 {offsets = [0, 16, 0], sizes = [2, 8, 32], strides = [1, 1, 1]} : vector<2x32x32xf32> to vector<2x8x32xf32>
    %336 = arith.addf %334, %335 : vector<2x8x32xf32>
    %337 = vector.extract_strided_slice %331 {offsets = [0, 24, 0], sizes = [2, 8, 32], strides = [1, 1, 1]} : vector<2x32x32xf32> to vector<2x8x32xf32>
    %338 = arith.addf %336, %337 : vector<2x8x32xf32>
    %339 = vector.shape_cast %338 : vector<2x8x32xf32> to vector<16x32xf32>
    %c1_145 = arith.constant 1 : index
    %c0_146 = arith.constant 0 : index
    %c0_147 = arith.constant 0 : index
    %340 = vector.load %arg11[%c1_145, %c0_146, %c0_147] : memref<2x32x32xf32, #tpu.memory_space<vmem>>, vector<1x32x32xf32>
    %341 = vector.shape_cast %340 : vector<1x32x32xf32> to vector<32x32xf32>
    %cst_148 = arith.constant dense<0.000000e+00> : vector<16x32xf32>
    %342 = tpu.matmul %339, %341, %cst_148 {dimension_numbers = #tpu.dot_dimension_numbers<[1], [0], [0], [1], [0, 0, 1, 1], [], []>} : vector<16x32xf32>, vector<32x32xf32>, vector<16x32xf32> -> vector<16x32xf32>
    %c1_149 = arith.constant 1 : index
    %c0_150 = arith.constant 0 : index
    %c0_151 = arith.constant 0 : index
    %343 = vector.load %arg12[%c1_149, %c0_150, %c0_151] : memref<2x1x32xf32, #tpu.memory_space<vmem>>, vector<1x1x32xf32>
    %344 = vector.shape_cast %343 : vector<1x1x32xf32> to vector<1x32xf32>
    %345 = vector.broadcast %344 : vector<1x32xf32> to vector<16x32xf32>
    %346 = arith.addf %342, %345 : vector<16x32xf32>
    %347 = arith.addf %288, %346 : vector<16x32xf32>
    %c1_152 = arith.constant 1 : index
    %c0_153 = arith.constant 0 : index
    %c0_154 = arith.constant 0 : index
    %348 = vector.load %arg15[%c1_152, %c0_153, %c0_154] : memref<2x1x32xf32, #tpu.memory_space<vmem>>, vector<1x1x32xf32>
    %349 = vector.shape_cast %348 : vector<1x1x32xf32> to vector<1x32xf32>
    %c1_155 = arith.constant 1 : index
    %c0_156 = arith.constant 0 : index
    %c0_157 = arith.constant 0 : index
    %350 = vector.load %arg16[%c1_155, %c0_156, %c0_157] : memref<2x1x32xf32, #tpu.memory_space<vmem>>, vector<1x1x32xf32>
    %351 = vector.shape_cast %350 : vector<1x1x32xf32> to vector<1x32xf32>
    %cst_158 = arith.constant dense<0.000000e+00> : vector<16xf32>
    %352 = vector.multi_reduction <add>, %347, %cst_158 [1] : vector<16x32xf32> to vector<16xf32>
    %353 = vector.shape_cast %352 : vector<16xf32> to vector<16x1xf32>
    %cst_159 = arith.constant 3.200000e+01 : f32
    %354 = vector.broadcast %cst_159 : f32 to vector<16x1xf32>
    %355 = arith.divf %353, %354 : vector<16x1xf32>
    %356 = vector.broadcast %355 : vector<16x1xf32> to vector<16x32xf32>
    %357 = arith.subf %347, %356 : vector<16x32xf32>
    %358 = arith.mulf %357, %357 : vector<16x32xf32>
    %cst_160 = arith.constant dense<0.000000e+00> : vector<16xf32>
    %359 = vector.multi_reduction <add>, %358, %cst_160 [1] : vector<16x32xf32> to vector<16xf32>
    %360 = vector.shape_cast %359 : vector<16xf32> to vector<16x1xf32>
    %cst_161 = arith.constant 3.200000e+01 : f32
    %361 = vector.broadcast %cst_161 : f32 to vector<16x1xf32>
    %362 = arith.divf %360, %361 : vector<16x1xf32>
    %363 = vector.broadcast %355 : vector<16x1xf32> to vector<16x32xf32>
    %364 = arith.subf %347, %363 : vector<16x32xf32>
    %cst_162 = arith.constant 9.99999974E-6 : f32
    %365 = vector.broadcast %cst_162 : f32 to vector<16x1xf32>
    %366 = arith.addf %362, %365 : vector<16x1xf32>
    %367 = math.rsqrt %366 : vector<16x1xf32>
    %368 = vector.broadcast %367 : vector<16x1xf32> to vector<16x32xf32>
    %369 = arith.mulf %364, %368 : vector<16x32xf32>
    %370 = vector.broadcast %349 : vector<1x32xf32> to vector<16x32xf32>
    %371 = arith.mulf %369, %370 : vector<16x32xf32>
    %372 = vector.broadcast %351 : vector<1x32xf32> to vector<16x32xf32>
    %373 = arith.addf %371, %372 : vector<16x32xf32>
    %c1_163 = arith.constant 1 : index
    %c0_164 = arith.constant 0 : index
    %c0_165 = arith.constant 0 : index
    %374 = vector.load %arg19[%c1_163, %c0_164, %c0_165] : memref<2x32x256xf32, #tpu.memory_space<vmem>>, vector<1x32x256xf32>
    %375 = vector.shape_cast %374 : vector<1x32x256xf32> to vector<32x256xf32>
    %cst_166 = arith.constant dense<0.000000e+00> : vector<16x256xf32>
    %376 = tpu.matmul %373, %375, %cst_166 {dimension_numbers = #tpu.dot_dimension_numbers<[1], [0], [0], [1], [0, 0, 1, 1], [], []>} : vector<16x32xf32>, vector<32x256xf32>, vector<16x256xf32> -> vector<16x256xf32>
    %c1_167 = arith.constant 1 : index
    %c0_168 = arith.constant 0 : index
    %c0_169 = arith.constant 0 : index
    %377 = vector.load %arg20[%c1_167, %c0_168, %c0_169] : memref<2x1x256xf32, #tpu.memory_space<vmem>>, vector<1x1x256xf32>
    %378 = vector.shape_cast %377 : vector<1x1x256xf32> to vector<1x256xf32>
    %379 = vector.broadcast %378 : vector<1x256xf32> to vector<16x256xf32>
    %380 = arith.addf %376, %379 : vector<16x256xf32>
    %cst_170 = arith.constant 0.000000e+00 : f32
    %381 = vector.broadcast %cst_170 : f32 to vector<16x256xf32>
    %382 = arith.maximumf %380, %381 : vector<16x256xf32>
    %c1_171 = arith.constant 1 : index
    %c0_172 = arith.constant 0 : index
    %c0_173 = arith.constant 0 : index
    %383 = vector.load %arg21[%c1_171, %c0_172, %c0_173] : memref<2x256x32xf32, #tpu.memory_space<vmem>>, vector<1x256x32xf32>
    %384 = vector.shape_cast %383 : vector<1x256x32xf32> to vector<256x32xf32>
    %cst_174 = arith.constant dense<0.000000e+00> : vector<16x32xf32>
    %385 = tpu.matmul %382, %384, %cst_174 {dimension_numbers = #tpu.dot_dimension_numbers<[1], [0], [0], [1], [0, 0, 1, 1], [], []>} : vector<16x256xf32>, vector<256x32xf32>, vector<16x32xf32> -> vector<16x32xf32>
    %c1_175 = arith.constant 1 : index
    %c0_176 = arith.constant 0 : index
    %c0_177 = arith.constant 0 : index
    %386 = vector.load %arg22[%c1_175, %c0_176, %c0_177] : memref<2x1x32xf32, #tpu.memory_space<vmem>>, vector<1x1x32xf32>
    %387 = vector.shape_cast %386 : vector<1x1x32xf32> to vector<1x32xf32>
    %388 = vector.broadcast %387 : vector<1x32xf32> to vector<16x32xf32>
    %389 = arith.addf %385, %388 : vector<16x32xf32>
    %390 = arith.addf %373, %389 : vector<16x32xf32>
    %c1_178 = arith.constant 1 : index
    %c0_179 = arith.constant 0 : index
    %c0_180 = arith.constant 0 : index
    %391 = vector.load %arg17[%c1_178, %c0_179, %c0_180] : memref<2x1x32xf32, #tpu.memory_space<vmem>>, vector<1x1x32xf32>
    %392 = vector.shape_cast %391 : vector<1x1x32xf32> to vector<1x32xf32>
    %c1_181 = arith.constant 1 : index
    %c0_182 = arith.constant 0 : index
    %c0_183 = arith.constant 0 : index
    %393 = vector.load %arg18[%c1_181, %c0_182, %c0_183] : memref<2x1x32xf32, #tpu.memory_space<vmem>>, vector<1x1x32xf32>
    %394 = vector.shape_cast %393 : vector<1x1x32xf32> to vector<1x32xf32>
    %cst_184 = arith.constant dense<0.000000e+00> : vector<16xf32>
    %395 = vector.multi_reduction <add>, %390, %cst_184 [1] : vector<16x32xf32> to vector<16xf32>
    %396 = vector.shape_cast %395 : vector<16xf32> to vector<16x1xf32>
    %cst_185 = arith.constant 3.200000e+01 : f32
    %397 = vector.broadcast %cst_185 : f32 to vector<16x1xf32>
    %398 = arith.divf %396, %397 : vector<16x1xf32>
    %399 = vector.broadcast %398 : vector<16x1xf32> to vector<16x32xf32>
    %400 = arith.subf %390, %399 : vector<16x32xf32>
    %401 = arith.mulf %400, %400 : vector<16x32xf32>
    %cst_186 = arith.constant dense<0.000000e+00> : vector<16xf32>
    %402 = vector.multi_reduction <add>, %401, %cst_186 [1] : vector<16x32xf32> to vector<16xf32>
    %403 = vector.shape_cast %402 : vector<16xf32> to vector<16x1xf32>
    %cst_187 = arith.constant 3.200000e+01 : f32
    %404 = vector.broadcast %cst_187 : f32 to vector<16x1xf32>
    %405 = arith.divf %403, %404 : vector<16x1xf32>
    %406 = vector.broadcast %398 : vector<16x1xf32> to vector<16x32xf32>
    %407 = arith.subf %390, %406 : vector<16x32xf32>
    %cst_188 = arith.constant 9.99999974E-6 : f32
    %408 = vector.broadcast %cst_188 : f32 to vector<16x1xf32>
    %409 = arith.addf %405, %408 : vector<16x1xf32>
    %410 = math.rsqrt %409 : vector<16x1xf32>
    %411 = vector.broadcast %410 : vector<16x1xf32> to vector<16x32xf32>
    %412 = arith.mulf %407, %411 : vector<16x32xf32>
    %413 = vector.broadcast %392 : vector<1x32xf32> to vector<16x32xf32>
    %414 = arith.mulf %412, %413 : vector<16x32xf32>
    %415 = vector.broadcast %394 : vector<1x32xf32> to vector<16x32xf32>
    %416 = arith.addf %414, %415 : vector<16x32xf32>
    %c0_189 = arith.constant 0 : index
    %c0_190 = arith.constant 0 : index
    %417 = vector.load %arg23[%c0_189, %c0_190] : memref<32x16xf32, #tpu.memory_space<vmem>>, vector<32x16xf32>
    %cst_191 = arith.constant dense<0.000000e+00> : vector<16x16xf32>
    %418 = tpu.matmul %416, %417, %cst_191 {dimension_numbers = #tpu.dot_dimension_numbers<[1], [0], [0], [1], [0, 0, 1, 1], [], []>} : vector<16x32xf32>, vector<32x16xf32>, vector<16x16xf32> -> vector<16x16xf32>
    %c0_192 = arith.constant 0 : index
    %c0_193 = arith.constant 0 : index
    %419 = vector.load %arg24[%c0_192, %c0_193] : memref<1x16xf32, #tpu.memory_space<vmem>>, vector<1x16xf32>
    %420 = vector.broadcast %419 : vector<1x16xf32> to vector<16x16xf32>
    %421 = arith.addf %418, %420 : vector<16x16xf32>
    %c0_194 = arith.constant 0 : index
    %c0_195 = arith.constant 0 : index
    %422 = vector.load %arg25[%c0_194, %c0_195] : memref<16x16xf32, #tpu.memory_space<vmem>>, vector<16x16xf32>
    tpu.vector_store %arg25[%c0_194, %c0_195], %421 {strides = array<i32>} : memref<16x16xf32, #tpu.memory_space<vmem>>, vector<16x16xf32>,
    return
  }
}

</mosaic_0001>

<bundles_post_ra>
// kernel: tpu_custom_call.1
= control target key start
LH: loop header
LB: loop body
LE: loop exit
PB: predicated region body
PF: predicated region fallthrough
CT: control target
= control target key end

     0   :  { %s6025_s0 = inlined_call_operand.vmem [shape: f32[16,32], index: 0, kind: input, shape index: {}]   ;;  %s6026_s1 = inlined_call_operand.vmem [shape: f32[16,32], index: 1, kind: input, shape index: {}]   ;;  %s6027_s2 = inlined_call_operand.vmem [shape: f32[32,32], index: 2, kind: input, shape index: {}]   ;;  %s6028_s3 = inlined_call_operand.vmem [shape: f32[2,32,96], index: 3, kind: input, shape index: {}]   ;;  %s6029_s4 = inlined_call_operand.vmem [shape: f32[2,1,96], index: 4, kind: input, shape index: {}]   ;;  %s6030_s5 = inlined_call_operand.vmem [shape: f32[2,32,32], index: 5, kind: input, shape index: {}]   ;;  %s6031_s6 = inlined_call_operand.vmem [shape: f32[2,1,32], index: 6, kind: input, shape index: {}]   ;;  %s6032_s7 = inlined_call_operand.vmem [shape: f32[2,32,32], index: 7, kind: input, shape index: {}]   ;;  %s6033_s8 = inlined_call_operand.vmem [shape: f32[2,1,32], index: 8, kind: input, shape index: {}]   ;;  %s6034_s9 = inlined_call_operand.vmem [shape: f32[2,32,64], index: 9, kind: input, shape index: {}]   ;;  %s6035_s10 = inlined_call_operand.vmem [shape: f32[2,1,64], index: 10, kind: input, shape index: {}]   ;;  %s6036_s11 = inlined_call_operand.vmem [shape: f32[2,32,32], index: 11, kind: input, shape index: {}]   ;;  %s6037_s12 = inlined_call_operand.vmem [shape: f32[2,1,32], index: 12, kind: input, shape index: {}]   ;;  %s6038_s13 = inlined_call_operand.vmem [shape: f32[2,1,32], index: 13, kind: input, shape index: {}]   ;;  %s6039_s14 = inlined_call_operand.vmem [shape: f32[2,1,32], index: 14, kind: input, shape index: {}]   ;;  %s6040_s15 = inlined_call_operand.vmem [shape: f32[2,1,32], index: 15, kind: input, shape index: {}]   ;;  %s6041_s16 = inlined_call_operand.vmem [shape: f32[2,1,32], index: 16, kind: input, shape index: {}]   ;;  %s6042_s17 = inlined_call_operand.vmem [shape: f32[2,1,32], index: 17, kind: input, shape index: {}]   ;;  %s6043_s18 = inlined_call_operand.vmem [shape: f32[2,1,32], index: 18, kind: input, shape index: {}]   ;;  %s6044_s19 = inlined_call_operand.vmem [shape: f32[2,32,256], index: 19, kind: input, shape index: {}]   ;;  %s6045_s20 = inlined_call_operand.vmem [shape: f32[2,1,256], index: 20, kind: input, shape index: {}]   ;;  %s6046_s21 = inlined_call_operand.vmem [shape: f32[2,256,32], index: 21, kind: input, shape index: {}]   ;;  %s6047_s22 = inlined_call_operand.vmem [shape: f32[2,1,32], index: 22, kind: input, shape index: {}]   ;;  %s6048_s23 = inlined_call_operand.vmem [shape: f32[32,16], index: 23, kind: input, shape index: {}]   ;;  %s6049_s24 = inlined_call_operand.vmem [shape: f32[1,16], index: 24, kind: input, shape index: {}]   ;;  %s6050_s25 = inlined_call_operand.hbm [shape: f32[16,16], index: 25, kind: output, shape index: {}]  }
   0x1   :  { %6072 = sst [smem:[#allocation5_spill]] %s6025_s0 }
   0x2   :  { %6073 = sst [smem:[#allocation6_spill]] %s6026_s1 }
   0x3   :  { %6074 = sst [smem:[#allocation7_spill]] %s6027_s2 }
   0x4   :  { %6075 = sst [smem:[#allocation8_spill]] %s6028_s3 }
   0x5   :  { %6076 = sst [smem:[#allocation9_spill]] %s6029_s4 }
   0x6   :  { %6077 = sst [smem:[#allocation10_spill]] %s6030_s5 }
   0x7   :  { %6078 = sst [smem:[#allocation11_spill]] %s6031_s6 }
   0x8   :  { %6079 = sst [smem:[#allocation12_spill]] %s6032_s7 }
   0x9   :  { %6080 = sst [smem:[#allocation13_spill]] %s6033_s8 }
   0xa   :  { %6081 = sst [smem:[#allocation14_spill]] %s6034_s9 }
   0xb   :  { %6082 = sst [smem:[#allocation15_spill]] %s6036_s11 }
   0xc   :  { %6083 = sst [smem:[#allocation16_spill]] %s6037_s12 }
   0xd   :  { %6084 = sst [smem:[#allocation17_spill]] %s6044_s19 }
   0xe   :  { %6085 = sst [smem:[#allocation18_spill]] %s6048_s23 }
   0xf   :  { %6086 = sst [smem:[#allocation19_spill]] %s6049_s24 }
  0x10   :  { %6087 = sst [smem:[#allocation20_spill]] %s6050_s25 }
  0x11   :  { %s6088_s6 = sld [smem:[#allocation8_spill]]  ;;  %vm100_vm0 = vcmask 261120   ;;  %s6089_s28 = sld [smem:[#allocation5_spill]] }
  0x17   :  { %v89_v0 = vld [vmem:[%s6088_s6] sm:$0xff]  ;;  %v90_v1 = vld [vmem:[%s6088_s6 + $0x8] sm:$0xff]  ;;  %v91_v2 = vld [vmem:[%s6088_s6 + $0x10] sm:$0xff] }
  0x18   :  { %v4602_v3 = vpack.c.bf16 %v90_v1, %v89_v0  ;;  %v92_v4 = vld [vmem:[%s6088_s6 + $0x18] sm:$0xff]  ;;  %v5111_v5 = vld [vmem:[%s6089_s28] sm:$0xff] }
  0x19   :  { %v4606_v6 = vpack.c.bf16 %v92_v4, %v91_v2  ;;  %4361 = vmatprep.mubr.msk.f32.mxu0 %vm100_vm0, %v5111_v5 }
  0x1a   :  { %30 = vsyncpa [#allocation3], 0  ;;  %4603 = vmatprep.subr.bf16.mxu0 %v4602_v3  ;;  %v5118_v7 = vld [vmem:[%s6089_s28 + $0x8] sm:$0xff]  ;;  %s6090_s2 = sld [smem:[#allocation9_spill]]  ;;  %s6091_s3 = sld [smem:[#allocation7_spill]]  ;;  %vm402_vm1 = vcmask 64512  }
  0x1b   :  { %4605 = vmatpush3.bf16.msra.mxu0 %v4602_v3  ;;  %s6063_s26 = smov 96   ;;  %s6061_s5 = smov 64   ;;  %vm3916_vm2 = vcmask 130048  }
  0x1c   :  { %4607 = vmatprep.subr.bf16.mxu0 %v4606_v6  ;;  %s6092_s30 = sld [smem:[#allocation10_spill]]  ;;  %s6093_s29 = sld [smem:[#allocation11_spill]] }
  0x1d   :  { %s6094_s8 = sld [smem:[#allocation14_spill]]  ;;  %s6095_s0 = sld [smem:[#allocation12_spill]] }
  0x1e   :  { %s6096_s23 = sld [smem:[#allocation6_spill]]  ;;  %s6097_s24 = sld [smem:[#allocation13_spill]] }
  0x1f   :  { %4609 = vmatpush3.bf16.msra.mxu0 %v4606_v6  ;;  %s6098_s25 = smov 96   ;;  %s6100_s27 = sld [smem:[#allocation15_spill]] }
  0x20   :  { %v3935_v8 = vld [vmem:[%s6090_s2] ss:$0 sm:$0xff]  ;;  %v5144_v16 = vld [vmem:[%s6091_s3 + $0x8] sm:$0xff]  ;;  %v5150_v17 = vld [vmem:[%s6091_s3 + $0x10] sm:$0xff] }
  0x21   :  { %v5128_v11 = vld [vmem:[%s6091_s3] sm:$0xff]  ;;  %v5160_v21 = vld [vmem:[%s6091_s3 + $0x18] sm:$0xff] }
  0x22   :  { %4362 = vmatmul.mubr.msk.f32.vlgmr.msra.gmra.mrb[0].mxu0 %vm100_vm0, %v5118_v7 }
  0xf5   :  { %v4363_v9 = vpop.f32.mrb[0].mxu0 }
  0xf6   :  { %v173_v10 = vpop.f32.mrb[1].mxu0  ;;  %v5136_v14 = vadd.f32 %v4363_v9, %v3935_v8 }
  0xf7   :  { %v5130_v12 = vadd.f32 %v3935_v8, %v173_v10 }
  0xf8   :  { %v186_v23 = vmul.f32 %v5136_v14, %v5128_v11  ;;  %v187_v24 = vmul.f32 %v5136_v14, %v5144_v16  ;;  %v188_v25 = vmul.f32 %v5136_v14, %v5150_v17  ;;  %v189_v26 = vmul.f32 %v5136_v14, %v5160_v21 }
  0xf9   :  { %191 = vrot.lane.b32.xlu0 %v5130_v12, %s6063_s26  ;;  %v182_v13 = vmul.f32 %v5130_v12, %v5128_v11  ;;  %v183_v18 = vmul.f32 %v5130_v12, %v5144_v16  ;;  %v184_v20 = vmul.f32 %v5130_v12, %v5150_v17  ;;  %v185_v22 = vmul.f32 %v5130_v12, %v5160_v21 }
  0xfb   :  { %4366 = vmatprep.mubr.msk.f32.mxu0 %vm100_vm0, %v182_v13 }
  0xfd   :  { %293 = vrot.lane.b32.xlu0 %v5136_v14, %s6063_s26 }
 0x16b   :  { %v192_v15 = vpop.permute.xlu0 %191 }
 0x16c   :  { %4364 = vmatprep.subr.msk.mxu0 %vm100_vm0, %v192_v15 }
 0x16d   :  { %4365 = vmatpush3.xpose.msk.msra.mxu0 %vm100_vm0, %v192_v15 }
 0x16f   :  { %v294_v19 = vpop.permute.xlu0 %293 }
 0x170   :  { %4367 = vmatmul.mubr.msk.f32.vlgmr.msra.gmra.mrb[2].mxu0 %vm100_vm0, %v183_v18  ;;  %4372 = vmatprep.subr.msk.mxu0 %vm100_vm0, %v294_v19 }
 0x171   :  { %4369 = vmatprep.mubr.msk.f32.mxu0 %vm100_vm0, %v184_v20  ;;  %4373 = vmatpush3.xpose.msk.msra.mxu0 %vm100_vm0, %v294_v19 }
 0x174   :  { %4370 = vmatmul.mubr.msk.f32.gmra.mrb[4].mxu0 %vm100_vm0, %v185_v22 }
 0x175   :  { %4374 = vmatprep.mubr.msk.f32.mxu0 %vm100_vm0, %v186_v23 }
 0x178   :  { %4375 = vmatmul.mubr.msk.f32.vlgmr.msra.gmra.mrb[6].mxu0 %vm100_vm0, %v187_v24 }
 0x179   :  { %4377 = vmatprep.mubr.msk.f32.mxu0 %vm100_vm0, %v188_v25 }
 0x17c   :  { %4378 = vmatmul.mubr.msk.f32.gmra.mrb[8].mxu0 %vm100_vm0, %v189_v26 }
 0x243   :  { %v4368_v27 = vpop.f32.mrb[2].mxu0 }
 0x244   :  { %v395_v28 = vmul.f32 0.35355338, %v4368_v27  ;;  %v273_v29 = vpop.f32.mrb[3].mxu0 }
 0x245   :  { %v394_v30 = vmul.f32 0.35355338, %v273_v29 }
 0x246   :  { %v406_v31 = vsel %vm402_vm1, %v395_v28, -inf }
 0x247   :  { %407 = vmax.xlane.f32.xlu1 %v406_v31  ;;  %v4371_v32 = vpop.f32.mrb[4].mxu0  ;;  %v403_v34 = vsel %vm402_vm1, %v394_v30, -inf }
 0x248   :  { %v283_v33 = vpop.f32.mrb[5].mxu0  ;;  %v397_v44 = vmul.f32 0.35355338, %v4371_v32 }
 0x249   :  { %v396_v39 = vmul.f32 0.35355338, %v283_v33 }
 0x24a   :  { %v412_v47 = vsel %vm402_vm1, %v397_v44, -inf }
 0x24b   :  { %404 = vmax.xlane.f32.xlu1 %v403_v34  ;;  %v4376_v35 = vpop.f32.mrb[6].mxu0  ;;  %v409_v45 = vsel %vm402_vm1, %v396_v39, -inf }
 0x24c   :  { %v399_v36 = vmul.f32 0.35355338, %v4376_v35  ;;  %v375_v37 = vpop.f32.mrb[7].mxu0 }
 0x24d   :  { %v398_v38 = vmul.f32 0.35355338, %v375_v37 }
 0x24e   :  { %v418_v40 = vsel %vm402_vm1, %v399_v36, -inf }
 0x24f   :  { %419 = vmax.xlane.f32.xlu1 %v418_v40  ;;  %v4379_v41 = vpop.f32.mrb[8].mxu0  ;;  %v415_v42 = vsel %vm402_vm1, %v398_v38, -inf }
 0x250   :  { %416 = vmax.xlane.f32.xlu0 %v415_v42  ;;  %v385_v43 = vpop.f32.mrb[9].mxu0  ;;  %v401_v48 = vmul.f32 0.35355338, %v4379_v41 }
 0x251   :  { %v400_v46 = vmul.f32 0.35355338, %v385_v43 }
 0x252   :  { %v424_v50 = vsel %vm402_vm1, %v401_v48, -inf }
 0x253   :  { %410 = vmax.xlane.f32.xlu1 %v409_v45  ;;  %v421_v49 = vsel %vm402_vm1, %v400_v46, -inf }
 0x257   :  { %413 = vmax.xlane.f32.xlu1 %v412_v47 }
 0x25b   :  { %422 = vmax.xlane.f32.xlu1 %v421_v49 }
 0x25f   :  { %425 = vmax.xlane.f32.xlu1 %v424_v50 }
 0x2d4   :  { %v408_v51 = vpop.xlane.xlu1 %407 }
 0x2d5   :  { %v428_v52 = vsub.f32 %v395_v28, %v408_v51 }
 0x2d7   :  { %v437_v53 = vmul.f32 1.442695, %v428_v52 }
 0x2d8   :  { %v405_v54 = vpop.xlane.xlu1 %404 }
 0x2d9   :  { %4778 = vpow2.f32 %v437_v53  ;;  %v427_v55 = vsub.f32 %v394_v30, %v405_v54 }
 0x2db   :  { %v435_v56 = vmul.f32 1.442695, %v427_v55 }
 0x2dc   :  { %v420_v57 = vpop.xlane.xlu1 %419 }
 0x2dd   :  { %4780 = vpow2.f32 %v435_v56  ;;  %v417_v58 = vpop.xlane.xlu0 %416  ;;  %v432_v63 = vsub.f32 %v399_v36, %v420_v57 }
 0x2de   :  { %v431_v59 = vsub.f32 %v398_v38, %v417_v58 }
 0x2df   :  { %v445_v8 = vmul.f32 1.442695, %v432_v63  ;;  %v708_v63 = vld [vmem:[%s6092_s30 + $0x18] sm:$0xff] }
 0x2e0   :  { %v411_v60 = vpop.xlane.xlu1 %410  ;;  %v443_v0 = vmul.f32 1.442695, %v431_v59  ;;  %v705_v59 = vld [vmem:[%s6092_s30] sm:$0xff] }
 0x2e1   :  { %v429_v61 = vsub.f32 %v396_v39, %v411_v60  ;;  %v706_v60 = vld [vmem:[%s6092_s30 + $0x8] sm:$0xff] }
 0x2e3   :  { %v5189_v62 = vpop.eup %4778  ;;  %v439_v1 = vmul.f32 1.442695, %v429_v61  ;;  %v4610_v61 = vpack.c.bf16 %v706_v60, %v705_v59  ;;  %v84_v59 = vld [vmem:[%s6096_s23 + $0x8] sm:$0xff] }
 0x2e4   :  { %v414_v2 = vpop.xlane.xlu1 %413  ;;  %v454_v3 = vsel %vm402_vm1, %v5189_v62, 0.0 }
 0x2e5   :  { %4782 = vpow2.f32 %v439_v1  ;;  %v430_v4 = vsub.f32 %v397_v44, %v414_v2  ;;  %455 = vadd.xlane.f32.xlu1 %v454_v3 }
 0x2e6   :  { %4784 = vpow2.f32 %v443_v0 }
 0x2e7   :  { %v4781_v6 = vpop.eup %4780  ;;  %v441_v9 = vmul.f32 1.442695, %v430_v4 }
 0x2e8   :  { %v423_v10 = vpop.xlane.xlu1 %422  ;;  %v451_v13 = vsel %vm402_vm1, %v4781_v6, 0.0 }
 0x2e9   :  { %4786 = vpow2.f32 %v441_v9  ;;  %v433_v15 = vsub.f32 %v400_v46, %v423_v10  ;;  %452 = vadd.xlane.f32.xlu1 %v451_v13 }
 0x2ea   :  { %4788 = vpow2.f32 %v445_v8 }
 0x2eb   :  { %v447_v18 = vmul.f32 1.442695, %v433_v15 }
 0x2ec   :  { %v426_v19 = vpop.xlane.xlu1 %425 }
 0x2ed   :  { %4790 = vpow2.f32 %v447_v18  ;;  %v434_v20 = vsub.f32 %v401_v48, %v426_v19 }
 0x2ef   :  { %v4783_v22 = vpop.eup %4782  ;;  %v449_v23 = vmul.f32 1.442695, %v434_v20 }
 0x2f0   :  { %v457_v24 = vsel %vm402_vm1, %v4783_v22, 0.0  ;;  %v4785_v25 = vpop.eup %4784 }
 0x2f1   :  { %4792 = vpow2.f32 %v449_v23  ;;  %458 = vadd.xlane.f32.xlu1 %v457_v24  ;;  %v463_v28 = vsel %vm402_vm1, %v4785_v25, 0.0 }
 0x2f3   :  { %v4787_v26 = vpop.eup %4786 }
 0x2f4   :  { %v460_v27 = vsel %vm402_vm1, %v4787_v26, 0.0  ;;  %v4789_v29 = vpop.eup %4788 }
 0x2f5   :  { %461 = vadd.xlane.f32.xlu0 %v460_v27  ;;  %464 = vadd.xlane.f32.xlu1 %v463_v28  ;;  %v466_v31 = vsel %vm402_vm1, %v4789_v29, 0.0 }
 0x2f7   :  { %v4791_v30 = vpop.eup %4790 }
 0x2f8   :  { %v469_v32 = vsel %vm402_vm1, %v4791_v30, 0.0 }
 0x2f9   :  { %467 = vadd.xlane.f32.xlu0 %v466_v31  ;;  %470 = vadd.xlane.f32.xlu1 %v469_v32  ;;  %v3956_v31 = vld [vmem:[%s6093_s29] ss:$0 sm:$0xff] }
 0x2fb   :  { %v4793_v33 = vpop.eup %4792 }
 0x2fc   :  { %v472_v34 = vsel %vm402_vm1, %v4793_v33, 0.0 }
 0x2fd   :  { %473 = vadd.xlane.f32.xlu0 %v472_v34 }
 0x30a   :  { %491 = vrot.lane.b32.xlu1 %v5130_v12, %s6061_s5 }
 0x313   :  { %591 = vrot.lane.b32.xlu0 %v5136_v14, %s6061_s5  ;;  %s6101_s5 = sld [smem:[#allocation16_spill]] }
 0x372   :  { %v456_v35 = vpop.xlane.xlu1 %455 }
 0x376   :  { %v453_v36 = vpop.xlane.xlu1 %452 }
 0x377   :  { %4794 = vrcp.f32 %v453_v36 }
 0x378   :  { %4796 = vrcp.f32 %v456_v35 }
 0x37e   :  { %v459_v37 = vpop.xlane.xlu1 %458 }
 0x37f   :  { %4798 = vrcp.f32 %v459_v37 }
 0x381   :  { %v4795_v38 = vpop.eup %4794 }
 0x382   :  { %v462_v39 = vpop.xlane.xlu0 %461  ;;  %v465_v40 = vpop.xlane.xlu1 %464  ;;  %v483_v41 = vmul.f32 %v4795_v38, %v4781_v6 }
 0x383   :  { %4800 = vrcp.f32 %v462_v39  ;;  %v4797_v12 = vpop.eup %4796 }
 0x384   :  { %4802 = vrcp.f32 %v465_v40  ;;  %4382 = vmatprep.mubr.msk.f32.mxu1 %vm402_vm1, %v483_v41  ;;  %v484_v46 = vmul.f32 %v4797_v12, %v5189_v62  ;;  %v707_v62 = vld [vmem:[%s6092_s30 + $0x10] sm:$0xff] }
 0x385   :  { %v4614_v0 = vpack.c.bf16 %v708_v63, %v707_v62 }
 0x386   :  { %v468_v42 = vpop.xlane.xlu0 %467  ;;  %v471_v43 = vpop.xlane.xlu1 %470 }
 0x387   :  { %4804 = vrcp.f32 %v468_v42 }
 0x388   :  { %4806 = vrcp.f32 %v471_v43 }
 0x389   :  { %v4799_v14 = vpop.eup %4798 }
 0x38a   :  { %v474_v44 = vpop.xlane.xlu0 %473  ;;  %v492_v45 = vpop.permute.xlu1 %491  ;;  %v485_v47 = vmul.f32 %v4799_v14, %v4783_v22 }
 0x38b   :  { %4808 = vrcp.f32 %v474_v44  ;;  %4380 = vmatprep.subr.mxu1 %v492_v45 }
 0x38c   :  { %4381 = vmatpush3.msra.mxu1 %v492_v45 }
 0x38d   :  { %v4801_v48 = vpop.eup %4800  ;;  %4383 = vmatmul.mubr.msk.f32.vlgmr.msra.gmra.mrb[0].mxu1 %vm402_vm1, %v484_v46  ;;  %4611 = vmatprep.subr.bf16.mxu1 %v4610_v61 }
 0x38e   :  { %v4803_v49 = vpop.eup %4802  ;;  %v592_v50 = vpop.permute.xlu0 %591  ;;  %4385 = vmatprep.mubr.msk.f32.mxu1 %vm402_vm1, %v485_v47  ;;  %v486_v51 = vmul.f32 %v4801_v48, %v4787_v26  ;;  %4613 = vmatpush3.bf16.msra.mxu1 %v4610_v61  ;;  %v937_v47 = vld [vmem:[%s6094_s8 + $0x8] sm:$0xff] }
 0x38f   :  { %4388 = vmatprep.subr.mxu0 %v592_v50  ;;  %v487_v52 = vmul.f32 %v4803_v49, %v4785_v25  ;;  %4615 = vmatprep.subr.bf16.mxu1 %v4614_v0  ;;  %v844_v49 = vld [vmem:[%s6095_s0] sm:$0xff] }
 0x390   :  { %4389 = vmatpush3.msra.mxu0 %v592_v50  ;;  %v845_v50 = vld [vmem:[%s6095_s0 + $0x8] sm:$0xff] }
 0x391   :  { %v4805_v53 = vpop.eup %4804  ;;  %4390 = vmatprep.mubr.msk.f32.mxu0 %vm402_vm1, %v487_v52  ;;  %4386 = vmatmul.mubr.msk.f32.gmra.mrb[2].mxu1 %vm402_vm1, %v486_v51  ;;  %v938_v51 = vld [vmem:[%s6094_s8 + $0x10] sm:$0xff]  ;;  %v4618_v52 = vpack.c.bf16 %v845_v50, %v844_v49 }
 0x392   :  { %v4807_v54 = vpop.eup %4806  ;;  %v488_v55 = vmul.f32 %v4805_v53, %v4789_v29  ;;  %4617 = vmatpush3.bf16.msra.mxu1 %v4614_v0  ;;  %v939_v53 = vld [vmem:[%s6094_s8 + $0x18] sm:$0xff] }
 0x393   :  { %v489_v56 = vmul.f32 %v4807_v54, %v4791_v30  ;;  %v4630_v54 = vpack.c.bf16 %v939_v53, %v938_v51  ;;  %4619 = vmatprep.subr.bf16.mxu0 %v4618_v52 }
 0x394   :  { %4391 = vmatmul.mubr.msk.f32.vlgmr.msra.gmra.mrb[10].mxu0 %vm402_vm1, %v488_v55  ;;  %v83_v55 = vld [vmem:[%s6096_s23] sm:$0xff] }
 0x395   :  { %v4809_v57 = vpop.eup %4808  ;;  %4393 = vmatprep.mubr.msk.f32.mxu0 %vm402_vm1, %v489_v56  ;;  %v846_v56 = vld [vmem:[%s6095_s0 + $0x10] sm:$0xff]  ;;  %4621 = vmatpush3.bf16.msra.mxu0 %v4618_v52 }
 0x396   :  { %v490_v58 = vmul.f32 %v4809_v57, %v4793_v33  ;;  %v847_v57 = vld [vmem:[%s6095_s0 + $0x18] sm:$0xff] }
 0x398   :  { %4394 = vmatmul.mubr.msk.f32.gmra.mrb[12].mxu0 %vm402_vm1, %v490_v58  ;;  %v4622_v58 = vpack.c.bf16 %v847_v57, %v846_v56 }
 0x39a   :  { %4623 = vmatprep.subr.bf16.mxu0 %v4622_v58 }
 0x39b   :  { %4625 = vmatpush3.bf16.msra.mxu0 %v4622_v58 }
 0x460   :  { %v4384_v1 = vpop.f32.mrb[0].mxu1 }
 0x461   :  { %v692_v2 = vmul.f32 %v4384_v1, %v5144_v16  ;;  %v572_v3 = vpop.f32.mrb[1].mxu1 }
 0x462   :  { %v691_v4 = vmul.f32 %v572_v3, %v5128_v11  ;;  %v3959_v3 = vld [vmem:[%s6038_s13] ss:$0 sm:$0xff] }
 0x464   :  { %v699_v6 = vadd.f32 %v692_v2, %v691_v4  ;;  %v4387_v8 = vpop.f32.mrb[2].mxu1 }
 0x465   :  { %v582_v9 = vpop.f32.mrb[3].mxu1  ;;  %v694_v15 = vmul.f32 %v4387_v8, %v5160_v21 }
 0x466   :  { %v693_v10 = vmul.f32 %v582_v9, %v5150_v17  ;;  %v3960_v9 = vld [vmem:[%s6039_s14] ss:$0 sm:$0xff] }
 0x467   :  { %v4392_v13 = vpop.f32.mrb[10].mxu0 }
 0x468   :  { %v701_v18 = vadd.f32 %v699_v6, %v693_v10  ;;  %v696_v19 = vmul.f32 %v4392_v13, %v5144_v16  ;;  %v672_v20 = vpop.f32.mrb[11].mxu0 }
 0x469   :  { %v695_v22 = vmul.f32 %v672_v20, %v5128_v11 }
 0x46a   :  { %v703_v23 = vadd.f32 %v701_v18, %v694_v15 }
 0x46b   :  { %v700_v24 = vadd.f32 %v696_v19, %v695_v22  ;;  %v4395_v25 = vpop.f32.mrb[12].mxu0  ;;  %v3964_v19 = vld [vmem:[%s6035_s10] ss:$0 sm:$0xff] }
 0x46c   :  { %v682_v26 = vpop.f32.mrb[13].mxu0  ;;  %4404 = vmatprep.mubr.msk.f32.mxu1 %vm100_vm0, %v703_v23  ;;  %v698_v28 = vmul.f32 %v4395_v25, %v5160_v21  ;;  %v3961_v25 = vld [vmem:[%s6097_s24] ss:$0 sm:$0xff] }
 0x46d   :  { %v697_v27 = vmul.f32 %v682_v26, %v5150_v17 }
 0x46f   :  { %v702_v29 = vadd.f32 %v700_v24, %v697_v27 }
 0x471   :  { %v704_v30 = vadd.f32 %v702_v29, %v698_v28 }
 0x473   :  { %4405 = vmatmul.mubr.msk.f32.vlgmr.msra.gmra.mrb[4].mxu1 %vm100_vm0, %v704_v30 }
 0x474   :  { %4426 = vmatprep.mubr.msk.f32.mxu1 %vm100_vm0, %v83_v55 }
 0x546   :  { %v4406_v32 = vpop.f32.mrb[4].mxu1 }
 0x547   :  { %v794_v33 = vadd.f32 %v4406_v32, %v3956_v31  ;;  %v788_v34 = vpop.f32.mrb[5].mxu1 }
 0x548   :  { %v789_v35 = vadd.f32 %v3956_v31, %v788_v34 }
 0x549   :  { %v798_v36 = vadd.f32 %v794_v33, %v5118_v7 }
 0x54a   :  { %v797_v37 = vadd.f32 %v789_v35, %v5111_v5  ;;  %v936_v5 = vld [vmem:[%s6094_s8] sm:$0xff] }
 0x54b   :  { %v804_v38 = vsel %vm100_vm0, %v798_v36, 0.0  ;;  %v4626_v48 = vpack.c.bf16 %v937_v47, %v936_v5 }
 0x54c   :  { %805 = vadd.xlane.f32.xlu0 %v804_v38  ;;  %v801_v39 = vsel %vm100_vm0, %v797_v37, 0.0 }
 0x54d   :  { %802 = vadd.xlane.f32.xlu1 %v801_v39  ;;  %4627 = vmatprep.subr.bf16.mxu1 %v4626_v48 }
 0x54e   :  { %4629 = vmatpush3.bf16.msra.mxu1 %v4626_v48 }
 0x54f   :  { %4631 = vmatprep.subr.bf16.mxu1 %v4630_v54 }
 0x552   :  { %4633 = vmatpush3.bf16.msra.mxu1 %v4630_v54 }
 0x555   :  { %4427 = vmatmul.mubr.msk.f32.vlgmr.msra.gmra.mrb[6].mxu1 %vm100_vm0, %v84_v59 }
 0x5d9   :  { %v806_v40 = vpop.xlane.xlu0 %805 }
 0x5da   :  { %v809_v41 = vmul.f32 0.03125, %v806_v40  ;;  %v803_v42 = vpop.xlane.xlu1 %802 }
 0x5db   :  { %v808_v43 = vmul.f32 0.03125, %v803_v42 }
 0x5dc   :  { %v811_v12 = vsub.f32 %v798_v36, %v809_v41 }
 0x5dd   :  { %v810_v14 = vsub.f32 %v797_v37, %v808_v43 }
 0x5de   :  { %v813_v44 = vmul.f32 %v811_v12, %v811_v12 }
 0x5df   :  { %v812_v45 = vmul.f32 %v810_v14, %v810_v14 }
 0x5e0   :  { %v817_v46 = vsel %vm100_vm0, %v813_v44, 0.0 }
 0x5e1   :  { %818 = vadd.xlane.f32.xlu0 %v817_v46  ;;  %v814_v7 = vsel %vm100_vm0, %v812_v45, 0.0 }
 0x5e2   :  { %815 = vadd.xlane.f32.xlu1 %v814_v7 }
 0x628   :  { %v4428_v20 = vpop.f32.mrb[6].mxu1 }
 0x629   :  { %v5293_v22 = vadd.f32 %v4428_v20, %v3964_v19  ;;  %v1019_v23 = vpop.f32.mrb[7].mxu1 }
 0x62a   :  { %v5295_v24 = vadd.f32 %v3964_v19, %v1019_v23 }
 0x62b   :  { %4770 = vmatprep.subr.msk.mxu1 %vm100_vm0, %v5293_v22 }
 0x62c   :  { %4429 = vmatprep.subr.msk.mxu0 %vm100_vm0, %v5295_v24  ;;  %4771 = vmatpush3.xpose.msk.msra.mxu1 %vm100_vm0, %v5293_v22 }
 0x66e   :  { %v819_v60 = vpop.xlane.xlu0 %818 }
 0x66f   :  { %v821_v61 = vmul.f32 0.03125, %v819_v60  ;;  %v816_v62 = vpop.xlane.xlu1 %815 }
 0x670   :  { %v820_v63 = vmul.f32 0.03125, %v816_v62 }
 0x671   :  { %v823_v0 = vadd.f32 1e-05, %v821_v61 }
 0x672   :  { %v822_v1 = vadd.f32 1e-05, %v820_v63 }
 0x673   :  { %4810 = vrsqrt.f32 %v823_v0 }
 0x674   :  { %4812 = vrsqrt.f32 %v822_v1 }
 0x67d   :  { %v4811_v2 = vpop.eup %4810 }
 0x67e   :  { %v4813_v4 = vpop.eup %4812  ;;  %v827_v6 = vmul.f32 %v4811_v2, %v811_v12 }
 0x67f   :  { %v826_v8 = vmul.f32 %v4813_v4, %v810_v14 }
 0x680   :  { %v835_v10 = vmul.f32 %v3959_v3, %v827_v6 }
 0x681   :  { %v834_v13 = vmul.f32 %v3959_v3, %v826_v8 }
 0x682   :  { %v5284_v18 = vadd.f32 %v3960_v9, %v835_v10 }
 0x683   :  { %v5282_v15 = vadd.f32 %v3960_v9, %v834_v13 }
 0x685   :  { %4415 = vmatprep.mubr.msk.f32.mxu0 %vm100_vm0, %v5282_v15 }
 0x686   :  { %4416 = vmatmul.mubr.msk.f32.vlgmr.msra.gmra.mrb[14].mxu0 %vm100_vm0, %v5284_v18 }
 0x687   :  { %4430 = vmatpush3.xpose.msk.msra.mxu0 %vm100_vm0, %v5295_v24 }
 0x688   :  { %4437 = vmatprep.subr.msk.mxu0 %vm100_vm0, %v5293_v22 }
 0x759   :  { %v4417_v26 = vpop.f32.mrb[14].mxu0 }
 0x75a   :  { %v933_v27 = vadd.f32 %v4417_v26, %v3961_v25  ;;  %v927_v28 = vpop.f32.mrb[15].mxu0 }
 0x75b   :  { %v928_v29 = vadd.f32 %v3961_v25, %v927_v28 }
 0x75c   :  { %v1035_v30 = vmul.f32 %v933_v27, %v5160_v21  ;;  %v1034_v31 = vmul.f32 %v933_v27, %v5150_v17  ;;  %v1032_v36 = vmul.f32 %v933_v27, %v5128_v11  ;;  %v1033_v37 = vmul.f32 %v933_v27, %v5144_v16 }
 0x75d   :  { %v1029_v32 = vmul.f32 %v928_v29, %v5144_v16  ;;  %v1028_v33 = vmul.f32 %v928_v29, %v5128_v11  ;;  %v1030_v34 = vmul.f32 %v928_v29, %v5150_v17  ;;  %v1031_v35 = vmul.f32 %v928_v29, %v5160_v21 }
 0x75e   :  { %4442 = vmatprep.mubr.msk.f32.mxu1 %vm100_vm0, %v1034_v31 }
 0x75f   :  { %4431 = vmatprep.mubr.msk.f32.mxu0 %vm100_vm0, %v1028_v33  ;;  %4443 = vmatmul.mubr.msk.f32.vlgmr.msra.gmra.mrb[8].mxu1 %vm100_vm0, %v1035_v30 }
 0x760   :  { %4432 = vmatmul.mubr.msk.f32.vlgmr.msra.gmra.mrb[16].mxu0 %vm100_vm0, %v1029_v32 }
 0x761   :  { %4438 = vmatpush3.xpose.msk.msra.mxu0 %vm100_vm0, %v5293_v22  ;;  %4434 = vmatprep.mubr.msk.f32.mxu0 %vm100_vm0, %v1030_v34 }
 0x764   :  { %4435 = vmatmul.mubr.msk.f32.gmra.mrb[18].mxu0 %vm100_vm0, %v1031_v35 }
 0x765   :  { %4439 = vmatprep.mubr.msk.f32.mxu0 %vm100_vm0, %v1032_v36 }
 0x768   :  { %4440 = vmatmul.mubr.msk.f32.vlgmr.msra.gmra.mrb[20].mxu0 %vm100_vm0, %v1033_v37 }
 0x832   :  { %v4444_v38 = vpop.f32.mrb[8].mxu1 }
 0x833   :  { %v4433_v39 = vpop.f32.mrb[16].mxu0  ;;  %v1227_v40 = vpop.f32.mrb[9].mxu1  ;;  %v1243_v52 = vmul.f32 0.35355338, %v4444_v38 }
 0x834   :  { %v1237_v41 = vmul.f32 0.35355338, %v4433_v39  ;;  %v1117_v42 = vpop.f32.mrb[17].mxu0  ;;  %v1242_v54 = vmul.f32 0.35355338, %v1227_v40 }
 0x835   :  { %v1236_v43 = vmul.f32 0.35355338, %v1117_v42  ;;  %v1265_v56 = vsel %vm402_vm1, %v1243_v52, -inf }
 0x836   :  { %v1247_v12 = vsel %vm402_vm1, %v1237_v41, -inf  ;;  %v1262_v57 = vsel %vm402_vm1, %v1242_v54, -inf }
 0x837   :  { %1248 = vmax.xlane.f32.xlu0 %v1247_v12  ;;  %v4436_v14 = vpop.f32.mrb[18].mxu0  ;;  %v1244_v44 = vsel %vm402_vm1, %v1236_v43, -inf }
 0x838   :  { %v1239_v45 = vmul.f32 0.35355338, %v4436_v14  ;;  %1245 = vmax.xlane.f32.xlu1 %v1244_v44  ;;  %v1127_v46 = vpop.f32.mrb[19].mxu0 }
 0x839   :  { %v1238_v7 = vmul.f32 0.35355338, %v1127_v46 }
 0x83a   :  { %v1253_v5 = vsel %vm402_vm1, %v1239_v45, -inf }
 0x83b   :  { %1254 = vmax.xlane.f32.xlu0 %v1253_v5  ;;  %v4441_v47 = vpop.f32.mrb[20].mxu0  ;;  %v1250_v48 = vsel %vm402_vm1, %v1238_v7, -inf }
 0x83c   :  { %v1241_v49 = vmul.f32 0.35355338, %v4441_v47  ;;  %1251 = vmax.xlane.f32.xlu1 %v1250_v48  ;;  %v1217_v50 = vpop.f32.mrb[21].mxu0 }
 0x83d   :  { %v1240_v51 = vmul.f32 0.35355338, %v1217_v50 }
 0x83e   :  { %v1259_v53 = vsel %vm402_vm1, %v1241_v49, -inf }
 0x83f   :  { %1260 = vmax.xlane.f32.xlu0 %v1259_v53  ;;  %v1256_v55 = vsel %vm402_vm1, %v1240_v51, -inf }
 0x840   :  { %1257 = vmax.xlane.f32.xlu1 %v1256_v55 }
 0x843   :  { %1266 = vmax.xlane.f32.xlu0 %v1265_v56 }
 0x844   :  { %1263 = vmax.xlane.f32.xlu1 %v1262_v57 }
 0x8c4   :  { %v1249_v58 = vpop.xlane.xlu0 %1248 }
 0x8c5   :  { %v1246_v59 = vpop.xlane.xlu1 %1245  ;;  %v1269_v0 = vsub.f32 %v1237_v41, %v1249_v58 }
 0x8c6   :  { %v1268_v1 = vsub.f32 %v1236_v43, %v1246_v59 }
 0x8c7   :  { %v1278_v8 = vmul.f32 1.442695, %v1269_v0 }
 0x8c8   :  { %v1255_v60 = vpop.xlane.xlu0 %1254  ;;  %v1276_v13 = vmul.f32 1.442695, %v1268_v1 }
 0x8c9   :  { %v1252_v61 = vpop.xlane.xlu1 %1251  ;;  %v1271_v9 = vsub.f32 %v1239_v45, %v1255_v60 }
 0x8ca   :  { %v1270_v19 = vsub.f32 %v1238_v7, %v1252_v61 }
 0x8cb   :  { %v1282_v23 = vmul.f32 1.442695, %v1271_v9 }
 0x8cc   :  { %v1261_v62 = vpop.xlane.xlu0 %1260  ;;  %v1280_v26 = vmul.f32 1.442695, %v1270_v19 }
 0x8cd   :  { %v1258_v63 = vpop.xlane.xlu1 %1257  ;;  %v1273_v25 = vsub.f32 %v1241_v49, %v1261_v62 }
 0x8ce   :  { %v1272_v27 = vsub.f32 %v1240_v51, %v1258_v63 }
 0x8cf   :  { %v1286_v28 = vmul.f32 1.442695, %v1273_v25 }
 0x8d0   :  { %v1267_v2 = vpop.xlane.xlu0 %1266  ;;  %v1284_v29 = vmul.f32 1.442695, %v1272_v27 }
 0x8d1   :  { %v1275_v3 = vsub.f32 %v1243_v52, %v1267_v2  ;;  %v1264_v4 = vpop.xlane.xlu1 %1263  ;;  %v1546_v2 = vld [vmem:[%s6036_s11] sm:$0xff] }
 0x8d2   :  { %v1274_v6 = vsub.f32 %v1242_v54, %v1264_v4 }
 0x8d3   :  { %v1290_v10 = vmul.f32 1.442695, %v1275_v3  ;;  %v1547_v3 = vld [vmem:[%s6036_s11 + $0x8] sm:$0xff] }
 0x8d4   :  { %v1288_v20 = vmul.f32 1.442695, %v1274_v6  ;;  %v4634_v4 = vpack.c.bf16 %v1547_v3, %v1546_v2  ;;  %v1548_v6 = vld [vmem:[%s6036_s11 + $0x10] sm:$0xff]  ;;  %v1792_v2 = vld [vmem:[%s6046_s21 + $0x8] sm:$0xff] }
 0x8d5   :  { %4814 = vpow2.f32 %v1290_v10  ;;  %v1809_v3 = vld [vmem:[%s6046_s21 + $0x90] sm:$0xff] }
 0x8d6   :  { %4816 = vpow2.f32 %v1288_v20 }
 0x8d7   :  { %4818 = vpow2.f32 %v1278_v8  ;;  %v1549_v8 = vld [vmem:[%s6036_s11 + $0x18] sm:$0xff] }
 0x8d8   :  { %4820 = vpow2.f32 %v1276_v13  ;;  %v4638_v9 = vpack.c.bf16 %v1549_v8, %v1548_v6 }
 0x8d9   :  { %4822 = vpow2.f32 %v1282_v23 }
 0x8da   :  { %4824 = vpow2.f32 %v1280_v26 }
 0x8db   :  { %4826 = vpow2.f32 %v1286_v28 }
 0x8dc   :  { %4828 = vpow2.f32 %v1284_v29 }
 0x8df   :  { %v5336_v30 = vpop.eup %4814 }
 0x8e0   :  { %v5338_v31 = vpop.eup %4816  ;;  %v1313_v32 = vsel %vm402_vm1, %v5336_v30, 0.0 }
 0x8e1   :  { %v4819_v33 = vpop.eup %4818  ;;  %1314 = vadd.xlane.f32.xlu0 %v1313_v32  ;;  %v1310_v34 = vsel %vm402_vm1, %v5338_v31, 0.0 }
 0x8e2   :  { %v4821_v35 = vpop.eup %4820  ;;  %1311 = vadd.xlane.f32.xlu1 %v1310_v34  ;;  %v1295_v36 = vsel %vm402_vm1, %v4819_v33, 0.0 }
 0x8e3   :  { %v4823_v37 = vpop.eup %4822  ;;  %v1292_v38 = vsel %vm402_vm1, %v4821_v35, 0.0 }
 0x8e4   :  { %v4825_v39 = vpop.eup %4824  ;;  %v1301_v40 = vsel %vm402_vm1, %v4823_v37, 0.0 }
 0x8e5   :  { %1296 = vadd.xlane.f32.xlu0 %v1295_v36  ;;  %v4827_v41 = vpop.eup %4826  ;;  %v1298_v42 = vsel %vm402_vm1, %v4825_v39, 0.0 }
 0x8e6   :  { %1293 = vadd.xlane.f32.xlu1 %v1292_v38  ;;  %v4829_v43 = vpop.eup %4828  ;;  %v1307_v12 = vsel %vm402_vm1, %v4827_v41, 0.0 }
 0x8e7   :  { %v1304_v14 = vsel %vm402_vm1, %v4829_v43, 0.0 }
 0x8e9   :  { %1302 = vadd.xlane.f32.xlu0 %v1301_v40 }
 0x8ea   :  { %1299 = vadd.xlane.f32.xlu1 %v1298_v42 }
 0x8ed   :  { %1308 = vadd.xlane.f32.xlu0 %v1307_v12 }
 0x8ee   :  { %1305 = vadd.xlane.f32.xlu1 %v1304_v14 }
 0x8ff   :  { %1332 = vrot.lane.b32.xlu1 %v5295_v24, %s6098_s25 }
 0x903   :  { %1432 = vrot.lane.b32.xlu0 %v5293_v22, %s6098_s25 }
 0x96e   :  { %v1315_v44 = vpop.xlane.xlu0 %1314 }
 0x96f   :  { %v1312_v45 = vpop.xlane.xlu1 %1311 }
 0x972   :  { %v1297_v46 = vpop.xlane.xlu0 %1296 }
 0x973   :  { %4830 = vrcp.f32 %v1297_v46  ;;  %v1294_v7 = vpop.xlane.xlu1 %1293 }
 0x974   :  { %4832 = vrcp.f32 %v1294_v7 }
 0x976   :  { %v1303_v5 = vpop.xlane.xlu0 %1302 }
 0x977   :  { %4834 = vrcp.f32 %v1303_v5  ;;  %v1300_v47 = vpop.xlane.xlu1 %1299 }
 0x978   :  { %4836 = vrcp.f32 %v1300_v47 }
 0x979   :  { %4838 = vrcp.f32 %v1312_v45 }
 0x97a   :  { %v1309_v48 = vpop.xlane.xlu0 %1308 }
 0x97b   :  { %4840 = vrcp.f32 %v1309_v48  ;;  %v1306_v49 = vpop.xlane.xlu1 %1305 }
 0x97c   :  { %4842 = vrcp.f32 %v1306_v49 }
 0x97d   :  { %v4831_v50 = vpop.eup %4830  ;;  %4844 = vrcp.f32 %v1315_v44 }
 0x97e   :  { %v4833_v24 = vpop.eup %4832  ;;  %v1433_v51 = vpop.permute.xlu0 %1432  ;;  %v1325_v53 = vmul.f32 %v4831_v50, %v4819_v33 }
 0x97f   :  { %4453 = vmatprep.subr.mxu1 %v1433_v51  ;;  %v1333_v22 = vpop.permute.xlu1 %1332  ;;  %v1324_v52 = vmul.f32 %v4833_v24, %v4821_v35  ;;  %v1685_v24 = vld [vmem:[%s6044_s19 + $0x8] sm:$0xff] }
 0x980   :  { %4445 = vmatprep.subr.mxu0 %v1333_v22  ;;  %4454 = vmatpush3.msra.mxu1 %v1433_v51  ;;  %v1687_v51 = vld [vmem:[%s6044_s19 + $0x18] sm:$0xff] }
 0x981   :  { %v4835_v54 = vpop.eup %4834  ;;  %4446 = vmatpush3.msra.mxu0 %v1333_v22  ;;  %4447 = vmatprep.mubr.msk.f32.mxu0 %vm402_vm1, %v1324_v52  ;;  %v4642_v22 = vpack.c.bf16 %v1687_v51, %v1685_v24  ;;  %v1684_v52 = vld [vmem:[%s6044_s19] sm:$0xff] }
 0x982   :  { %v4837_v55 = vpop.eup %4836  ;;  %4448 = vmatmul.mubr.msk.f32.vlgmr.msra.gmra.mrb[22].mxu0 %vm402_vm1, %v1325_v53  ;;  %v1327_v58 = vmul.f32 %v4835_v54, %v4823_v37  ;;  %4635 = vmatprep.subr.bf16.mxu0 %v4634_v4  ;;  %v1686_v53 = vld [vmem:[%s6044_s19 + $0x10] sm:$0xff]  ;;  %v3989_v51 = vld [vmem:[%s6041_s16] ss:$0 sm:$0xff] }
 0x983   :  { %v1326_v56 = vmul.f32 %v4837_v55, %v4825_v39  ;;  %v4839_v57 = vpop.eup %4838  ;;  %4637 = vmatpush3.bf16.msra.mxu0 %v4634_v4  ;;  %v4644_v54 = vpack.c.bf16 %v1686_v53, %v1684_v52  ;;  %4643 = vmatprep.subr.bf16.mxu1 %v4642_v22  ;;  %v1689_v55 = vld [vmem:[%s6044_s19 + $0x28] sm:$0xff]  ;;  %v1810_v4 = vld [vmem:[%s6046_s21 + $0x98] sm:$0xff] }
 0x984   :  { %v1330_v0 = vmul.f32 %v4839_v57, %v5338_v31  ;;  %4639 = vmatprep.subr.bf16.mxu0 %v4638_v9  ;;  %v4654_v8 = vpack.c.bf16 %v1810_v4, %v1809_v3 }
 0x985   :  { %v4841_v59 = vpop.eup %4840  ;;  %4450 = vmatprep.mubr.msk.f32.mxu0 %vm402_vm1, %v1326_v56  ;;  %v1691_v56 = vld [vmem:[%s6044_s19 + $0x38] sm:$0xff] }
 0x986   :  { %v4843_v60 = vpop.eup %4842  ;;  %4451 = vmatmul.mubr.msk.f32.gmra.mrb[24].mxu0 %vm402_vm1, %v1327_v58  ;;  %v1329_v62 = vmul.f32 %v4841_v59, %v4827_v41  ;;  %v4646_v57 = vpack.c.bf16 %v1691_v56, %v1689_v55  ;;  %v1688_v58 = vld [vmem:[%s6044_s19 + $0x20] sm:$0xff]  ;;  %v1690_v59 = vld [vmem:[%s6044_s19 + $0x30] sm:$0xff] }
 0x987   :  { %v1328_v61 = vmul.f32 %v4843_v60, %v4829_v43  ;;  %v4845_v63 = vpop.eup %4844  ;;  %4641 = vmatpush3.bf16.msra.mxu0 %v4638_v9  ;;  %v4648_v60 = vpack.c.bf16 %v1690_v59, %v1688_v58  ;;  %v1793_v9 = vld [vmem:[%s6046_s21 + $0x10] sm:$0xff] }
 0x988   :  { %v1331_v1 = vmul.f32 %v4845_v63, %v5336_v30  ;;  %v1808_v63 = vld [vmem:[%s6046_s21 + $0x88] sm:$0xff]  ;;  %v1821_v56 = vld [vmem:[%s6046_s21 + $0xf0] sm:$0xff] }
 0x989   :  { %4455 = vmatprep.mubr.msk.f32.mxu1 %vm402_vm1, %v1328_v61  ;;  %v4962_v61 = vmov 0.0   ;;  %v1805_v59 = vld [vmem:[%s6046_s21 + $0x70] sm:$0xff] }
 0x98a   :  { %4456 = vmatmul.mubr.msk.f32.vlgmr.msra.gmra.mrb[10].mxu1 %vm402_vm1, %v1329_v62  ;;  %v1807_v62 = vld [vmem:[%s6046_s21 + $0x80] sm:$0xff] }
 0x98b   :  { %4458 = vmatprep.mubr.msk.f32.mxu1 %vm402_vm1, %v1330_v0  ;;  %4645 = vmatpush1.bf16.msra.mxu1 %v4644_v54  ;;  %v1791_v0 = vld [vmem:[%s6046_s21] sm:$0xff] }
 0x98c   :  { %4647 = vmatprep.subr.bf16.mxu1 %v4646_v57  ;;  %v4652_v6 = vpack.c.bf16 %v1792_v2, %v1791_v0  ;;  %v1822_v57 = vld [vmem:[%s6046_s21 + $0xf8] sm:$0xff]  ;;  %v1692_v2 = vld [vmem:[%s6045_s20] sm:$0x3] }
 0x98d   :  { %v4678_v58 = vpack.c.bf16 %v1822_v57, %v1821_v56  ;;  %v3994_v56 = vld [vmem:[%s6043_s18] ss:$0 sm:$0xff] }
 0x98e   :  { %4459 = vmatmul.mubr.msk.f32.gmra.mrb[12].mxu1 %vm402_vm1, %v1331_v1  ;;  %v4650_v1 = vpack.c.bf16 %v1808_v63, %v1807_v62  ;;  %v1694_v63 = vlaneseq }
 0x98f   :  { %4649 = vmatpush1.bf16.msra.mxu1 %v4648_v60  ;;  %1774 = vmatprep.mubr.f32.mxu1 %v4962_v61  ;;  %v1806_v60 = vld [vmem:[%s6046_s21 + $0x78] sm:$0xff] }
 0x990   :  { %4651 = vmatprep.subr.bf16.mxu0 %v4650_v1  ;;  %v4680_v62 = vpack.c.bf16 %v1806_v60, %v1805_v59  ;;  %v5535_v0 = vshrl.u32 %v1694_v63, 7 }
 0x992   :  { %v1696_v1 = vsub.s32 0, %v5535_v0  ;;  %v1700_v3 = vsub.s32 1, %v5535_v0  ;;  %v4123_v0 = vld [vmem:[%s6047_s22 + $0x1] ss:$0 sm:$0xff] }
 0x994   :  { %v1697_v4 = vrot.slane %v1692_v2, %v1696_v1 }
 0xa55   :  { %v4449_v10 = vpop.f32.mrb[22].mxu0 }
 0xa56   :  { %v1533_v13 = vmul.f32 %v4449_v10, %v5144_v16  ;;  %v1413_v19 = vpop.f32.mrb[23].mxu0  ;;  %v1794_v10 = vld [vmem:[%s6046_s21 + $0x18] sm:$0xff] }
 0xa57   :  { %v1532_v20 = vmul.f32 %v1413_v19, %v5128_v11  ;;  %v1812_v19 = vld [vmem:[%s6046_s21 + $0xa8] sm:$0xff] }
 0xa59   :  { %v1540_v23 = vadd.f32 %v1533_v13, %v1532_v20  ;;  %v4452_v25 = vpop.f32.mrb[24].mxu0  ;;  %v1811_v13 = vld [vmem:[%s6046_s21 + $0xa0] sm:$0xff]  ;;  %v4656_v20 = vpack.c.bf16 %v1794_v10, %v1793_v9 }
 0xa5a   :  { %v1423_v26 = vpop.f32.mrb[25].mxu0  ;;  %v1535_v28 = vmul.f32 %v4452_v25, %v5160_v21  ;;  %v1795_v25 = vld [vmem:[%s6046_s21 + $0x20] sm:$0xff] }
 0xa5b   :  { %v1534_v27 = vmul.f32 %v1423_v26, %v5150_v17  ;;  %v1796_v26 = vld [vmem:[%s6046_s21 + $0x28] sm:$0xff] }
 0xa5d   :  { %v1542_v29 = vadd.f32 %v1540_v23, %v1534_v27  ;;  %v4457_v30 = vpop.f32.mrb[10].mxu1  ;;  %v4658_v23 = vpack.c.bf16 %v1812_v19, %v1811_v13  ;;  %v1813_v27 = vld [vmem:[%s6046_s21 + $0xb0] sm:$0xff] }
 0xa5e   :  { %v1537_v31 = vmul.f32 %v4457_v30, %v5144_v16  ;;  %v1513_v32 = vpop.f32.mrb[11].mxu1  ;;  %v3985_v16 = vld [vmem:[%s6037_s12] ss:$0 sm:$0xff] }
 0xa5f   :  { %v1544_v33 = vadd.f32 %v1542_v29, %v1535_v28  ;;  %v1536_v34 = vmul.f32 %v1513_v32, %v5128_v11  ;;  %v1814_v28 = vld [vmem:[%s6046_s21 + $0xb8] sm:$0xff]  ;;  %v4660_v29 = vpack.c.bf16 %v1796_v26, %v1795_v25 }
 0xa60   :  { %v4662_v30 = vpack.c.bf16 %v1814_v28, %v1813_v27  ;;  %v1798_v32 = vld [vmem:[%s6046_s21 + $0x38] sm:$0xff] }
 0xa61   :  { %v1541_v35 = vadd.f32 %v1537_v31, %v1536_v34  ;;  %v4460_v36 = vpop.f32.mrb[12].mxu1  ;;  %4469 = vmatprep.mubr.msk.f32.mxu0 %vm100_vm0, %v1544_v33  ;;  %v1797_v31 = vld [vmem:[%s6046_s21 + $0x30] sm:$0xff]  ;;  %v1815_v33 = vld [vmem:[%s6046_s21 + $0xc0] sm:$0xff]  ;;  %v1816_v34 = vld [vmem:[%s6046_s21 + $0xc8] sm:$0xff] }
 0xa62   :  { %v1523_v37 = vpop.f32.mrb[13].mxu1  ;;  %v1539_v39 = vmul.f32 %v4460_v36, %v5160_v21  ;;  %v4666_v36 = vpack.c.bf16 %v1816_v34, %v1815_v33 }
 0xa63   :  { %v1538_v38 = vmul.f32 %v1523_v37, %v5150_v17  ;;  %v1799_v37 = vld [vmem:[%s6046_s21 + $0x40] sm:$0xff] }
 0xa65   :  { %v1543_v40 = vadd.f32 %v1541_v35, %v1538_v38  ;;  %v4664_v35 = vpack.c.bf16 %v1798_v32, %v1797_v31  ;;  %v1800_v38 = vld [vmem:[%s6046_s21 + $0x48] sm:$0xff]  ;;  %v3992_v31 = vld [vmem:[%s6047_s22] ss:$0 sm:$0xff] }
 0xa67   :  { %v1545_v41 = vadd.f32 %v1543_v40, %v1539_v39  ;;  %v1817_v39 = vld [vmem:[%s6046_s21 + $0xd0] sm:$0xff]  ;;  %v1818_v40 = vld [vmem:[%s6046_s21 + $0xd8] sm:$0xff] }
 0xa69   :  { %4470 = vmatmul.mubr.msk.f32.vlgmr.msra.gmra.mrb[26].mxu0 %vm100_vm0, %v1545_v41  ;;  %v4668_v41 = vpack.c.bf16 %v1800_v38, %v1799_v37 }
 0xa6a   :  { %4653 = vmatpush3.bf16.msra.mxu0 %v4652_v6  ;;  %v1701_v6 = vrot.slane %v1692_v2, %v1700_v3  ;;  %v4000_v2 = vld [vmem:[%s6090_s2 + $0x1] ss:$0 sm:$0xff] }
 0xa6b   :  { %4655 = vmatprep.subr.bf16.mxu0 %v4654_v8 }
 0xa6e   :  { %4657 = vmatpush3.bf16.msra.mxu0 %v4656_v20 }
 0xa6f   :  { %4659 = vmatprep.subr.bf16.mxu0 %v4658_v23 }
 0xa72   :  { %4661 = vmatpush3.bf16.msra.mxu0 %v4660_v29 }
 0xa73   :  { %4663 = vmatprep.subr.bf16.mxu0 %v4662_v30 }
 0xa76   :  { %4665 = vmatpush3.bf16.msra.mxu0 %v4664_v35 }
 0xa77   :  { %4667 = vmatprep.subr.bf16.mxu0 %v4666_v36 }
 0xa7a   :  { %4669 = vmatpush3.bf16.msra.mxu0 %v4668_v41 }
 0xb3c   :  { %v4471_v42 = vpop.f32.mrb[26].mxu0 }
 0xb3d   :  { %v1635_v43 = vadd.f32 %v4471_v42, %v3985_v16  ;;  %v1629_v11 = vpop.f32.mrb[27].mxu0  ;;  %v1801_v42 = vld [vmem:[%s6046_s21 + $0x50] sm:$0xff] }
 0xb3e   :  { %v1630_v12 = vadd.f32 %v3985_v16, %v1629_v11  ;;  %v4670_v16 = vpack.c.bf16 %v1818_v40, %v1817_v39  ;;  %v1819_v11 = vld [vmem:[%s6046_s21 + $0xe0] sm:$0xff] }
 0xb3f   :  { %v1639_v14 = vadd.f32 %v1635_v43, %v5284_v18  ;;  %v1802_v43 = vld [vmem:[%s6046_s21 + $0x58] sm:$0xff] }
 0xb40   :  { %v1638_v44 = vadd.f32 %v1630_v12, %v5282_v15  ;;  %v1820_v12 = vld [vmem:[%s6046_s21 + $0xe8] sm:$0xff]  ;;  %4671 = vmatprep.subr.bf16.mxu0 %v4670_v16 }
 0xb41   :  { %v1645_v17 = vsel %vm100_vm0, %v1639_v14, 0.0 }
 0xb42   :  { %1646 = vadd.xlane.f32.xlu0 %v1645_v17  ;;  %v1642_v21 = vsel %vm100_vm0, %v1638_v44, 0.0 }
 0xb43   :  { %1643 = vadd.xlane.f32.xlu1 %v1642_v21 }
 0xbcf   :  { %v1647_v45 = vpop.xlane.xlu0 %1646 }
 0xbd0   :  { %v1649_v46 = vmul.f32 0.03125, %v1647_v45  ;;  %v1644_v7 = vpop.xlane.xlu1 %1643 }
 0xbd1   :  { %v1648_v5 = vmul.f32 0.03125, %v1644_v7 }
 0xbd2   :  { %v5393_v47 = vsub.f32 %v1639_v14, %v1649_v46  ;;  %v4672_v14 = vpack.c.bf16 %v1802_v43, %v1801_v42 }
 0xbd3   :  { %v5395_v48 = vsub.f32 %v1638_v44, %v1648_v5  ;;  %v4674_v44 = vpack.c.bf16 %v1820_v12, %v1819_v11 }
 0xbd4   :  { %v1653_v49 = vmul.f32 %v5393_v47, %v5393_v47  ;;  %4673 = vmatpush3.bf16.msra.mxu0 %v4672_v14 }
 0xbd5   :  { %v1652_v15 = vmul.f32 %v5395_v48, %v5395_v48  ;;  %4675 = vmatprep.subr.bf16.mxu0 %v4674_v44 }
 0xbd6   :  { %v1657_v18 = vsel %vm100_vm0, %v1653_v49, 0.0 }
 0xbd7   :  { %1658 = vadd.xlane.f32.xlu0 %v1657_v18  ;;  %v1654_v50 = vsel %vm100_vm0, %v1652_v15, 0.0  ;;  %v3988_v18 = vld [vmem:[%s6040_s15] ss:$0 sm:$0xff] }
 0xbd8   :  { %1655 = vadd.xlane.f32.xlu1 %v1654_v50 }
 0xc64   :  { %v1659_v17 = vpop.xlane.xlu0 %1658 }
 0xc65   :  { %v1661_v21 = vmul.f32 0.03125, %v1659_v17  ;;  %v1656_v45 = vpop.xlane.xlu1 %1655 }
 0xc66   :  { %v1660_v46 = vmul.f32 0.03125, %v1656_v45 }
 0xc67   :  { %v1663_v7 = vadd.f32 1e-05, %v1661_v21 }
 0xc68   :  { %v1662_v5 = vadd.f32 1e-05, %v1660_v46 }
 0xc69   :  { %4846 = vrsqrt.f32 %v1663_v7  ;;  %v3995_v7 = vld [vmem:[%s6088_s6 + $0x20] sm:$0xff] }
 0xc6a   :  { %4848 = vrsqrt.f32 %v1662_v5  ;;  %v3996_v5 = vld [vmem:[%s6088_s6 + $0x28] sm:$0xff] }
 0xc73   :  { %v4847_v49 = vpop.eup %4846 }
 0xc74   :  { %v4849_v15 = vpop.eup %4848  ;;  %v1667_v24 = vmul.f32 %v4847_v49, %v5393_v47  ;;  %v1804_v47 = vld [vmem:[%s6046_s21 + $0x68] sm:$0xff]  ;;  %v4682_v49 = vpack.c.bf16 %v3996_v5, %v3995_v7 }
 0xc75   :  { %v1666_v50 = vmul.f32 %v4849_v15, %v5395_v48  ;;  %v1803_v48 = vld [vmem:[%s6046_s21 + $0x60] sm:$0xff]  ;;  %v3997_v15 = vld [vmem:[%s6088_s6 + $0x30] sm:$0xff] }
 0xc76   :  { %v1675_v53 = vmul.f32 %v3988_v18, %v1667_v24  ;;  %v4676_v55 = vpack.c.bf16 %v1804_v47, %v1803_v48  ;;  %4683 = vmatprep.subr.bf16.mxu1 %v4682_v49  ;;  %v3993_v47 = vld [vmem:[%s6042_s17] ss:$0 sm:$0xff] }
 0xc77   :  { %v1674_v22 = vmul.f32 %v3988_v18, %v1666_v50  ;;  %v3998_v18 = vld [vmem:[%s6088_s6 + $0x38] sm:$0xff] }
 0xc78   :  { %v1683_v54 = vadd.f32 %v3989_v51, %v1675_v53  ;;  %4677 = vmatpush3.bf16.msra.mxu0 %v4676_v55  ;;  %v4686_v50 = vpack.c.bf16 %v3998_v18, %v3997_v15 }
 0xc79   :  { %v1682_v52 = vadd.f32 %v3989_v51, %v1674_v22  ;;  %4679 = vmatprep.subr.bf16.mxu0 %v4678_v58 }
 0xc7b   :  { %3990 = vmatmul.mubr.msk.f32.vlgmr.msra.gmra.mrb[14].mxu1 %vm100_vm0, %v1682_v52 }
 0xc7c   :  { %1780 = vmatprep.mubr.f32.mxu1 %v4962_v61  ;;  %4681 = vmatpush3.bf16.msra.mxu0 %v4680_v62 }
 0xc7d   :  { %4685 = vmatpush3.bf16.msra.mxu1 %v4682_v49 }
 0xc7e   :  { %4687 = vmatprep.subr.bf16.mxu1 %v4686_v50 }
 0xc7f   :  { %3991 = vmatmul.mubr.msk.f32.gmra.mrb[16].mxu1 %vm100_vm0, %v1683_v54 }
 0xc81   :  { %4689 = vmatpush3.bf16.msra.mxu1 %v4686_v50 }
 0xd4e   :  { %v1776_v8 = vpop.f32.mrb[14].mxu1 }
 0xd4f   :  { %v1777_v9 = vadd.f32 %v1776_v8, %v1697_v4  ;;  %v1778_v10 = vpop.f32.mrb[15].mxu1 }
 0xd50   :  { %v1779_v13 = vadd.f32 %v1778_v10, %v1701_v6  ;;  %v5593_v10 = vld [vmem:[%s6091_s3] sm:$0xff] }
 0xd51   :  { %v1787_v23 = vmax.f32 %v1777_v9, 0.0 }
 0xd52   :  { %v1788_v19 = vmax.f32 %v1779_v13, 0.0  ;;  %v1782_v20 = vpop.f32.mrb[16].mxu1 }
 0xd53   :  { %v1783_v25 = vadd.f32 %v1782_v20, %v1697_v4  ;;  %v1784_v26 = vpop.f32.mrb[17].mxu1 }
 0xd54   :  { %v1785_v27 = vadd.f32 %v1784_v26, %v1701_v6  ;;  %1894 = vmatprep.mubr.f32.mxu0 %v1788_v19  ;;  %v5611_v26 = vld [vmem:[%s6091_s3 + $0x10] sm:$0xff] }
 0xd55   :  { %1895 = vmatmul.mubr.f32.vlgmr.msra.gmra.mrb[28].mxu0 %v1787_v23  ;;  %v1789_v29 = vmax.f32 %v1783_v25, 0.0  ;;  %v5604_v23 = vld [vmem:[%s6091_s3 + $0x8] sm:$0xff] }
 0xd56   :  { %v1790_v28 = vmax.f32 %v1785_v27, 0.0 }
 0xd58   :  { %1899 = vmatprep.mubr.f32.mxu0 %v1790_v28  ;;  %v5621_v28 = vld [vmem:[%s6091_s3 + $0x18] sm:$0xff]  ;;  %s6099_s3 = smov 64  }
 0xd59   :  { %1900 = vmatmul.mubr.f32.gmra.mrb[30].mxu0 %v1789_v29 }
 0xe28   :  { %v4233_v30 = vpop.f32.mrb[28].mxu0 }
 0xe29   :  { %v4234_v32 = vpop.f32.mrb[29].mxu0 }
 0xe2a   :  { %v4235_v33 = vadd.f32 %v4234_v32, %v4233_v30 }
 0xe2c   :  { %v1897_v34 = vadd.f32 %v4235_v33, %v3992_v31  ;;  %v4236_v35 = vpop.f32.mrb[30].mxu0 }
 0xe2d   :  { %v4237_v36 = vpop.f32.mrb[31].mxu0 }
 0xe2e   :  { %v4238_v37 = vadd.f32 %v4237_v36, %v4236_v35  ;;  %v1905_v38 = vadd.f32 %v1897_v34, %v1682_v52 }
 0xe30   :  { %v1902_v39 = vadd.f32 %v4238_v37, %v3992_v31  ;;  %v1909_v40 = vsel %vm100_vm0, %v1905_v38, 0.0 }
 0xe31   :  { %1910 = vadd.xlane.f32.xlu1 %v1909_v40 }
 0xe32   :  { %v1906_v41 = vadd.f32 %v1902_v39, %v1683_v54 }
 0xe34   :  { %v1912_v16 = vsel %vm100_vm0, %v1906_v41, 0.0 }
 0xe35   :  { %1913 = vadd.xlane.f32.xlu0 %v1912_v16 }
 0xebe   :  { %v1911_v42 = vpop.xlane.xlu1 %1910 }
 0xebf   :  { %v1915_v43 = vmul.f32 0.03125, %v1911_v42 }
 0xec1   :  { %v1917_v11 = vsub.f32 %v1905_v38, %v1915_v43 }
 0xec2   :  { %v1914_v12 = vpop.xlane.xlu0 %1913 }
 0xec3   :  { %v1916_v14 = vmul.f32 0.03125, %v1914_v12  ;;  %v1919_v44 = vmul.f32 %v1917_v11, %v1917_v11 }
 0xec5   :  { %v1918_v17 = vsub.f32 %v1906_v41, %v1916_v14  ;;  %v1921_v21 = vsel %vm100_vm0, %v1919_v44, 0.0 }
 0xec6   :  { %1922 = vadd.xlane.f32.xlu1 %v1921_v21 }
 0xec7   :  { %v1920_v45 = vmul.f32 %v1918_v17, %v1918_v17 }
 0xec9   :  { %v1924_v46 = vsel %vm100_vm0, %v1920_v45, 0.0 }
 0xeca   :  { %1925 = vadd.xlane.f32.xlu0 %v1924_v46 }
 0xf53   :  { %v1923_v24 = vpop.xlane.xlu1 %1922 }
 0xf54   :  { %v1927_v51 = vmul.f32 0.03125, %v1923_v24 }
 0xf56   :  { %v1929_v22 = vadd.f32 1e-05, %v1927_v51 }
 0xf57   :  { %v1926_v52 = vpop.xlane.xlu0 %1925 }
 0xf58   :  { %4850 = vrsqrt.f32 %v1929_v22  ;;  %v1928_v53 = vmul.f32 0.03125, %v1926_v52 }
 0xf5a   :  { %v1930_v54 = vadd.f32 1e-05, %v1928_v53 }
 0xf5c   :  { %4852 = vrsqrt.f32 %v1930_v54 }
 0xf62   :  { %v4851_v48 = vpop.eup %4850 }
 0xf63   :  { %v1933_v55 = vmul.f32 %v4851_v48, %v1917_v11 }
 0xf65   :  { %v1941_v57 = vmul.f32 %v3993_v47, %v1933_v55 }
 0xf66   :  { %v4853_v58 = vpop.eup %4852 }
 0xf67   :  { %v1934_v59 = vmul.f32 %v4853_v58, %v1918_v17  ;;  %v5571_v60 = vadd.f32 %v3994_v56, %v1941_v57 }
 0xf69   :  { %v1942_v62 = vmul.f32 %v3993_v47, %v1934_v59  ;;  %4480 = vmatprep.mubr.msk.f32.mxu1 %vm100_vm0, %v5571_v60 }
 0xf6b   :  { %v5575_v63 = vadd.f32 %v3994_v56, %v1942_v62 }
 0xf6d   :  { %4481 = vmatmul.mubr.msk.f32.vlgmr.msra.gmra.mrb[18].mxu1 %vm100_vm0, %v5575_v63 }
0x1040   :  { %v4482_v4 = vpop.f32.mrb[18].mxu1 }
0x1041   :  { %v5582_v6 = vadd.f32 %v4482_v4, %v4000_v2  ;;  %v2036_v8 = vpop.f32.mrb[19].mxu1 }
0x1042   :  { %v5584_v9 = vadd.f32 %v4000_v2, %v2036_v8 }
0x1043   :  { %2156 = vrot.lane.b32.xlu0 %v5582_v6, %s6098_s25  ;;  %v2049_v30 = vmul.f32 %v5593_v10, %v5582_v6  ;;  %v2050_v31 = vmul.f32 %v5604_v23, %v5582_v6  ;;  %v2051_v32 = vmul.f32 %v5611_v26, %v5582_v6  ;;  %v2052_v33 = vmul.f32 %v5621_v28, %v5582_v6 }
0x1044   :  { %2054 = vrot.lane.b32.xlu1 %v5584_v9, %s6098_s25  ;;  %v2045_v13 = vmul.f32 %v5593_v10, %v5584_v9  ;;  %v2046_v25 = vmul.f32 %v5604_v23, %v5584_v9  ;;  %v2047_v27 = vmul.f32 %v5611_v26, %v5584_v9  ;;  %v2048_v29 = vmul.f32 %v5621_v28, %v5584_v9 }
0x1046   :  { %4485 = vmatprep.mubr.msk.f32.mxu1 %vm100_vm0, %v2045_v13 }
0x10b5   :  { %v2157_v20 = vpop.permute.xlu0 %2156 }
0x10b6   :  { %v2055_v19 = vpop.permute.xlu1 %2054 }
0x10b7   :  { %4483 = vmatprep.subr.msk.mxu1 %vm100_vm0, %v2055_v19 }
0x10b8   :  { %4484 = vmatpush3.xpose.msk.msra.mxu1 %vm100_vm0, %v2055_v19 }
0x10b9   :  { %4491 = vmatprep.subr.msk.mxu1 %vm100_vm0, %v2157_v20 }
0x10bb   :  { %4486 = vmatmul.mubr.msk.f32.vlgmr.msra.gmra.mrb[20].mxu1 %vm100_vm0, %v2046_v25 }
0x10bc   :  { %4488 = vmatprep.mubr.msk.f32.mxu1 %vm100_vm0, %v2047_v27  ;;  %4492 = vmatpush3.xpose.msk.msra.mxu1 %vm100_vm0, %v2157_v20 }
0x10bf   :  { %4489 = vmatmul.mubr.msk.f32.gmra.mrb[22].mxu1 %vm100_vm0, %v2048_v29 }
0x10c0   :  { %4493 = vmatprep.mubr.msk.f32.mxu1 %vm100_vm0, %v2049_v30 }
0x10c3   :  { %4494 = vmatmul.mubr.msk.f32.vlgmr.msra.gmra.mrb[24].mxu1 %vm100_vm0, %v2050_v31 }
0x10c4   :  { %4496 = vmatprep.mubr.msk.f32.mxu1 %vm100_vm0, %v2051_v32 }
0x10c7   :  { %4497 = vmatmul.mubr.msk.f32.gmra.mrb[26].mxu1 %vm100_vm0, %v2052_v33 }
0x118e   :  { %v4487_v34 = vpop.f32.mrb[20].mxu1 }
0x118f   :  { %v2258_v35 = vmul.f32 0.35355338, %v4487_v34  ;;  %v2136_v36 = vpop.f32.mrb[21].mxu1 }
0x1190   :  { %v2257_v37 = vmul.f32 0.35355338, %v2136_v36 }
0x1191   :  { %v2268_v38 = vsel %vm402_vm1, %v2258_v35, -inf }
0x1192   :  { %2269 = vmax.xlane.f32.xlu0 %v2268_v38  ;;  %v4490_v39 = vpop.f32.mrb[22].mxu1  ;;  %v2265_v40 = vsel %vm402_vm1, %v2257_v37, -inf }
0x1193   :  { %v2260_v41 = vmul.f32 0.35355338, %v4490_v39  ;;  %2266 = vmax.xlane.f32.xlu1 %v2265_v40  ;;  %v2146_v16 = vpop.f32.mrb[23].mxu1 }
0x1194   :  { %v2259_v42 = vmul.f32 0.35355338, %v2146_v16 }
0x1195   :  { %v2274_v43 = vsel %vm402_vm1, %v2260_v41, -inf }
0x1196   :  { %2275 = vmax.xlane.f32.xlu0 %v2274_v43  ;;  %v4495_v11 = vpop.f32.mrb[24].mxu1  ;;  %v2271_v12 = vsel %vm402_vm1, %v2259_v42, -inf }
0x1197   :  { %v2262_v14 = vmul.f32 0.35355338, %v4495_v11  ;;  %2272 = vmax.xlane.f32.xlu1 %v2271_v12  ;;  %v2238_v44 = vpop.f32.mrb[25].mxu1 }
0x1198   :  { %v2261_v17 = vmul.f32 0.35355338, %v2238_v44 }
0x1199   :  { %v2280_v21 = vsel %vm402_vm1, %v2262_v14, -inf }
0x119a   :  { %2281 = vmax.xlane.f32.xlu0 %v2280_v21  ;;  %v4498_v45 = vpop.f32.mrb[26].mxu1  ;;  %v2277_v46 = vsel %vm402_vm1, %v2261_v17, -inf }
0x119b   :  { %v2264_v7 = vmul.f32 0.35355338, %v4498_v45  ;;  %2278 = vmax.xlane.f32.xlu1 %v2277_v46  ;;  %v2248_v5 = vpop.f32.mrb[27].mxu1 }
0x119c   :  { %v2263_v49 = vmul.f32 0.35355338, %v2248_v5 }
0x119d   :  { %v2286_v15 = vsel %vm402_vm1, %v2264_v7, -inf }
0x119e   :  { %2287 = vmax.xlane.f32.xlu0 %v2286_v15  ;;  %v2283_v18 = vsel %vm402_vm1, %v2263_v49, -inf }
0x119f   :  { %2284 = vmax.xlane.f32.xlu1 %v2283_v18 }
0x121f   :  { %v2270_v50 = vpop.xlane.xlu0 %2269 }
0x1220   :  { %v2290_v24 = vsub.f32 %v2258_v35, %v2270_v50  ;;  %v2267_v51 = vpop.xlane.xlu1 %2266 }
0x1221   :  { %v2289_v22 = vsub.f32 %v2257_v37, %v2267_v51 }
0x1222   :  { %v2299_v52 = vmul.f32 1.442695, %v2290_v24 }
0x1223   :  { %v2297_v53 = vmul.f32 1.442695, %v2289_v22  ;;  %v2276_v54 = vpop.xlane.xlu0 %2275 }
0x1224   :  { %4854 = vpow2.f32 %v2299_v52  ;;  %v2292_v48 = vsub.f32 %v2260_v41, %v2276_v54  ;;  %v2273_v47 = vpop.xlane.xlu1 %2272 }
0x1225   :  { %4856 = vpow2.f32 %v2297_v53  ;;  %v2291_v55 = vsub.f32 %v2259_v42, %v2273_v47 }
0x1226   :  { %v2303_v56 = vmul.f32 1.442695, %v2292_v48 }
0x1227   :  { %v2301_v57 = vmul.f32 1.442695, %v2291_v55  ;;  %v2282_v58 = vpop.xlane.xlu0 %2281 }
0x1228   :  { %4858 = vpow2.f32 %v2303_v56  ;;  %v2294_v59 = vsub.f32 %v2262_v14, %v2282_v58  ;;  %v2279_v62 = vpop.xlane.xlu1 %2278  ;;  %v4021_v58 = vld [vmem:[%s6092_s30 + $0x20] sm:$0xff] }
0x1229   :  { %4860 = vpow2.f32 %v2301_v57  ;;  %v2293_v2 = vsub.f32 %v2261_v17, %v2279_v62 }
0x122a   :  { %v2307_v4 = vmul.f32 1.442695, %v2294_v59  ;;  %v4022_v59 = vld [vmem:[%s6092_s30 + $0x28] sm:$0xff] }
0x122b   :  { %v2305_v8 = vmul.f32 1.442695, %v2293_v2  ;;  %v2288_v13 = vpop.xlane.xlu0 %2287  ;;  %v4690_v62 = vpack.c.bf16 %v4022_v59, %v4021_v58  ;;  %v4023_v2 = vld [vmem:[%s6092_s30 + $0x30] sm:$0xff] }
0x122c   :  { %4862 = vpow2.f32 %v2307_v4  ;;  %v2296_v19 = vsub.f32 %v2264_v7, %v2288_v13  ;;  %v2285_v20 = vpop.xlane.xlu1 %2284  ;;  %v4024_v4 = vld [vmem:[%s6092_s30 + $0x38] sm:$0xff]  ;;  %v4035_v59 = vld [vmem:[%s6095_s0 + $0x30] sm:$0xff] }
0x122d   :  { %4864 = vpow2.f32 %v2305_v8  ;;  %v2295_v25 = vsub.f32 %v2263_v49, %v2285_v20  ;;  %4691 = vmatprep.subr.bf16.mxu0 %v4690_v62  ;;  %v4694_v8 = vpack.c.bf16 %v4024_v4, %v4023_v2  ;;  %v4935_v4 = vld [vmem:[%s6096_s23 + $0x8] sm:$0xff] }
0x122e   :  { %v4855_v27 = vpop.eup %4854  ;;  %v2311_v29 = vmul.f32 1.442695, %v2296_v19  ;;  %4693 = vmatpush3.bf16.msra.mxu0 %v4690_v62  ;;  %v4036_v62 = vld [vmem:[%s6095_s0 + $0x38] sm:$0xff] }
0x122f   :  { %v4857_v30 = vpop.eup %4856  ;;  %v2309_v31 = vmul.f32 1.442695, %v2295_v25  ;;  %v2316_v32 = vsel %vm402_vm1, %v4855_v27, 0.0  ;;  %4695 = vmatprep.subr.bf16.mxu0 %v4694_v8  ;;  %v4702_v2 = vpack.c.bf16 %v4036_v62, %v4035_v59 }
0x1230   :  { %4866 = vpow2.f32 %v2311_v29  ;;  %2317 = vadd.xlane.f32.xlu0 %v2316_v32  ;;  %v2313_v33 = vsel %vm402_vm1, %v4857_v30, 0.0 }
0x1231   :  { %4868 = vpow2.f32 %v2309_v31  ;;  %2314 = vadd.xlane.f32.xlu1 %v2313_v33 }
0x1232   :  { %v4859_v34 = vpop.eup %4858  ;;  %4697 = vmatpush3.bf16.msra.mxu0 %v4694_v8 }
0x1233   :  { %v4861_v35 = vpop.eup %4860  ;;  %v2322_v36 = vsel %vm402_vm1, %v4859_v34, 0.0 }
0x1234   :  { %2323 = vadd.xlane.f32.xlu0 %v2322_v36  ;;  %v2319_v37 = vsel %vm402_vm1, %v4861_v35, 0.0 }
0x1235   :  { %2320 = vadd.xlane.f32.xlu1 %v2319_v37 }
0x1236   :  { %v4863_v38 = vpop.eup %4862 }
0x1237   :  { %v4865_v39 = vpop.eup %4864  ;;  %v2328_v40 = vsel %vm402_vm1, %v4863_v38, 0.0 }
0x1238   :  { %2329 = vadd.xlane.f32.xlu0 %v2328_v40  ;;  %v2325_v41 = vsel %vm402_vm1, %v4865_v39, 0.0 }
0x1239   :  { %2326 = vadd.xlane.f32.xlu1 %v2325_v41 }
0x123a   :  { %v4867_v16 = vpop.eup %4866 }
0x123b   :  { %v4869_v42 = vpop.eup %4868  ;;  %v2334_v43 = vsel %vm402_vm1, %v4867_v16, 0.0 }
0x123c   :  { %2335 = vadd.xlane.f32.xlu0 %v2334_v43  ;;  %v2331_v11 = vsel %vm402_vm1, %v4869_v42, 0.0 }
0x123d   :  { %2332 = vadd.xlane.f32.xlu1 %v2331_v11 }
0x124e   :  { %2353 = vrot.lane.b32.xlu1 %v5584_v9, %s6099_s3 }
0x1252   :  { %2453 = vrot.lane.b32.xlu0 %v5582_v6, %s6099_s3 }
0x12bd   :  { %v2318_v12 = vpop.xlane.xlu0 %2317 }
0x12be   :  { %v2315_v14 = vpop.xlane.xlu1 %2314 }
0x12bf   :  { %4870 = vrcp.f32 %v2315_v14  ;;  %v4026_v14 = vld [vmem:[%s6093_s29 + $0x1] ss:$0 sm:$0xff]  ;;  %s6102_s29 = sld [smem:[#allocation17_spill]] }
0x12c0   :  { %4872 = vrcp.f32 %v2318_v12  ;;  %v4934_v12 = vld [vmem:[%s6096_s23] sm:$0xff] }
0x12c1   :  { %v2324_v44 = vpop.xlane.xlu0 %2323 }
0x12c2   :  { %v2321_v17 = vpop.xlane.xlu1 %2320 }
0x12c3   :  { %4874 = vrcp.f32 %v2321_v17 }
0x12c4   :  { %4876 = vrcp.f32 %v2324_v44 }
0x12c5   :  { %v2330_v21 = vpop.xlane.xlu0 %2329 }
0x12c6   :  { %v2327_v45 = vpop.xlane.xlu1 %2326 }
0x12c7   :  { %4878 = vrcp.f32 %v2327_v45 }
0x12c8   :  { %4880 = vrcp.f32 %v2330_v21 }
0x12c9   :  { %v4871_v46 = vpop.eup %4870  ;;  %v2336_v7 = vpop.xlane.xlu0 %2335 }
0x12ca   :  { %v2333_v5 = vpop.xlane.xlu1 %2332  ;;  %v2345_v49 = vmul.f32 %v4871_v46, %v4857_v30  ;;  %v4873_v9 = vpop.eup %4872 }
0x12cb   :  { %4882 = vrcp.f32 %v2333_v5  ;;  %v2346_v18 = vmul.f32 %v4873_v9, %v4855_v27 }
0x12cc   :  { %4501 = vmatprep.mubr.msk.f32.mxu1 %vm402_vm1, %v2345_v49  ;;  %4884 = vrcp.f32 %v2336_v7 }
0x12cd   :  { %v4875_v6 = vpop.eup %4874  ;;  %v2454_v24 = vpop.permute.xlu0 %2453 }
0x12ce   :  { %v2354_v15 = vpop.permute.xlu1 %2353  ;;  %v4877_v50 = vpop.eup %4876  ;;  %v2347_v51 = vmul.f32 %v4875_v6, %v4861_v35 }
0x12cf   :  { %4499 = vmatprep.subr.mxu1 %v2354_v15  ;;  %v2348_v52 = vmul.f32 %v4877_v50, %v4859_v34 }
0x12d0   :  { %4500 = vmatpush3.msra.mxu1 %v2354_v15 }
0x12d1   :  { %v4879_v22 = vpop.eup %4878  ;;  %4502 = vmatmul.mubr.msk.f32.vlgmr.msra.gmra.mrb[28].mxu1 %vm402_vm1, %v2346_v18  ;;  %4507 = vmatprep.subr.mxu1 %v2454_v24 }
0x12d2   :  { %4504 = vmatprep.mubr.msk.f32.mxu1 %vm402_vm1, %v2347_v51  ;;  %4508 = vmatpush3.msra.mxu1 %v2454_v24  ;;  %v4881_v53 = vpop.eup %4880  ;;  %v2349_v54 = vmul.f32 %v4879_v22, %v4865_v39 }
0x12d3   :  { %v2350_v47 = vmul.f32 %v4881_v53, %v4863_v38  ;;  %v4042_v53 = vld [vmem:[%s6094_s8 + $0x28] sm:$0xff] }
0x12d5   :  { %v4883_v48 = vpop.eup %4882  ;;  %4505 = vmatmul.mubr.msk.f32.gmra.mrb[30].mxu1 %vm402_vm1, %v2348_v52 }
0x12d6   :  { %4509 = vmatprep.mubr.msk.f32.mxu1 %vm402_vm1, %v2349_v54  ;;  %v4885_v55 = vpop.eup %4884  ;;  %v2351_v56 = vmul.f32 %v4883_v48, %v4869_v42  ;;  %v4033_v48 = vld [vmem:[%s6095_s0 + $0x20] sm:$0xff] }
0x12d7   :  { %v2352_v57 = vmul.f32 %v4885_v55, %v4867_v16 }
0x12d9   :  { %4510 = vmatmul.mubr.msk.f32.vlgmr.msra.gmra.mrb[32].mxu1 %vm402_vm1, %v2350_v47  ;;  %v4034_v47 = vld [vmem:[%s6095_s0 + $0x28] sm:$0xff] }
0x12da   :  { %4512 = vmatprep.mubr.msk.f32.mxu1 %vm402_vm1, %v2351_v56  ;;  %v4698_v55 = vpack.c.bf16 %v4034_v47, %v4033_v48  ;;  %v4043_v56 = vld [vmem:[%s6094_s8 + $0x30] sm:$0xff] }
0x12dc   :  { %4699 = vmatprep.subr.bf16.mxu1 %v4698_v55 }
0x12dd   :  { %4513 = vmatmul.mubr.msk.f32.gmra.mrb[34].mxu1 %vm402_vm1, %v2352_v57  ;;  %v4044_v57 = vld [vmem:[%s6094_s8 + $0x38] sm:$0xff] }
0x12de   :  { %v4710_v58 = vpack.c.bf16 %v4044_v57, %v4043_v56  ;;  %4701 = vmatpush3.bf16.msra.mxu1 %v4698_v55 }
0x12df   :  { %4703 = vmatprep.subr.bf16.mxu1 %v4702_v2 }
0x12e2   :  { %4705 = vmatpush3.bf16.msra.mxu1 %v4702_v2 }
0x13a4   :  { %v4503_v13 = vpop.f32.mrb[28].mxu1 }
0x13a5   :  { %v2554_v19 = vmul.f32 %v5604_v23, %v4503_v13  ;;  %v2434_v20 = vpop.f32.mrb[29].mxu1 }
0x13a6   :  { %v2553_v25 = vmul.f32 %v5593_v10, %v2434_v20 }
0x13a8   :  { %v2561_v27 = vadd.f32 %v2554_v19, %v2553_v25  ;;  %v4506_v29 = vpop.f32.mrb[30].mxu1 }
0x13a9   :  { %v2444_v30 = vpop.f32.mrb[31].mxu1  ;;  %v2556_v32 = vmul.f32 %v5621_v28, %v4506_v29 }
0x13aa   :  { %v2555_v31 = vmul.f32 %v5611_v26, %v2444_v30  ;;  %v4031_v30 = vld [vmem:[%s6038_s13 + $0x1] ss:$0 sm:$0xff] }
0x13ac   :  { %v2563_v33 = vadd.f32 %v2561_v27, %v2555_v31  ;;  %v4511_v34 = vpop.f32.mrb[32].mxu1 }
0x13ad   :  { %v2558_v35 = vmul.f32 %v5604_v23, %v4511_v34  ;;  %v2534_v36 = vpop.f32.mrb[33].mxu1  ;;  %v4032_v34 = vld [vmem:[%s6039_s14 + $0x1] ss:$0 sm:$0xff] }
0x13ae   :  { %v2565_v37 = vadd.f32 %v2563_v33, %v2556_v32  ;;  %v2557_v38 = vmul.f32 %v5593_v10, %v2534_v36 }
0x13b0   :  { %v2562_v39 = vadd.f32 %v2558_v35, %v2557_v38  ;;  %v4514_v40 = vpop.f32.mrb[34].mxu1  ;;  %4523 = vmatprep.mubr.msk.f32.mxu0 %vm100_vm0, %v2565_v37 }
0x13b1   :  { %v2544_v41 = vpop.f32.mrb[35].mxu1  ;;  %v2560_v42 = vmul.f32 %v5621_v28, %v4514_v40 }
0x13b2   :  { %v2559_v16 = vmul.f32 %v5611_v26, %v2544_v41 }
0x13b4   :  { %v2564_v43 = vadd.f32 %v2562_v39, %v2559_v16  ;;  %v4046_v39 = vld [vmem:[%s6035_s10 + $0x1] ss:$0 sm:$0xff] }
0x13b6   :  { %v2566_v11 = vadd.f32 %v2564_v43, %v2560_v42  ;;  %v4038_v43 = vld [vmem:[%s6097_s24 + $0x1] ss:$0 sm:$0xff] }
0x13b8   :  { %4524 = vmatmul.mubr.msk.f32.vlgmr.msra.gmra.mrb[32].mxu0 %vm100_vm0, %v2566_v11 }
0x13b9   :  { %4545 = vmatprep.mubr.msk.f32.mxu0 %vm100_vm0, %v4934_v12 }
0x148b   :  { %v4525_v44 = vpop.f32.mrb[32].mxu0 }
0x148c   :  { %v2658_v17 = vadd.f32 %v4525_v44, %v4026_v14  ;;  %v2652_v21 = vpop.f32.mrb[33].mxu0 }
0x148d   :  { %v2653_v45 = vadd.f32 %v4026_v14, %v2652_v21 }
0x148e   :  { %v2662_v46 = vadd.f32 %v2658_v17, %v5575_v63 }
0x148f   :  { %v2661_v7 = vadd.f32 %v2653_v45, %v5571_v60  ;;  %v4041_v60 = vld [vmem:[%s6094_s8 + $0x20] sm:$0xff] }
0x1490   :  { %v2670_v5 = vsel %vm100_vm0, %v2662_v46, 0.0  ;;  %v4706_v54 = vpack.c.bf16 %v4042_v53, %v4041_v60 }
0x1491   :  { %2671 = vadd.xlane.f32.xlu0 %v2670_v5  ;;  %v2667_v49 = vsel %vm100_vm0, %v2661_v7, 0.0 }
0x1492   :  { %2668 = vadd.xlane.f32.xlu1 %v2667_v49  ;;  %4707 = vmatprep.subr.bf16.mxu0 %v4706_v54 }
0x1493   :  { %4709 = vmatpush3.bf16.msra.mxu0 %v4706_v54 }
0x1494   :  { %4711 = vmatprep.subr.bf16.mxu0 %v4710_v58 }
0x1497   :  { %4713 = vmatpush3.bf16.msra.mxu0 %v4710_v58 }
0x149a   :  { %4546 = vmatmul.mubr.msk.f32.vlgmr.msra.gmra.mrb[34].mxu0 %vm100_vm0, %v4935_v4 }
0x151e   :  { %v2672_v9 = vpop.xlane.xlu0 %2671 }
0x151f   :  { %v2674_v6 = vmul.f32 0.03125, %v2672_v9  ;;  %v2669_v15 = vpop.xlane.xlu1 %2668 }
0x1520   :  { %v2673_v18 = vmul.f32 0.03125, %v2669_v15 }
0x1521   :  { %v2676_v50 = vsub.f32 %v2662_v46, %v2674_v6 }
0x1522   :  { %v2675_v24 = vsub.f32 %v2661_v7, %v2673_v18 }
0x1523   :  { %v2678_v51 = vmul.f32 %v2676_v50, %v2676_v50 }
0x1524   :  { %v2677_v22 = vmul.f32 %v2675_v24, %v2675_v24 }
0x1525   :  { %v2682_v52 = vsel %vm100_vm0, %v2678_v51, 0.0 }
0x1526   :  { %2683 = vadd.xlane.f32.xlu0 %v2682_v52  ;;  %v2679_v63 = vsel %vm100_vm0, %v2677_v22, 0.0 }
0x1527   :  { %2680 = vadd.xlane.f32.xlu1 %v2679_v63 }
0x156d   :  { %v4547_v40 = vpop.f32.mrb[34].mxu0 }
0x156e   :  { %v5746_v41 = vadd.f32 %v4547_v40, %v4046_v39  ;;  %v2882_v16 = vpop.f32.mrb[35].mxu0 }
0x156f   :  { %v5748_v42 = vadd.f32 %v4046_v39, %v2882_v16 }
0x1570   :  { %4556 = vmatprep.subr.msk.mxu0 %vm100_vm0, %v5746_v41 }
0x1571   :  { %4548 = vmatprep.subr.msk.mxu1 %vm100_vm0, %v5748_v42  ;;  %4557 = vmatpush3.xpose.msk.msra.mxu0 %vm100_vm0, %v5746_v41 }
0x15b3   :  { %v2684_v8 = vpop.xlane.xlu0 %2683 }
0x15b4   :  { %v2686_v13 = vmul.f32 0.03125, %v2684_v8  ;;  %v2681_v19 = vpop.xlane.xlu1 %2680 }
0x15b5   :  { %v2685_v20 = vmul.f32 0.03125, %v2681_v19 }
0x15b6   :  { %v2688_v25 = vadd.f32 1e-05, %v2686_v13 }
0x15b7   :  { %v2687_v27 = vadd.f32 1e-05, %v2685_v20 }
0x15b8   :  { %4886 = vrsqrt.f32 %v2688_v25 }
0x15b9   :  { %4888 = vrsqrt.f32 %v2687_v27 }
0x15c2   :  { %v4887_v29 = vpop.eup %4886 }
0x15c3   :  { %v4889_v31 = vpop.eup %4888  ;;  %v2692_v32 = vmul.f32 %v4887_v29, %v2676_v50 }
0x15c4   :  { %v2691_v33 = vmul.f32 %v4889_v31, %v2675_v24 }
0x15c5   :  { %v2700_v35 = vmul.f32 %v4031_v30, %v2692_v32 }
0x15c6   :  { %v2699_v36 = vmul.f32 %v4031_v30, %v2691_v33 }
0x15c7   :  { %v5737_v38 = vadd.f32 %v4032_v34, %v2700_v35 }
0x15c8   :  { %v5735_v37 = vadd.f32 %v4032_v34, %v2699_v36 }
0x15ca   :  { %4534 = vmatprep.mubr.msk.f32.mxu1 %vm100_vm0, %v5735_v37 }
0x15cb   :  { %4535 = vmatmul.mubr.msk.f32.vlgmr.msra.gmra.mrb[36].mxu1 %vm100_vm0, %v5737_v38 }
0x15cc   :  { %4549 = vmatpush3.xpose.msk.msra.mxu1 %vm100_vm0, %v5748_v42 }
0x169e   :  { %v4536_v11 = vpop.f32.mrb[36].mxu1 }
0x169f   :  { %v2800_v12 = vadd.f32 %v4536_v11, %v4038_v43  ;;  %v2794_v14 = vpop.f32.mrb[37].mxu1 }
0x16a0   :  { %v2795_v44 = vadd.f32 %v4038_v43, %v2794_v14 }
0x16a1   :  { %v2896_v17 = vmul.f32 %v5604_v23, %v2800_v12  ;;  %v2895_v21 = vmul.f32 %v5593_v10, %v2800_v12  ;;  %v2897_v7 = vmul.f32 %v5611_v26, %v2800_v12  ;;  %v2898_v49 = vmul.f32 %v5621_v28, %v2800_v12 }
0x16a2   :  { %v2892_v45 = vmul.f32 %v5604_v23, %v2795_v44  ;;  %v2891_v46 = vmul.f32 %v5593_v10, %v2795_v44  ;;  %v2893_v5 = vmul.f32 %v5611_v26, %v2795_v44  ;;  %v2894_v9 = vmul.f32 %v5621_v28, %v2795_v44 }
0x16a3   :  { %4558 = vmatprep.mubr.msk.f32.mxu0 %vm100_vm0, %v2895_v21 }
0x16a4   :  { %4550 = vmatprep.mubr.msk.f32.mxu1 %vm100_vm0, %v2891_v46  ;;  %4559 = vmatmul.mubr.msk.f32.vlgmr.msra.gmra.mrb[36].mxu0 %vm100_vm0, %v2896_v17 }
0x16a5   :  { %4551 = vmatmul.mubr.msk.f32.vlgmr.msra.gmra.mrb[38].mxu1 %vm100_vm0, %v2892_v45  ;;  %4561 = vmatprep.mubr.msk.f32.mxu0 %vm100_vm0, %v2897_v7 }
0x16a6   :  { %4553 = vmatprep.mubr.msk.f32.mxu1 %vm100_vm0, %v2893_v5 }
0x16a8   :  { %4562 = vmatmul.mubr.msk.f32.gmra.mrb[38].mxu0 %vm100_vm0, %v2898_v49 }
0x16a9   :  { %4554 = vmatmul.mubr.msk.f32.gmra.mrb[40].mxu1 %vm100_vm0, %v2894_v9 }
0x1777   :  { %v4560_v6 = vpop.f32.mrb[36].mxu0 }
0x1778   :  { %v3104_v15 = vmul.f32 0.35355338, %v4560_v6  ;;  %v4552_v18 = vpop.f32.mrb[38].mxu1  ;;  %v3080_v50 = vpop.f32.mrb[37].mxu0 }
0x1779   :  { %v3103_v24 = vmul.f32 0.35355338, %v3080_v50  ;;  %v2980_v51 = vpop.f32.mrb[39].mxu1  ;;  %v3100_v22 = vmul.f32 0.35355338, %v4552_v18 }
0x177a   :  { %v3122_v52 = vsel %vm402_vm1, %v3104_v15, -inf  ;;  %v3099_v63 = vmul.f32 0.35355338, %v2980_v51 }
0x177b   :  { %3123 = vmax.xlane.f32.xlu0 %v3122_v52  ;;  %v4563_v60 = vpop.f32.mrb[38].mxu0  ;;  %v3119_v53 = vsel %vm402_vm1, %v3103_v24, -inf  ;;  %v3110_v56 = vsel %vm402_vm1, %v3100_v22, -inf }
0x177c   :  { %3120 = vmax.xlane.f32.xlu1 %v3119_v53  ;;  %v4555_v54 = vpop.f32.mrb[40].mxu1  ;;  %v3090_v48 = vpop.f32.mrb[39].mxu0  ;;  %v3107_v58 = vsel %vm402_vm1, %v3099_v63, -inf  ;;  %v3106_v59 = vmul.f32 0.35355338, %v4563_v60 }
0x177d   :  { %v2990_v47 = vpop.f32.mrb[41].mxu1  ;;  %v3102_v55 = vmul.f32 0.35355338, %v4555_v54  ;;  %v3105_v2 = vmul.f32 0.35355338, %v3090_v48 }
0x177e   :  { %v3101_v57 = vmul.f32 0.35355338, %v2990_v47  ;;  %v3128_v8 = vsel %vm402_vm1, %v3106_v59, -inf }
0x177f   :  { %3111 = vmax.xlane.f32.xlu0 %v3110_v56  ;;  %v3116_v62 = vsel %vm402_vm1, %v3102_v55, -inf  ;;  %v3125_v13 = vsel %vm402_vm1, %v3105_v2, -inf }
0x1780   :  { %3108 = vmax.xlane.f32.xlu1 %v3107_v58  ;;  %v3113_v4 = vsel %vm402_vm1, %v3101_v57, -inf }
0x1783   :  { %3117 = vmax.xlane.f32.xlu0 %v3116_v62 }
0x1784   :  { %3114 = vmax.xlane.f32.xlu1 %v3113_v4 }
0x1787   :  { %3129 = vmax.xlane.f32.xlu0 %v3128_v8 }
0x1788   :  { %3126 = vmax.xlane.f32.xlu1 %v3125_v13 }
0x1808   :  { %v3124_v19 = vpop.xlane.xlu0 %3123 }
0x1809   :  { %v3136_v20 = vsub.f32 %v3104_v15, %v3124_v19  ;;  %v3121_v25 = vpop.xlane.xlu1 %3120 }
0x180a   :  { %v3135_v27 = vsub.f32 %v3103_v24, %v3121_v25 }
0x180b   :  { %v3149_v29 = vmul.f32 1.442695, %v3136_v20 }
0x180c   :  { %v3147_v30 = vmul.f32 1.442695, %v3135_v27  ;;  %v3112_v31 = vpop.xlane.xlu0 %3111 }
0x180d   :  { %4890 = vpow2.f32 %v3149_v29  ;;  %v3132_v32 = vsub.f32 %v3100_v22, %v3112_v31  ;;  %v3109_v33 = vpop.xlane.xlu1 %3108 }
0x180e   :  { %4892 = vpow2.f32 %v3147_v30  ;;  %v3131_v34 = vsub.f32 %v3099_v63, %v3109_v33 }
0x180f   :  { %v3141_v35 = vmul.f32 1.442695, %v3132_v32 }
0x1810   :  { %v3139_v36 = vmul.f32 1.442695, %v3131_v34  ;;  %v3118_v39 = vpop.xlane.xlu0 %3117 }
0x1811   :  { %4894 = vpow2.f32 %v3141_v35  ;;  %v3115_v40 = vpop.xlane.xlu1 %3114  ;;  %v3134_v16 = vsub.f32 %v3102_v55, %v3118_v39  ;;  %v4067_v39 = vld [vmem:[%s6100_s27 + $0x20] sm:$0xff] }
0x1812   :  { %4896 = vpow2.f32 %v3139_v36  ;;  %v3133_v43 = vsub.f32 %v3101_v57, %v3115_v40  ;;  %v4068_v40 = vld [vmem:[%s6100_s27 + $0x28] sm:$0xff] }
0x1813   :  { %v3145_v21 = vmul.f32 1.442695, %v3134_v16  ;;  %v4714_v16 = vpack.c.bf16 %v4068_v40, %v4067_v39  ;;  %v4107_v39 = vld [vmem:[%s6046_s21 + $0x188] sm:$0xff]  ;;  %v4090_v40 = vld [vmem:[%s6046_s21 + $0x100] sm:$0xff] }
0x1814   :  { %v3130_v11 = vpop.xlane.xlu0 %3129  ;;  %v3143_v7 = vmul.f32 1.442695, %v3133_v43  ;;  %v4069_v43 = vld [vmem:[%s6100_s27 + $0x30] sm:$0xff] }
0x1815   :  { %v3138_v12 = vsub.f32 %v3106_v59, %v3130_v11  ;;  %v3127_v14 = vpop.xlane.xlu1 %3126  ;;  %v4070_v11 = vld [vmem:[%s6100_s27 + $0x38] sm:$0xff]  ;;  %s6103_s27 = sld [smem:[#allocation18_spill]] }
0x1816   :  { %v3137_v44 = vsub.f32 %v3105_v2, %v3127_v14 }
0x1817   :  { %v4891_v17 = vpop.eup %4890  ;;  %v3153_v45 = vmul.f32 1.442695, %v3138_v12  ;;  %v4718_v12 = vpack.c.bf16 %v4070_v11, %v4069_v43  ;;  %v4091_v43 = vld [vmem:[%s6046_s21 + $0x108] sm:$0xff]  ;;  %v4108_v11 = vld [vmem:[%s6046_s21 + $0x190] sm:$0xff] }
0x1818   :  { %v4893_v46 = vpop.eup %4892  ;;  %v3151_v5 = vmul.f32 1.442695, %v3137_v44  ;;  %v3170_v49 = vsel %vm402_vm1, %v4891_v17, 0.0 }
0x1819   :  { %4898 = vpow2.f32 %v3153_v45  ;;  %3171 = vadd.xlane.f32.xlu0 %v3170_v49  ;;  %v3167_v9 = vsel %vm402_vm1, %v4893_v46, 0.0 }
0x181a   :  { %4900 = vpow2.f32 %v3151_v5  ;;  %3168 = vadd.xlane.f32.xlu1 %v3167_v9 }
0x181b   :  { %v4895_v6 = vpop.eup %4894  ;;  %4902 = vpow2.f32 %v3145_v21 }
0x181c   :  { %v4897_v15 = vpop.eup %4896  ;;  %4904 = vpow2.f32 %v3143_v7  ;;  %v3158_v18 = vsel %vm402_vm1, %v4895_v6, 0.0 }
0x181d   :  { %3159 = vadd.xlane.f32.xlu0 %v3158_v18  ;;  %v3155_v50 = vsel %vm402_vm1, %v4897_v15, 0.0 }
0x181e   :  { %3156 = vadd.xlane.f32.xlu1 %v3155_v50 }
0x1823   :  { %v4899_v24 = vpop.eup %4898 }
0x1824   :  { %v4901_v51 = vpop.eup %4900  ;;  %v3176_v22 = vsel %vm402_vm1, %v4899_v24, 0.0 }
0x1825   :  { %v4903_v52 = vpop.eup %4902  ;;  %3177 = vadd.xlane.f32.xlu0 %v3176_v22  ;;  %v3173_v63 = vsel %vm402_vm1, %v4901_v51, 0.0 }
0x1826   :  { %v4905_v60 = vpop.eup %4904  ;;  %3174 = vadd.xlane.f32.xlu1 %v3173_v63  ;;  %v3164_v53 = vsel %vm402_vm1, %v4903_v52, 0.0 }
0x1827   :  { %v3161_v54 = vsel %vm402_vm1, %v4905_v60, 0.0 }
0x1829   :  { %3165 = vadd.xlane.f32.xlu0 %v3164_v53 }
0x182a   :  { %3162 = vadd.xlane.f32.xlu1 %v3161_v54 }
0x183b   :  { %3195 = vrot.lane.b32.xlu1 %v5748_v42, %s6098_s25 }
0x183f   :  { %3295 = vrot.lane.b32.xlu0 %v5746_v41, %s6098_s25 }
0x18a6   :  { %v3172_v48 = vpop.xlane.xlu0 %3171 }
0x18a7   :  { %v3169_v47 = vpop.xlane.xlu1 %3168 }
0x18a8   :  { %4906 = vrcp.f32 %v3169_v47 }
0x18aa   :  { %v3160_v56 = vpop.xlane.xlu0 %3159 }
0x18ab   :  { %v3157_v55 = vpop.xlane.xlu1 %3156 }
0x18ac   :  { %4908 = vrcp.f32 %v3157_v55 }
0x18ad   :  { %4910 = vrcp.f32 %v3172_v48 }
0x18ae   :  { %4912 = vrcp.f32 %v3160_v56 }
0x18b2   :  { %v4907_v57 = vpop.eup %4906  ;;  %v3178_v58 = vpop.xlane.xlu0 %3177 }
0x18b3   :  { %4914 = vrcp.f32 %v3178_v58  ;;  %v3175_v59 = vpop.xlane.xlu1 %3174  ;;  %v3191_v62 = vmul.f32 %v4907_v57, %v4893_v46 }
0x18b4   :  { %4916 = vrcp.f32 %v3175_v59 }
0x18b5   :  { %4574 = vmatprep.mubr.msk.f32.mxu0 %vm402_vm1, %v3191_v62 }
0x18b6   :  { %v4909_v42 = vpop.eup %4908  ;;  %v3166_v2 = vpop.xlane.xlu0 %3165 }
0x18b7   :  { %4918 = vrcp.f32 %v3166_v2  ;;  %v3163_v41 = vpop.xlane.xlu1 %3162  ;;  %v3187_v4 = vmul.f32 %v4909_v42, %v4897_v15  ;;  %v4911_v8 = vpop.eup %4910 }
0x18b8   :  { %4920 = vrcp.f32 %v3163_v41  ;;  %v4913_v13 = vpop.eup %4912  ;;  %v3192_v20 = vmul.f32 %v4911_v8, %v4891_v17 }
0x18b9   :  { %4566 = vmatprep.mubr.msk.f32.mxu1 %vm402_vm1, %v3187_v4  ;;  %v3188_v27 = vmul.f32 %v4913_v13, %v4895_v6  ;;  %v4080_v13 = vld [vmem:[%s6102_s29 + $0x48] sm:$0xff] }
0x18ba   :  { %v3296_v19 = vpop.permute.xlu0 %3295 }
0x18bb   :  { %4572 = vmatprep.subr.mxu0 %v3296_v19  ;;  %v3196_v25 = vpop.permute.xlu1 %3195 }
0x18bc   :  { %4564 = vmatprep.subr.mxu1 %v3196_v25  ;;  %4573 = vmatpush3.msra.mxu0 %v3296_v19  ;;  %v4082_v19 = vld [vmem:[%s6102_s29 + $0x58] sm:$0xff] }
0x18bd   :  { %v4915_v29 = vpop.eup %4914  ;;  %4565 = vmatpush3.msra.mxu1 %v3196_v25  ;;  %4575 = vmatmul.mubr.msk.f32.vlgmr.msra.gmra.mrb[40].mxu0 %vm402_vm1, %v3192_v20  ;;  %v4722_v20 = vpack.c.bf16 %v4082_v19, %v4080_v13  ;;  %v4079_v25 = vld [vmem:[%s6102_s29 + $0x40] sm:$0xff] }
0x18be   :  { %v4917_v30 = vpop.eup %4916  ;;  %4567 = vmatmul.mubr.msk.f32.vlgmr.msra.gmra.mrb[42].mxu1 %vm402_vm1, %v3188_v27  ;;  %v3194_v32 = vmul.f32 %v4915_v29, %v4899_v24  ;;  %4715 = vmatprep.subr.bf16.mxu1 %v4714_v16  ;;  %v4081_v27 = vld [vmem:[%s6102_s29 + $0x50] sm:$0xff]  ;;  %v4077_v19 = vld [vmem:[%s6040_s15 + $0x1] ss:$0 sm:$0xff] }
0x18bf   :  { %v3193_v31 = vmul.f32 %v4917_v30, %v4901_v51  ;;  %4717 = vmatpush3.bf16.msra.mxu1 %v4714_v16  ;;  %v4724_v29 = vpack.c.bf16 %v4081_v27, %v4079_v25  ;;  %4723 = vmatprep.subr.bf16.mxu0 %v4722_v20  ;;  %v4084_v30 = vld [vmem:[%s6102_s29 + $0x68] sm:$0xff]  ;;  %v4078_v27 = vld [vmem:[%s6041_s16 + $0x1] ss:$0 sm:$0xff] }
0x18c0   :  { %4719 = vmatprep.subr.bf16.mxu1 %v4718_v12 }
0x18c1   :  { %v4919_v33 = vpop.eup %4918  ;;  %4577 = vmatprep.mubr.msk.f32.mxu0 %vm402_vm1, %v3193_v31  ;;  %4725 = vmatpush1.bf16.msra.mxu0 %v4724_v29  ;;  %v4086_v31 = vld [vmem:[%s6102_s29 + $0x78] sm:$0xff] }
0x18c2   :  { %v4921_v34 = vpop.eup %4920  ;;  %4578 = vmatmul.mubr.msk.f32.gmra.mrb[42].mxu0 %vm402_vm1, %v3194_v32  ;;  %v3190_v36 = vmul.f32 %v4919_v33, %v4903_v52  ;;  %v4726_v32 = vpack.c.bf16 %v4086_v31, %v4084_v30  ;;  %v4083_v33 = vld [vmem:[%s6102_s29 + $0x60] sm:$0xff] }
0x18c3   :  { %v3189_v35 = vmul.f32 %v4921_v34, %v4905_v60  ;;  %3643 = vmatprep.mubr.f32.mxu0 %v4962_v61  ;;  %4721 = vmatpush3.bf16.msra.mxu1 %v4718_v12  ;;  %v4085_v34 = vld [vmem:[%s6102_s29 + $0x70] sm:$0xff]  ;;  %v4109_v12 = vld [vmem:[%s6046_s21 + $0x198] sm:$0xff]  ;;  %s6104_s29 = sld [smem:[#allocation19_spill]] }
0x18c4   :  { %4727 = vmatprep.subr.bf16.mxu0 %v4726_v32 }
0x18c5   :  { %4569 = vmatprep.mubr.msk.f32.mxu1 %vm402_vm1, %v3189_v35  ;;  %v4728_v35 = vpack.c.bf16 %v4085_v34, %v4083_v33  ;;  %v4120_v34 = vld [vmem:[%s6046_s21 + $0x1f0] sm:$0xff] }
0x18c6   :  { %4570 = vmatmul.mubr.msk.f32.gmra.mrb[44].mxu1 %vm402_vm1, %v3190_v36  ;;  %v4106_v36 = vld [vmem:[%s6046_s21 + $0x180] sm:$0xff] }
0x18c7   :  { %4729 = vmatpush1.bf16.msra.mxu0 %v4728_v35  ;;  %v4730_v16 = vpack.c.bf16 %v4107_v39, %v4106_v36  ;;  %v4104_v36 = vld [vmem:[%s6046_s21 + $0x170] sm:$0xff]  ;;  %v4105_v39 = vld [vmem:[%s6046_s21 + $0x178] sm:$0xff] }
0x18c9   :  { %4731 = vmatprep.subr.bf16.mxu1 %v4730_v16  ;;  %v4087_v16 = vld [vmem:[%s6045_s20 + $0x2] sm:$0x3] }
0x1990   :  { %v4576_v14 = vpop.f32.mrb[40].mxu0 }
0x1991   :  { %v3400_v44 = vmul.f32 %v5604_v23, %v4576_v14  ;;  %v4568_v17 = vpop.f32.mrb[42].mxu1  ;;  %v3376_v21 = vpop.f32.mrb[41].mxu0  ;;  %v4732_v14 = vpack.c.bf16 %v4091_v43, %v4090_v40  ;;  %v4760_v40 = vpack.c.bf16 %v4105_v39, %v4104_v36  ;;  %v3566_v43 = vrot.slane %v4087_v16, %v1696_v1 }
0x1992   :  { %v3396_v45 = vmul.f32 %v5604_v23, %v4568_v17  ;;  %v3399_v46 = vmul.f32 %v5593_v10, %v3376_v21  ;;  %v3276_v7 = vpop.f32.mrb[43].mxu1  ;;  %v4092_v17 = vld [vmem:[%s6046_s21 + $0x110] sm:$0xff]  ;;  %v4093_v21 = vld [vmem:[%s6046_s21 + $0x118] sm:$0xff] }
0x1993   :  { %v3395_v5 = vmul.f32 %v5593_v10, %v3276_v7  ;;  %v4072_v10 = vld [vmem:[%s6101_s5 + $0x1] ss:$0 sm:$0xff]  ;;  %v4736_v7 = vpack.c.bf16 %v4093_v21, %v4092_v17 }
0x1994   :  { %v3404_v49 = vadd.f32 %v3400_v44, %v3399_v46  ;;  %v4734_v44 = vpack.c.bf16 %v4109_v12, %v4108_v11  ;;  %v4111_v46 = vld [vmem:[%s6046_s21 + $0x1a8] sm:$0xff]  ;;  %v3570_v11 = vrot.slane %v4087_v16, %v1700_v3 }
0x1995   :  { %v3403_v9 = vadd.f32 %v3396_v45, %v3395_v5  ;;  %v4579_v6 = vpop.f32.mrb[42].mxu0  ;;  %v4110_v45 = vld [vmem:[%s6046_s21 + $0x1a0] sm:$0xff] }
0x1996   :  { %v3386_v15 = vpop.f32.mrb[43].mxu0  ;;  %v3402_v50 = vmul.f32 %v5621_v28, %v4579_v6  ;;  %v4738_v5 = vpack.c.bf16 %v4111_v46, %v4110_v45  ;;  %v4112_v6 = vld [vmem:[%s6046_s21 + $0x1b0] sm:$0xff] }
0x1997   :  { %v3401_v18 = vmul.f32 %v5611_v26, %v3386_v15  ;;  %v4113_v15 = vld [vmem:[%s6046_s21 + $0x1b8] sm:$0xff] }
0x1999   :  { %v3406_v24 = vadd.f32 %v3404_v49, %v3401_v18  ;;  %v4571_v51 = vpop.f32.mrb[44].mxu1  ;;  %v4094_v49 = vld [vmem:[%s6046_s21 + $0x120] sm:$0xff] }
0x199a   :  { %v3286_v22 = vpop.f32.mrb[45].mxu1  ;;  %v3398_v23 = vmul.f32 %v5621_v28, %v4571_v51  ;;  %v4097_v51 = vld [vmem:[%s6046_s21 + $0x138] sm:$0xff] }
0x199b   :  { %v3408_v52 = vadd.f32 %v3406_v24, %v3402_v50  ;;  %v3397_v63 = vmul.f32 %v5611_v26, %v3286_v22  ;;  %v4742_v50 = vpack.c.bf16 %v4113_v15, %v4112_v6  ;;  %v4096_v24 = vld [vmem:[%s6046_s21 + $0x130] sm:$0xff]  ;;  %v4114_v22 = vld [vmem:[%s6046_s21 + $0x1c0] sm:$0xff] }
0x199d   :  { %v3405_v60 = vadd.f32 %v3403_v9, %v3397_v63  ;;  %v4095_v9 = vld [vmem:[%s6046_s21 + $0x128] sm:$0xff]  ;;  %v4744_v63 = vpack.c.bf16 %v4097_v51, %v4096_v24 }
0x199e   :  { %v4740_v18 = vpack.c.bf16 %v4095_v9, %v4094_v49 }
0x199f   :  { %v3407_v53 = vadd.f32 %v3405_v60, %v3398_v23  ;;  %v4098_v60 = vld [vmem:[%s6046_s21 + $0x140] sm:$0xff] }
0x19a1   :  { %4588 = vmatprep.mubr.msk.f32.mxu1 %vm100_vm0, %v3407_v53  ;;  %v4099_v53 = vld [vmem:[%s6046_s21 + $0x148] sm:$0xff] }
0x19a2   :  { %4589 = vmatmul.mubr.msk.f32.vlgmr.msra.gmra.mrb[46].mxu1 %vm100_vm0, %v3408_v52  ;;  %v4115_v52 = vld [vmem:[%s6046_s21 + $0x1c8] sm:$0xff] }
0x19a3   :  { %4733 = vmatpush3.bf16.msra.mxu1 %v4732_v14  ;;  %v4746_v23 = vpack.c.bf16 %v4115_v52, %v4114_v22 }
0x19a4   :  { %4735 = vmatprep.subr.bf16.mxu1 %v4734_v44 }
0x19a7   :  { %4737 = vmatpush3.bf16.msra.mxu1 %v4736_v7 }
0x19a8   :  { %4739 = vmatprep.subr.bf16.mxu1 %v4738_v5 }
0x19ab   :  { %4741 = vmatpush3.bf16.msra.mxu1 %v4740_v18 }
0x19ac   :  { %4743 = vmatprep.subr.bf16.mxu1 %v4742_v50 }
0x19af   :  { %4745 = vmatpush3.bf16.msra.mxu1 %v4744_v63 }
0x19b0   :  { %4747 = vmatprep.subr.bf16.mxu1 %v4746_v23 }
0x1a75   :  { %v4590_v54 = vpop.f32.mrb[46].mxu1 }
0x1a76   :  { %v3500_v48 = vadd.f32 %v4590_v54, %v4072_v10  ;;  %v3494_v47 = vpop.f32.mrb[47].mxu1  ;;  %v4117_v54 = vld [vmem:[%s6046_s21 + $0x1d8] sm:$0xff] }
0x1a77   :  { %v3495_v55 = vadd.f32 %v4072_v10, %v3494_v47  ;;  %v4116_v10 = vld [vmem:[%s6046_s21 + $0x1d0] sm:$0xff] }
0x1a78   :  { %v3504_v56 = vadd.f32 %v3500_v48, %v5737_v38  ;;  %v4748_v48 = vpack.c.bf16 %v4099_v53, %v4098_v60  ;;  %v4750_v47 = vpack.c.bf16 %v4117_v54, %v4116_v10 }
0x1a79   :  { %v3503_v26 = vadd.f32 %v3495_v55, %v5735_v37  ;;  %v4100_v55 = vld [vmem:[%s6046_s21 + $0x150] sm:$0xff] }
0x1a7a   :  { %v3512_v28 = vsel %vm100_vm0, %v3504_v56, 0.0  ;;  %4749 = vmatpush3.bf16.msra.mxu1 %v4748_v48 }
0x1a7b   :  { %3513 = vadd.xlane.f32.xlu0 %v3512_v28  ;;  %v3509_v57 = vsel %vm100_vm0, %v3503_v26, 0.0  ;;  %v4119_v28 = vld [vmem:[%s6046_s21 + $0x1e8] sm:$0xff]  ;;  %4751 = vmatprep.subr.bf16.mxu1 %v4750_v47 }
0x1a7c   :  { %3510 = vadd.xlane.f32.xlu1 %v3509_v57 }
0x1b08   :  { %v3514_v58 = vpop.xlane.xlu0 %3513 }
0x1b09   :  { %v3516_v59 = vmul.f32 0.03125, %v3514_v58  ;;  %v3511_v62 = vpop.xlane.xlu1 %3510 }
0x1b0a   :  { %v3515_v42 = vmul.f32 0.03125, %v3511_v62 }
0x1b0b   :  { %v5835_v2 = vsub.f32 %v3504_v56, %v3516_v59  ;;  %v4101_v56 = vld [vmem:[%s6046_s21 + $0x158] sm:$0xff] }
0x1b0c   :  { %v5837_v41 = vsub.f32 %v3503_v26, %v3515_v42  ;;  %v4118_v26 = vld [vmem:[%s6046_s21 + $0x1e0] sm:$0xff]  ;;  %v4752_v57 = vpack.c.bf16 %v4101_v56, %v4100_v55 }
0x1b0d   :  { %v3520_v4 = vmul.f32 %v5835_v2, %v5835_v2  ;;  %v4754_v58 = vpack.c.bf16 %v4119_v28, %v4118_v26 }
0x1b0e   :  { %v3519_v37 = vmul.f32 %v5837_v41, %v5837_v41  ;;  %4753 = vmatpush3.bf16.msra.mxu1 %v4752_v57 }
0x1b0f   :  { %v3524_v38 = vsel %vm100_vm0, %v3520_v4, 0.0  ;;  %4755 = vmatprep.subr.bf16.mxu1 %v4754_v58  ;;  %v3824_v58 = vld [vmem:[%s6103_s27] sm:$0xff] }
0x1b10   :  { %3525 = vadd.xlane.f32.xlu0 %v3524_v38  ;;  %v3521_v8 = vsel %vm100_vm0, %v3519_v37, 0.0 }
0x1b11   :  { %3522 = vadd.xlane.f32.xlu1 %v3521_v8 }
0x1b9d   :  { %v3526_v59 = vpop.xlane.xlu0 %3525 }
0x1b9e   :  { %v3528_v62 = vmul.f32 0.03125, %v3526_v59  ;;  %v3523_v42 = vpop.xlane.xlu1 %3522  ;;  %v3825_v59 = vld [vmem:[%s6103_s27 + $0x8] sm:$0xff] }
0x1b9f   :  { %v3527_v4 = vmul.f32 0.03125, %v3523_v42  ;;  %v3826_v42 = vld [vmem:[%s6103_s27 + $0x10] sm:$0xff] }
0x1ba0   :  { %v3530_v37 = vadd.f32 1e-05, %v3528_v62  ;;  %v4762_v62 = vpack.c.bf16 %v3825_v59, %v3824_v58 }
0x1ba1   :  { %v3529_v38 = vadd.f32 1e-05, %v3527_v4  ;;  %v3827_v4 = vld [vmem:[%s6103_s27 + $0x18] sm:$0xff] }
0x1ba2   :  { %4922 = vrsqrt.f32 %v3530_v37  ;;  %4763 = vmatprep.subr.bf16.mxu0 %v4762_v62  ;;  %v4766_v37 = vpack.c.bf16 %v3827_v4, %v3826_v42 }
0x1ba3   :  { %4924 = vrsqrt.f32 %v3529_v38 }
0x1bac   :  { %v4923_v8 = vpop.eup %4922 }
0x1bad   :  { %v4925_v13 = vpop.eup %4924  ;;  %v3534_v25 = vmul.f32 %v4923_v8, %v5835_v2  ;;  %v4103_v2 = vld [vmem:[%s6046_s21 + $0x168] sm:$0xff] }
0x1bae   :  { %v3533_v20 = vmul.f32 %v4925_v13, %v5837_v41  ;;  %v4102_v41 = vld [vmem:[%s6046_s21 + $0x160] sm:$0xff] }
0x1baf   :  { %v3542_v31 = vmul.f32 %v4077_v19, %v3534_v25  ;;  %v4756_v33 = vpack.c.bf16 %v4103_v2, %v4102_v41 }
0x1bb0   :  { %v3541_v29 = vmul.f32 %v4077_v19, %v3533_v20 }
0x1bb1   :  { %v3550_v32 = vadd.f32 %v4078_v27, %v3542_v31  ;;  %4757 = vmatpush3.bf16.msra.mxu1 %v4756_v33  ;;  %v4127_v31 = vld [vmem:[%s6043_s18 + $0x1] ss:$0 sm:$0xff] }
0x1bb2   :  { %v3549_v30 = vadd.f32 %v4078_v27, %v3541_v29  ;;  %v4126_v29 = vld [vmem:[%s6042_s17 + $0x1] ss:$0 sm:$0xff]  ;;  %s4963_s17 = smov [#allocation2]  }
0x1bb3   :  { %s3924_s7 = sshll.u32 %s4963_s17, 4  ;;  %s3925_s7 = int_to_ptr.vmem [resolvable:$true] %s3924_s7 }
0x1bb4   :  { %4088 = vmatmul.mubr.msk.f32.vlgmr.msra.gmra.mrb[44].mxu0 %vm100_vm0, %v3549_v30  ;;  %s4936_s18 = scalar_lea.vmem %s3925_s7, 256  ;;  %p4941_p1 = scmp.lt.s32.totalorder %s3925_s7, %s3925_s7 }
0x1bb5   :  { %3649 = vmatprep.mubr.f32.mxu0 %v4962_v61  ;;  %v4121_v61 = vld [vmem:[%s6046_s21 + $0x1f8] sm:$0xff]  ;;  %4765 = vmatpush3.bf16.msra.mxu0 %v4762_v62  ;;  %p4937_p0 = scmp.ne.s32.totalorder %s3925_s7, %s4936_s18  ;;  %p4942_p2 = scmp.lt.s32.totalorder %s4936_s18, %s4936_s18 }
0x1bb6   :  { %v4758_v35 = vpack.c.bf16 %v4121_v61, %v4120_v34  ;;  %4767 = vmatprep.subr.bf16.mxu0 %v4766_v37 }
0x1bb7   :  { %p4943_p3 = por %p4942_p2, %p4941_p1 }
0x1bb8   :  { %4089 = vmatmul.mubr.msk.f32.gmra.mrb[46].mxu0 %vm100_vm0, %v3550_v32  ;;  %4759 = vmatprep.subr.bf16.mxu1 %v4758_v35  ;;  %v4128_v35 = vld [vmem:[%s6104_s29] ss:$0 sm:$0xff] }
0x1bb9   :  { %4761 = vmatpush3.bf16.msra.mxu1 %v4760_v40  ;;  %4769 = vmatpush3.bf16.msra.mxu0 %v4766_v37  ;;  %p4944_p4 = pnand %p4943_p3, %p4937_p0 }
0x1c87   :  { %v3645_v12 = vpop.f32.mrb[44].mxu0 }
0x1c88   :  { %v3646_v14 = vadd.f32 %v3645_v12, %v3566_v43  ;;  %v3647_v44 = vpop.f32.mrb[45].mxu0 }
0x1c89   :  { %v3648_v17 = vadd.f32 %v3647_v44, %v3570_v11 }
0x1c8a   :  { %v3656_v46 = vmax.f32 %v3646_v14, 0.0 }
0x1c8b   :  { %v3657_v21 = vmax.f32 %v3648_v17, 0.0  ;;  %v3651_v45 = vpop.f32.mrb[46].mxu0 }
0x1c8c   :  { %v3652_v7 = vadd.f32 %v3651_v45, %v3566_v43  ;;  %v3653_v5 = vpop.f32.mrb[47].mxu0 }
0x1c8d   :  { %v3654_v49 = vadd.f32 %v3653_v5, %v3570_v11  ;;  %3765 = vmatprep.mubr.f32.mxu1 %v3657_v21 }
0x1c8e   :  { %3766 = vmatmul.mubr.f32.vlgmr.msra.gmra.mrb[48].mxu1 %v3656_v46  ;;  %v3658_v6 = vmax.f32 %v3652_v7, 0.0 }
0x1c8f   :  { %v3659_v9 = vmax.f32 %v3654_v49, 0.0 }
0x1c91   :  { %3770 = vmatprep.mubr.f32.mxu1 %v3659_v9 }
0x1c92   :  { %3771 = vmatmul.mubr.f32.gmra.mrb[50].mxu1 %v3658_v6 }
0x1d61   :  { %v4341_v1 = vpop.f32.mrb[48].mxu1 }
0x1d62   :  { %v4342_v3 = vpop.f32.mrb[49].mxu1 }
0x1d63   :  { %v4343_v15 = vadd.f32 %v4342_v3, %v4341_v1 }
0x1d65   :  { %v3768_v18 = vadd.f32 %v4343_v15, %v4123_v0  ;;  %v4344_v50 = vpop.f32.mrb[50].mxu1 }
0x1d66   :  { %v4345_v24 = vpop.f32.mrb[51].mxu1 }
0x1d67   :  { %v4346_v51 = vadd.f32 %v4345_v24, %v4344_v50  ;;  %v3776_v22 = vadd.f32 %v3768_v18, %v3549_v30 }
0x1d69   :  { %v3773_v52 = vadd.f32 %v4346_v51, %v4123_v0  ;;  %v3782_v63 = vsel %vm100_vm0, %v3776_v22, 0.0 }
0x1d6a   :  { %3783 = vadd.xlane.f32.xlu1 %v3782_v63 }
0x1d6b   :  { %v3777_v23 = vadd.f32 %v3773_v52, %v3550_v32 }
0x1d6d   :  { %v3785_v60 = vsel %vm100_vm0, %v3777_v23, 0.0 }
0x1d6e   :  { %3786 = vadd.xlane.f32.xlu0 %v3785_v60 }
0x1df7   :  { %v3784_v53 = vpop.xlane.xlu1 %3783 }
0x1df8   :  { %v3788_v10 = vmul.f32 0.03125, %v3784_v53 }
0x1dfa   :  { %v3790_v54 = vsub.f32 %v3776_v22, %v3788_v10 }
0x1dfb   :  { %v3787_v48 = vpop.xlane.xlu0 %3786 }
0x1dfc   :  { %v3789_v47 = vmul.f32 0.03125, %v3787_v48  ;;  %v3792_v55 = vmul.f32 %v3790_v54, %v3790_v54 }
0x1dfe   :  { %v3791_v56 = vsub.f32 %v3777_v23, %v3789_v47  ;;  %v3794_v26 = vsel %vm100_vm0, %v3792_v55, 0.0 }
0x1dff   :  { %3795 = vadd.xlane.f32.xlu1 %v3794_v26 }
0x1e00   :  { %v3793_v28 = vmul.f32 %v3791_v56, %v3791_v56 }
0x1e02   :  { %v3797_v57 = vsel %vm100_vm0, %v3793_v28, 0.0 }
0x1e03   :  { %3798 = vadd.xlane.f32.xlu0 %v3797_v57 }
0x1e8c   :  { %v3796_v38 = vpop.xlane.xlu1 %3795 }
0x1e8d   :  { %v3800_v8 = vmul.f32 0.03125, %v3796_v38 }
0x1e8f   :  { %v3802_v13 = vadd.f32 1e-05, %v3800_v8 }
0x1e90   :  { %v3799_v19 = vpop.xlane.xlu0 %3798 }
0x1e91   :  { %4926 = vrsqrt.f32 %v3802_v13  ;;  %v3801_v20 = vmul.f32 0.03125, %v3799_v19 }
0x1e93   :  { %v3803_v25 = vadd.f32 1e-05, %v3801_v20 }
0x1e95   :  { %4928 = vrsqrt.f32 %v3803_v25 }
0x1e9b   :  { %v4927_v27 = vpop.eup %4926 }
0x1e9c   :  { %v3806_v30 = vmul.f32 %v4927_v27, %v3790_v54 }
0x1e9e   :  { %v3814_v32 = vmul.f32 %v4126_v29, %v3806_v30 }
0x1e9f   :  { %v4929_v41 = vpop.eup %4928 }
0x1ea0   :  { %v3807_v2 = vmul.f32 %v4929_v41, %v3791_v56  ;;  %v3822_v33 = vadd.f32 %v4127_v31, %v3814_v32 }
0x1ea2   :  { %v3815_v34 = vmul.f32 %v4126_v29, %v3807_v2  ;;  %4599 = vmatprep.mubr.msk.f32.mxu0 %vm100_vm0, %v3822_v33 }
0x1ea4   :  { %v3823_v61 = vadd.f32 %v4127_v31, %v3815_v34 }
0x1ea6   :  { %4600 = vmatmul.mubr.msk.f32.vlgmr.msra.gmra.mrb[48].mxu0 %vm100_vm0, %v3823_v61 }
0x1f79   :  { %v4601_v36 = vpop.f32.mrb[48].mxu0 }
0x1f7a   :  { %v3913_v39 = vadd.f32 %v4601_v36, %v4128_v35  ;;  %v3907_v40 = vpop.f32.mrb[49].mxu0 }
0x1f7b   :  { %v3908_v16 = vadd.f32 %v4128_v35, %v3907_v40 }
0x1f7c   :  { %3918 = vst.msk [vmem:[#allocation2 + $0x8] sm:$0xff] %vm3916_vm2, %v3913_v39 }
0x1f7d   :  { %3917 = vst.msk [vmem:[#allocation2] sm:$0xff] %vm3916_vm2, %v3908_v16 }
0x1f7e   :  { %4947 = shalt.err (!%p4944_p4)
}
0x1f7f   :  { %s6105_s0 = sld [smem:[#allocation20_spill]] }
0x1f85   :  { %s4948_s1 = scalar_lea.hbm %s6105_s0, 256 }
0x1f86   :  { %p4949_p5 = scmp.ne.s32.totalorder %s6105_s0, %s4948_s1  ;;  %p4952_p6 = scmp.lt.u32.totalorder %s4948_s1, %s6105_s0 }
0x1f88   :  { %p4954_p7 = pnand %p4952_p6, %p4949_p5 }
0x1f8a   :  { %4957 = shalt.err (!%p4954_p7)
}
0x1f8b   :  { %s4964_s10 = smov 128   ;;  %s4965_s24 = smov 8  }
0x1f8c   :  { %3930 = dma.vmem_to_hbm [thread:$0]  %s3925_s7, 256, %s6105_s0, [#allocation3], %s4964_s10, %s4964_s10, %s4965_s24  }
0x1f8d   :  { %4958 = dma.done.wait [#allocation3], 256  }
0x1f8e   :  { %4959 = vsyncadd [#allocation3], 4294967040 }
0x1f8f   :  { %3934 = vsyncpa [#allocation3], 1 }

</bundles_post_ra>
